<compile_context>
chip_gen: v7x
topology: tpu7x:2x2x1
jax: 0.10.0
libtpu: 0.0.40
codegen_flags: <defaults>
</compile_context>

<pallas_src>
import functools
import math

import jax
import jax.numpy as jnp
from jax import lax
from jax.experimental import pallas as pl
from jax.experimental.pallas import tpu as pltpu

LN_EPS = 1e-5
MATMUL_DTYPE = jnp.bfloat16        # MXU operand dtype (accumulation is f32)
_MIB = 1024 * 1024


# ----------------------------------------------------------------------------
# hardware-aware knobs
# ----------------------------------------------------------------------------
@functools.lru_cache(maxsize=None)
def _vmem_capacity_bytes():
    try:
        cap = getattr(pltpu.get_tpu_info(), "vmem_capacity_bytes", None)
        if cap:
            return int(cap)
    except Exception:
        pass
    try:
        kind = jax.devices()[0].device_kind.lower()
    except Exception:
        kind = ""
    return 64 * _MIB if "v7" in kind else 128 * _MIB


@functools.lru_cache(maxsize=None)
def _vmem_limit_bytes():
    # ~16 MiB headroom for Mosaic internal scratch / pipeline bookkeeping:
    #   -> ~48 MiB on v7x (64 MiB physical), 112 MiB on v5e/v6e (128 MiB).
    return int(min(_vmem_capacity_bytes() - 16 * _MIB, 112 * _MIB))


def _tile_cap():
    # Bigger activation tiles on the 128-MiB-VMEM parts (v5e/v6e).
    return 512 if _vmem_limit_bytes() >= 96 * _MIB else 256


def _round_up(x, m):
    return -(-x // m) * m


def _pad_plan(t):
    """Return (tile, padded_len) for a valid sequence length t (tile | padded)."""
    cap = _tile_cap()
    if t <= cap:
        tile = _round_up(t, 8)
        return tile, tile
    return cap, _round_up(t, cap)


def _tile_for(t_padded):
    """Largest convenient tile dividing an already-padded length."""
    cap = _tile_cap()
    if t_padded <= cap:
        return t_padded
    if t_padded % cap == 0:
        return cap
    for d in range(cap - cap % 8, 7, -8):
        if t_padded % d == 0:
            return d
    return t_padded


def _mlp_chunk(m_dim, cap=2048):
    """Chunk of the MLP hidden dim resident per grid step (bounds VMEM + the
    live range of the (tq, chunk) f32 GELU intermediate)."""
    if m_dim <= cap:
        return m_dim
    d = cap - cap % 128
    while d >= 128:
        if m_dim % d == 0:
            return d
        d -= 128
    return m_dim


def _compiler_params(semantics):
    return pltpu.CompilerParams(dimension_semantics=tuple(semantics),
                                vmem_limit_bytes=_vmem_limit_bytes())


def _const_spec(shape, single_buffer):
    """BlockSpec for operands identical at every grid step (weights/biases)."""
    idx = lambda *_: (0,) * len(shape)
    if single_buffer:
        # Constant across the grid -> double buffering buys nothing; halve VMEM.
        return pl.BlockSpec(shape, idx, pipeline_mode=pl.Buffered(1))
    return pl.BlockSpec(shape, idx)


def buffered1_supported():
    """Explicit probe for pl.Buffered(1) weight specs (no silent 2x-VMEM fallback)."""
    def k(x_ref, w_ref, o_ref):
        o_ref[...] = x_ref[...] + w_ref[...]
    try:
        f = pl.pallas_call(
            k, out_shape=jax.ShapeDtypeStruct((8, 128), jnp.float32),
            grid_spec=pltpu.PrefetchScalarGridSpec(
                num_scalar_prefetch=0, grid=(1,),
                in_specs=[pl.BlockSpec((8, 128), lambda i: (0, 0)),
                          pl.BlockSpec((8, 128), lambda i: (0, 0),
                                       pipeline_mode=pl.Buffered(1))],
                out_specs=pl.BlockSpec((8, 128), lambda i: (0, 0))))
        z = jnp.zeros((8, 128), jnp.float32)
        jax.jit(f).lower(z, z).compile()
        return True
    except Exception:
        return False


# ----------------------------------------------------------------------------
# kernel bodies
# ----------------------------------------------------------------------------
def _conv3_gelu_kernel(*refs, add_pos):
    # Conv1d(k=3) expressed as 3 shifted matmuls; GELU (+ optional pos add).
    if add_pos:
        x0_ref, x1_ref, x2_ref, w_ref, b_ref, pos_ref, o_ref = refs
    else:
        x0_ref, x1_ref, x2_ref, w_ref, b_ref, o_ref = refs
        pos_ref = None
    acc = jnp.dot(x0_ref[0], w_ref[0], preferred_element_type=jnp.float32)
    acc += jnp.dot(x1_ref[0], w_ref[1], preferred_element_type=jnp.float32)
    acc += jnp.dot(x2_ref[0], w_ref[2], preferred_element_type=jnp.float32)
    acc += b_ref[...]
    # TODO(synk): nn.GELU() is exact (erf); tanh approximation used for
    # guaranteed Mosaic lowering (reference uses the same approximation).
    acc = jax.nn.gelu(acc, approximate=True)
    if add_pos:
        acc += pos_ref[...]
    o_ref[0] = acc.astype(o_ref.dtype)


def _ln_qkv_kernel(x_ref, g_ref, bln_ref, wq_ref, bq_ref, wk_ref, wv_ref, bv_ref,
                   q_ref, k_ref, v_ref):
    x = x_ref[0]                                          # (tq, S) f32
    mu = jnp.mean(x, axis=-1, keepdims=True)
    xc = x - mu
    var = jnp.mean(xc * xc, axis=-1, keepdims=True)
    xn = xc * lax.rsqrt(var + LN_EPS)
    xn = xn * g_ref[...] + bln_ref[...]
    xm = xn.astype(wq_ref.dtype)                          # bf16 MXU operand
    q = jnp.dot(xm, wq_ref[...], preferred_element_type=jnp.float32) + bq_ref[...]
    k = jnp.dot(xm, wk_ref[...], preferred_element_type=jnp.float32)
    v = jnp.dot(xm, wv_ref[...], preferred_element_type=jnp.float32) + bv_ref[...]
    q_ref[0] = q.astype(q_ref.dtype)
    k_ref[0] = k.astype(k_ref.dtype)
    v_ref[0] = v.astype(v_ref.dtype)


def _attention_kernel(q_ref, k_ref, v_ref, o_ref, *, n_head, t_valid, t_kv):
    # All heads of one q-tile per grid step; heads are static lane slices of
    # the (tq, S) block, results are concatenated back into a lane-dense slab.
    q = q_ref[0]                                          # (tq, S) bf16, q-scale pre-folded
    k = k_ref[0]                                          # (T_pad, S) bf16
    v = v_ref[0]                                          # (T_pad, S) bf16
    d_head = q.shape[-1] // n_head
    if t_valid < t_kv:                                    # mask padded kv rows
        kv_ids = lax.broadcasted_iota(jnp.int32, (1, t_kv), 1)
        bias = jnp.where(kv_ids < t_valid, 0.0, -1e30).astype(jnp.float32)
    else:
        bias = None
    outs = []
    for h in range(n_head):
        sl = slice(h * d_head, (h + 1) * d_head)
        # contract the head dims of both operands -> no explicit transpose
        s = lax.dot_general(q[:, sl], k[:, sl], (((1,), (1,)), ((), ())),
                            preferred_element_type=jnp.float32)   # (tq, T_pad)
        if bias is not None:
            s = s + bias
        m = jnp.max(s, axis=-1, keepdims=True)
        e = jnp.exp(s - m)
        p = e * pl.reciprocal(jnp.sum(e, axis=-1, keepdims=True), approx=True)
        outs.append(jnp.dot(p.astype(v.dtype), v[:, sl],
                            preferred_element_type=jnp.float32))  # (tq, D)
    o_ref[0] = jnp.concatenate(outs, axis=-1).astype(o_ref.dtype)


def _proj_mlp_kernel(x_ref, a_ref, wo_ref, bo_ref, g2_ref, b2_ref,
                     w1_ref, b1_ref, w2_ref, b2m_ref, o_ref, h_acc, hn_scr):
    # grid = (batch, q-tile, mlp-chunk); last axis is an "arbitrary" reduction.
    m = pl.program_id(2)

    @pl.when(m == 0)
    def _():
        x = x_ref[0]                                      # residual stream, f32
        a = a_ref[0]                                      # attention output, bf16
        h = x + jnp.dot(a, wo_ref[...], preferred_element_type=jnp.float32) + bo_ref[...]
        mu = jnp.mean(h, axis=-1, keepdims=True)
        hc = h - mu
        var = jnp.mean(hc * hc, axis=-1, keepdims=True)
        hn = hc * lax.rsqrt(var + LN_EPS) * g2_ref[...] + b2_ref[...]
        hn_scr[...] = hn.astype(hn_scr.dtype)             # bf16 MXU operand
        h_acc[...] = h + b2m_ref[...]                     # residual + final bias

    z = jnp.dot(hn_scr[...], w1_ref[...], preferred_element_type=jnp.float32) + b1_ref[...]
    z = jax.nn.gelu(z, approximate=True)
    h_acc[...] += jnp.dot(z.astype(w2_ref.dtype), w2_ref[...],
                          preferred_element_type=jnp.float32)

    @pl.when(m == pl.num_programs(2) - 1)
    def _():
        o_ref[0] = h_acc[...].astype(o_ref.dtype)


def _layernorm_kernel(x_ref, g_ref, b_ref, o_ref):
    x = x_ref[0]
    mu = jnp.mean(x, axis=-1, keepdims=True)
    xc = x - mu
    var = jnp.mean(xc * xc, axis=-1, keepdims=True)
    o_ref[0] = (xc * lax.rsqrt(var + LN_EPS) * g_ref[...]
                + b_ref[...]).astype(o_ref.dtype)


# ----------------------------------------------------------------------------
# pallas_call wrappers
# ----------------------------------------------------------------------------
def _conv3_gelu(x_btc, w3, b, *, stride, pos, tile, out_dtype, single_buffer):
    """x_btc: (B, T, Cin); w3: (3, Cin, Cout) bf16 -> (B, T_out, Cout) out_dtype."""
    B, T, Cin = x_btc.shape
    Cout = w3.shape[-1]
    T_out = (T + 2 - 3) // stride + 1
    xp = jnp.pad(x_btc.astype(MATMUL_DTYPE), ((0, 0), (1, 1), (0, 0)))
    taps = [xp[:, k:k + stride * (T_out - 1) + 1:stride, :] for k in range(3)]
    assert T_out % tile == 0

    grid = (B, T_out // tile)
    tap_spec = pl.BlockSpec((1, tile, Cin), lambda b_, q_: (b_, q_, 0))
    in_specs = [tap_spec, tap_spec, tap_spec,
                _const_spec((3, Cin, Cout), single_buffer),
                _const_spec((1, Cout), single_buffer)]
    args = taps + [w3, b]
    add_pos = pos is not None
    if add_pos:
        assert pos.shape == (T_out, Cout)
        in_specs.append(pl.BlockSpec((tile, Cout), lambda b_, q_: (q_, 0)))
        args.append(pos)

    return pl.pallas_call(
        functools.partial(_conv3_gelu_kernel, add_pos=add_pos),
        out_shape=jax.ShapeDtypeStruct((B, T_out, Cout), out_dtype),
        grid_spec=pltpu.PrefetchScalarGridSpec(
            num_scalar_prefetch=0, grid=grid,
            in_specs=in_specs,
            out_specs=pl.BlockSpec((1, tile, Cout), lambda b_, q_: (b_, q_, 0))),
        compiler_params=_compiler_params(("parallel", "parallel")),
    )(*args)


def _ln_qkv(x, blk, *, tile, single_buffer):
    B, T, S = x.shape
    grid = (B, T // tile)
    ts_spec = pl.BlockSpec((1, tile, S), lambda b_, q_: (b_, q_, 0))
    row = lambda: _const_spec((1, S), single_buffer)
    wsp = lambda: _const_spec((S, S), single_buffer)
    out_sd = jax.ShapeDtypeStruct((B, T, S), MATMUL_DTYPE)
    return pl.pallas_call(
        _ln_qkv_kernel,
        out_shape=(out_sd, out_sd, out_sd),
        grid_spec=pltpu.PrefetchScalarGridSpec(
            num_scalar_prefetch=0, grid=grid,
            in_specs=[ts_spec, row(), row(), wsp(), row(), wsp(), wsp(), row()],
            out_specs=(ts_spec, ts_spec, ts_spec)),
        compiler_params=_compiler_params(("parallel", "parallel")),
    )(x, blk["ln1_g"], blk["ln1_b"], blk["wq"], blk["bq"],
      blk["wk"], blk["wv"], blk["bv"])


def _attention(q, k, v, *, n_head, t_valid, tile):
    """q/k/v: (B, T_pad, S) bf16 -> (B, T_pad, S) bf16 (heads merged in-kernel)."""
    B, T, S = q.shape
    grid = (B, T // tile)
    q_spec = pl.BlockSpec((1, tile, S), lambda b_, t_: (b_, t_, 0))
    kv_spec = pl.BlockSpec((1, T, S), lambda b_, t_: (b_, 0, 0))   # re-fetched per batch only
    return pl.pallas_call(
        functools.partial(_attention_kernel, n_head=n_head, t_valid=t_valid, t_kv=T),
        out_shape=jax.ShapeDtypeStruct((B, T, S), MATMUL_DTYPE),
        grid_spec=pltpu.PrefetchScalarGridSpec(
            num_scalar_prefetch=0, grid=grid,
            in_specs=[q_spec, kv_spec, kv_spec],
            out_specs=q_spec),
        compiler_params=_compiler_params(("parallel", "parallel")),
    )(q, k, v)


def _proj_mlp(x, attn, blk, *, tile, single_buffer):
    B, T, S = x.shape
    M = blk["w1"].shape[-1]
    tm = _mlp_chunk(M)
    n_m = M // tm
    grid = (B, T // tile, n_m)
    ts_spec = pl.BlockSpec((1, tile, S), lambda b_, q_, m_: (b_, q_, 0))
    if n_m == 1 and single_buffer:
        w1_spec = _const_spec((S, tm), True)
        b1_spec = _const_spec((1, tm), True)
        w2_spec = _const_spec((tm, S), True)
    else:
        w1_spec = pl.BlockSpec((S, tm), lambda b_, q_, m_: (0, m_))
        b1_spec = pl.BlockSpec((1, tm), lambda b_, q_, m_: (0, m_))
        w2_spec = pl.BlockSpec((tm, S), lambda b_, q_, m_: (m_, 0))
    return pl.pallas_call(
        _proj_mlp_kernel,
        out_shape=jax.ShapeDtypeStruct((B, T, S), jnp.float32),
        grid_spec=pltpu.PrefetchScalarGridSpec(
            num_scalar_prefetch=0, grid=grid,
            in_specs=[ts_spec, ts_spec,
                      _const_spec((S, S), single_buffer),
                      _const_spec((1, S), single_buffer),
                      _const_spec((1, S), single_buffer),
                      _const_spec((1, S), single_buffer),
                      w1_spec, b1_spec, w2_spec,
                      _const_spec((1, S), single_buffer)],
            out_specs=ts_spec,
            scratch_shapes=[pltpu.VMEM((tile, S), jnp.float32),
                            pltpu.VMEM((tile, S), MATMUL_DTYPE)]),
        compiler_params=_compiler_params(("parallel", "parallel", "arbitrary")),
    )(x, attn, blk["wo"], blk["bo"], blk["ln2_g"], blk["ln2_b"],
      blk["w1"], blk["b1"], blk["w2"], blk["b2"])


def _final_ln(x, g, b, *, tile, single_buffer):
    B, T, S = x.shape
    grid = (B, T // tile)
    ts_spec = pl.BlockSpec((1, tile, S), lambda b_, q_: (b_, q_, 0))
    return pl.pallas_call(
        _layernorm_kernel,
        out_shape=jax.ShapeDtypeStruct((B, T, S), jnp.float32),
        grid_spec=pltpu.PrefetchScalarGridSpec(
            num_scalar_prefetch=0, grid=grid,
            in_specs=[ts_spec, _const_spec((1, S), single_buffer),
                      _const_spec((1, S), single_buffer)],
            out_specs=ts_spec),
        compiler_params=_compiler_params(("parallel", "parallel")),
    )(x, g, b)


# ----------------------------------------------------------------------------
# full forward
# ----------------------------------------------------------------------------
def audio_encoder_forward(x, params, *, n_head, single_buffer_weights=True):
    """x: (B, n_mels, T_in) f32 -> (B, n_audio_ctx, n_state) f32."""
    sb = single_buffer_weights
    B, _, t_in = x.shape
    t_valid = params["pos"].shape[0]                  # n_audio_ctx
    t2 = (t_in - 1) // 2 + 1                          # conv-stem output length
    assert t2 == t_valid, "input length inconsistent with positional embedding"

    # Pad the time axis so every kernel gets a real 256/512 tile grid.  Zero
    # padding preserves the valid conv rows (the reference conv zero-pads its
    # borders too); padded kv rows are masked out of attention and the output
    # is sliced back to t_valid at the end.
    tq2, t2_pad = _pad_plan(t_valid)
    t1_pad = 2 * t2_pad
    tq1 = _tile_for(t1_pad)
    xp = jnp.pad(x, ((0, 0), (0, 0), (0, t1_pad - t_in)))
    pos = params["pos"]
    if t2_pad != t_valid:
        pos = jnp.pad(pos, ((0, t2_pad - t_valid), (0, 0)))

    h = _conv3_gelu(jnp.transpose(xp, (0, 2, 1)), params["conv1_w"],
                    params["conv1_b"], stride=1, pos=None, tile=tq1,
                    out_dtype=MATMUL_DTYPE, single_buffer=sb)
    h = _conv3_gelu(h, params["conv2_w"], params["conv2_b"], stride=2,
                    pos=pos, tile=tq2, out_dtype=jnp.float32, single_buffer=sb)

    for blk in params["blocks"]:
        q, k, v = _ln_qkv(h, blk, tile=tq2, single_buffer=sb)
        attn = _attention(q, k, v, n_head=n_head, t_valid=t_valid, tile=tq2)
        h = _proj_mlp(h, attn, blk, tile=tq2, single_buffer=sb)

    out = _final_ln(h, params["lnp_g"], params["lnp_b"], tile=tq2, single_buffer=sb)
    return out[:, :t_valid, :]


# ----------------------------------------------------------------------------
# parameters
# ----------------------------------------------------------------------------
def sinusoidal_positions(n_ctx, n_state):
    half = n_state // 2
    factor = math.log(10000.0) / (half - 1)
    dim = jnp.exp(-factor * jnp.arange(half, dtype=jnp.float32))
    angles = jnp.arange(n_ctx, dtype=jnp.float32)[:, None] * dim[None, :]
    return jnp.concatenate([jnp.sin(angles), jnp.cos(angles)], axis=1)


def init_params(key, *, n_mels, n_layer, n_ctx, n_state, n_head):
    n_mlp = 4 * n_state
    keys = iter(jax.random.split(key, 16 + 20 * n_layer))
    dense = lambda k, fan, shape: (jax.random.normal(k, shape, jnp.float32)
                                   / jnp.sqrt(jnp.float32(fan)))
    ln_g = lambda k: 1.0 + 0.05 * jax.random.normal(k, (n_state,), jnp.float32)
    ln_b = lambda k: 0.05 * jax.random.normal(k, (n_state,), jnp.float32)
    params = {
        "conv1_w": dense(next(keys), 3 * n_mels, (3, n_mels, n_state)),
        "conv1_b": dense(next(keys), n_mels, (n_state,)),
        "conv2_w": dense(next(keys), 3 * n_state, (3, n_state, n_state)),
        "conv2_b": dense(next(keys), n_state, (n_state,)),
        "pos": sinusoidal_positions(n_ctx, n_state),
        "lnp_g": ln_g(next(keys)), "lnp_b": ln_b(next(keys)),
        "blocks": [],
    }
    for _ in range(n_layer):
        params["blocks"].append({
            "ln1_g": ln_g(next(keys)), "ln1_b": ln_b(next(keys)),
            "wq": dense(next(keys), n_state, (n_state, n_state)),
            "bq": dense(next(keys), n_state, (n_state,)),
            "wk": dense(next(keys), n_state, (n_state, n_state)),
            "wv": dense(next(keys), n_state, (n_state, n_state)),
            "bv": dense(next(keys), n_state, (n_state,)),
            "wo": dense(next(keys), n_state, (n_state, n_state)),
            "bo": dense(next(keys), n_state, (n_state,)),
            "ln2_g": ln_g(next(keys)), "ln2_b": ln_b(next(keys)),
            "w1": dense(next(keys), n_state, (n_state, n_mlp)),
            "b1": dense(next(keys), n_state, (n_mlp,)),
            "w2": dense(next(keys), n_mlp, (n_mlp, n_state)),
            "b2": dense(next(keys), n_mlp, (n_state,)),
        })
    return params


def prepare_params(raw, *, n_head):
    """One-time prep: fold attention scale into Wq/bq, cast matmul weights to
    bf16, reshape biases/LN params to (1, n) rows (lane-dense broadcasts)."""
    n_state = raw["blocks"][0]["wq"].shape[0] if raw["blocks"] else raw["conv2_w"].shape[-1]
    d_head = n_state // n_head
    scale = d_head ** -0.5          # == (d_head**-0.25) applied to both q and k
    mm = lambda w: w.astype(MATMUL_DTYPE)
    row = lambda b: b.reshape(1, -1).astype(jnp.float32)
    out = {
        "conv1_w": mm(raw["conv1_w"]), "conv1_b": row(raw["conv1_b"]),
        "conv2_w": mm(raw["conv2_w"]), "conv2_b": row(raw["conv2_b"]),
        "pos": raw["pos"].astype(jnp.float32),
        "lnp_g": row(raw["lnp_g"]), "lnp_b": row(raw["lnp_b"]),
        "blocks": [],
    }
    for b in raw["blocks"]:
        out["blocks"].append({
            "ln1_g": row(b["ln1_g"]), "ln1_b": row(b["ln1_b"]),
            "wq": mm(b["wq"] * scale), "bq": row(b["bq"] * scale),
            "wk": mm(b["wk"]), "wv": mm(b["wv"]), "bv": row(b["bv"]),
            "wo": mm(b["wo"]), "bo": row(b["bo"]),
            "ln2_g": row(b["ln2_g"]), "ln2_b": row(b["ln2_b"]),
            "w1": mm(b["w1"]), "b1": row(b["b1"]),
            "w2": mm(b["w2"]), "b2": row(b["b2"]),
        })
    return out


# ----------------------------------------------------------------------------
# pure-JAX reference (mirrors the PyTorch AudioEncoder.forward)
# ----------------------------------------------------------------------------
def _ref_layernorm(x, g, b):
    mu = jnp.mean(x, axis=-1, keepdims=True)
    var = jnp.mean((x - mu) ** 2, axis=-1, keepdims=True)
    return (x - mu) * lax.rsqrt(var + LN_EPS) * g + b


def reference_forward(x, raw, *, n_head, matmul_dtype=jnp.float32):
    dt = matmul_dtype
    mm = lambda a, b: jnp.dot(a.astype(dt), b.astype(dt),
                              preferred_element_type=jnp.float32)

    def conv1d(h, w3, bias, stride):
        w = jnp.transpose(w3, (2, 1, 0)).astype(dt)       # (Cout, Cin, 3)
        y = lax.conv_general_dilated(h.astype(dt), w, (stride,), [(1, 1)],
                                     dimension_numbers=("NCH", "OIH", "NCH"),
                                     preferred_element_type=jnp.float32)
        return y + bias[None, :, None]

    h = jax.nn.gelu(conv1d(x, raw["conv1_w"], raw["conv1_b"], 1), approximate=True)
    h = jax.nn.gelu(conv1d(h, raw["conv2_w"], raw["conv2_b"], 2), approximate=True)
    h = jnp.transpose(h, (0, 2, 1)) + raw["pos"]

    B, T, S = h.shape
    D = S // n_head
    scale = D ** -0.25
    for b in raw["blocks"]:
        xn = _ref_layernorm(h, b["ln1_g"], b["ln1_b"])
        q = mm(xn, b["wq"]) + b["bq"]
        k = mm(xn, b["wk"])
        v = mm(xn, b["wv"]) + b["bv"]
        q = jnp.transpose(q.reshape(B, T, n_head, D), (0, 2, 1, 3)) * scale
        k = jnp.transpose(k.reshape(B, T, n_head, D), (0, 2, 3, 1)) * scale
        v = jnp.transpose(v.reshape(B, T, n_head, D), (0, 2, 1, 3))
        p = jax.nn.softmax(jnp.matmul(q.astype(dt), k.astype(dt),
                                      preferred_element_type=jnp.float32), axis=-1)
        a = jnp.matmul(p.astype(dt), v.astype(dt), preferred_element_type=jnp.float32)
        a = jnp.transpose(a, (0, 2, 1, 3)).reshape(B, T, S)
        h = h + mm(a, b["wo"]) + b["bo"]
        xn2 = _ref_layernorm(h, b["ln2_g"], b["ln2_b"])
        h = h + mm(jax.nn.gelu(mm(xn2, b["w1"]) + b["b1"], approximate=True),
                   b["w2"]) + b["b2"]
    return _ref_layernorm(h, raw["lnp_g"], raw["lnp_b"])


# ----------------------------------------------------------------------------
if __name__ == "__main__":
    # Small AudioEncoder config.  n_ctx=20 deliberately exercises the
    # sequence-padding + attention-masking path (20 -> padded 24).
    n_mels, n_layer, n_ctx, n_state, n_head = 16, 2, 20, 32, 4
    B, t_in = 2, 2 * n_ctx            # conv2 (stride 2) halves time -> n_ctx

    key = jax.random.PRNGKey(0)
    kp, kx = jax.random.split(key)
    raw = init_params(kp, n_mels=n_mels, n_layer=n_layer, n_ctx=n_ctx,
                      n_state=n_state, n_head=n_head)
    x = jax.random.normal(kx, (B, n_mels, t_in), jnp.float32)
    kparams = prepare_params(raw, n_head=n_head)

    sb = buffered1_supported()        # explicit detection (no silent 2x VMEM)
    fwd = jax.jit(functools.partial(audio_encoder_forward, n_head=n_head,
                                    single_buffer_weights=sb))
    out = jax.block_until_ready(fwd(x, kparams))

    assert out.shape == (B, n_ctx, n_state)
    # Tight check vs. a reference mirroring the kernel's bf16-operand policy.
    ref_mixed = reference_forward(x, raw, n_head=n_head, matmul_dtype=jnp.bfloat16)
    assert jnp.allclose(out, ref_mixed, atol=4e-2, rtol=4e-2), "mismatch (bf16 ref)"
    # Looser sanity check vs. the pure-f32 PyTorch-faithful reference.
    ref_f32 = reference_forward(x, raw, n_head=n_head, matmul_dtype=jnp.float32)
    assert jnp.allclose(out, ref_f32, atol=1e-1, rtol=1e-1), "mismatch (f32 ref)"
    print("KERNEL_OK")
</pallas_src>

<mosaic_0001>
module attributes {stable_mosaic.version = 11 : i64} {
  func.func @_conv3_gelu_kernel(%arg0: i32, %arg1: i32, %arg2: memref<1x48x16xbf16, #tpu.memory_space<vmem>>, %arg3: memref<1x48x16xbf16, #tpu.memory_space<vmem>>, %arg4: memref<1x48x16xbf16, #tpu.memory_space<vmem>>, %arg5: memref<3x16x32xbf16, #tpu.memory_space<vmem>>, %arg6: memref<1x32xf32, #tpu.memory_space<vmem>>, %arg7: memref<1x48x32xbf16, #tpu.memory_space<vmem>>) attributes {dimension_semantics = [#tpu.dimension_semantics<parallel>, #tpu.dimension_semantics<parallel>], iteration_bounds = array<i64: 2, 1>, scalar_prefetch = 0 : i64, scratch_operands = 0 : i64, tpu.core_type = #tpu.core_type<tc>, window_params = [{transform_indices = @transform_0, window_bounds = array<i64: 1, 48, 16>}, {transform_indices = @transform_1, window_bounds = array<i64: 1, 48, 16>}, {transform_indices = @transform_2, window_bounds = array<i64: 1, 48, 16>}, {pipeline_mode = #tpu.pipeline_mode<synchronous>, transform_indices = @transform_3, window_bounds = array<i64: 3, 16, 32>}, {pipeline_mode = #tpu.pipeline_mode<synchronous>, transform_indices = @transform_4, window_bounds = array<i64: 1, 32>}, {transform_indices = @transform_5, window_bounds = array<i64: 1, 48, 32>}]} {
    %c0 = arith.constant 0 : index
    %c0_0 = arith.constant 0 : index
    %c0_1 = arith.constant 0 : index
    %0 = vector.load %arg2[%c0, %c0_0, %c0_1] : memref<1x48x16xbf16, #tpu.memory_space<vmem>>, vector<1x48x16xbf16>
    %1 = vector.shape_cast %0 : vector<1x48x16xbf16> to vector<48x16xbf16>
    %c0_2 = arith.constant 0 : index
    %c0_3 = arith.constant 0 : index
    %c0_4 = arith.constant 0 : index
    %2 = vector.load %arg5[%c0_2, %c0_3, %c0_4] : memref<3x16x32xbf16, #tpu.memory_space<vmem>>, vector<1x16x32xbf16>
    %3 = vector.shape_cast %2 : vector<1x16x32xbf16> to vector<16x32xbf16>
    %cst = arith.constant dense<0.000000e+00> : vector<48x32xf32>
    %4 = tpu.matmul %1, %3, %cst {dimension_numbers = #tpu.dot_dimension_numbers<[1], [0], [0], [1], [0, 0, 1, 1], [], []>} : vector<48x16xbf16>, vector<16x32xbf16>, vector<48x32xf32> -> vector<48x32xf32>
    %c0_5 = arith.constant 0 : index
    %c0_6 = arith.constant 0 : index
    %c0_7 = arith.constant 0 : index
    %5 = vector.load %arg3[%c0_5, %c0_6, %c0_7] : memref<1x48x16xbf16, #tpu.memory_space<vmem>>, vector<1x48x16xbf16>
    %6 = vector.shape_cast %5 : vector<1x48x16xbf16> to vector<48x16xbf16>
    %c1 = arith.constant 1 : index
    %c0_8 = arith.constant 0 : index
    %c0_9 = arith.constant 0 : index
    %7 = vector.load %arg5[%c1, %c0_8, %c0_9] : memref<3x16x32xbf16, #tpu.memory_space<vmem>>, vector<1x16x32xbf16>
    %8 = vector.shape_cast %7 : vector<1x16x32xbf16> to vector<16x32xbf16>
    %cst_10 = arith.constant dense<0.000000e+00> : vector<48x32xf32>
    %9 = tpu.matmul %6, %8, %cst_10 {dimension_numbers = #tpu.dot_dimension_numbers<[1], [0], [0], [1], [0, 0, 1, 1], [], []>} : vector<48x16xbf16>, vector<16x32xbf16>, vector<48x32xf32> -> vector<48x32xf32>
    %10 = arith.addf %4, %9 : vector<48x32xf32>
    %c0_11 = arith.constant 0 : index
    %c0_12 = arith.constant 0 : index
    %c0_13 = arith.constant 0 : index
    %11 = vector.load %arg4[%c0_11, %c0_12, %c0_13] : memref<1x48x16xbf16, #tpu.memory_space<vmem>>, vector<1x48x16xbf16>
    %12 = vector.shape_cast %11 : vector<1x48x16xbf16> to vector<48x16xbf16>
    %c2 = arith.constant 2 : index
    %c0_14 = arith.constant 0 : index
    %c0_15 = arith.constant 0 : index
    %13 = vector.load %arg5[%c2, %c0_14, %c0_15] : memref<3x16x32xbf16, #tpu.memory_space<vmem>>, vector<1x16x32xbf16>
    %14 = vector.shape_cast %13 : vector<1x16x32xbf16> to vector<16x32xbf16>
    %cst_16 = arith.constant dense<0.000000e+00> : vector<48x32xf32>
    %15 = tpu.matmul %12, %14, %cst_16 {dimension_numbers = #tpu.dot_dimension_numbers<[1], [0], [0], [1], [0, 0, 1, 1], [], []>} : vector<48x16xbf16>, vector<16x32xbf16>, vector<48x32xf32> -> vector<48x32xf32>
    %16 = arith.addf %10, %15 : vector<48x32xf32>
    %c0_17 = arith.constant 0 : index
    %c0_18 = arith.constant 0 : index
    %17 = vector.load %arg6[%c0_17, %c0_18] : memref<1x32xf32, #tpu.memory_space<vmem>>, vector<1x32xf32>
    %18 = vector.broadcast %17 : vector<1x32xf32> to vector<48x32xf32>
    %19 = arith.addf %16, %18 : vector<48x32xf32>
    %20 = arith.mulf %19, %19 : vector<48x32xf32>
    %21 = arith.mulf %19, %20 : vector<48x32xf32>
    %cst_19 = arith.constant 4.471500e-02 : f32
    %22 = vector.broadcast %cst_19 : f32 to vector<48x32xf32>
    %23 = arith.mulf %22, %21 : vector<48x32xf32>
    %24 = arith.addf %19, %23 : vector<48x32xf32>
    %cst_20 = arith.constant 0.797884583 : f32
    %25 = vector.broadcast %cst_20 : f32 to vector<48x32xf32>
    %26 = arith.mulf %25, %24 : vector<48x32xf32>
    %27 = math.tanh %26 : vector<48x32xf32>
    %cst_21 = arith.constant 1.000000e+00 : f32
    %28 = vector.broadcast %cst_21 : f32 to vector<48x32xf32>
    %29 = arith.addf %28, %27 : vector<48x32xf32>
    %cst_22 = arith.constant 5.000000e-01 : f32
    %30 = vector.broadcast %cst_22 : f32 to vector<48x32xf32>
    %31 = arith.mulf %30, %29 : vector<48x32xf32>
    %32 = arith.mulf %19, %31 : vector<48x32xf32>
    %33 = arith.truncf %32 : vector<48x32xf32> to vector<48x32xbf16>
    %c0_23 = arith.constant 0 : index
    %c0_24 = arith.constant 0 : index
    %c0_25 = arith.constant 0 : index
    %34 = vector.load %arg7[%c0_23, %c0_24, %c0_25] : memref<1x48x32xbf16, #tpu.memory_space<vmem>>, vector<1x48x32xbf16>
    %35 = vector.shape_cast %34 : vector<1x48x32xbf16> to vector<48x32xbf16>
    %36 = vector.shape_cast %33 : vector<48x32xbf16> to vector<1x48x32xbf16>
    tpu.vector_store %arg7[%c0_23, %c0_24, %c0_25], %36 {strides = array<i32>} : memref<1x48x32xbf16, #tpu.memory_space<vmem>>, vector<1x48x32xbf16>,
    return
  }
  func.func @transform_0(%arg0: i32, %arg1: i32) -> (i32, i32, i32) {
    %c0_i32 = arith.constant 0 : i32
    %c0_i32_0 = arith.constant 0 : i32
    return %arg0, %arg1, %c0_i32 : i32, i32, i32
  }
  func.func @transform_1(%arg0: i32, %arg1: i32) -> (i32, i32, i32) {
    %c0_i32 = arith.constant 0 : i32
    %c0_i32_0 = arith.constant 0 : i32
    return %arg0, %arg1, %c0_i32 : i32, i32, i32
  }
  func.func @transform_2(%arg0: i32, %arg1: i32) -> (i32, i32, i32) {
    %c0_i32 = arith.constant 0 : i32
    %c0_i32_0 = arith.constant 0 : i32
    return %arg0, %arg1, %c0_i32 : i32, i32, i32
  }
  func.func @transform_3(%arg0: i32, %arg1: i32) -> (i32, i32, i32) {
    %c0_i32 = arith.constant 0 : i32
    %c0_i32_0 = arith.constant 0 : i32
    %c0_i32_1 = arith.constant 0 : i32
    %c0_i32_2 = arith.constant 0 : i32
    return %c0_i32, %c0_i32_0, %c0_i32_1 : i32, i32, i32
  }
  func.func @transform_4(%arg0: i32, %arg1: i32) -> (i32, i32) {
    %c0_i32 = arith.constant 0 : i32
    %c0_i32_0 = arith.constant 0 : i32
    %c0_i32_1 = arith.constant 0 : i32
    return %c0_i32, %c0_i32_0 : i32, i32
  }
  func.func @transform_5(%arg0: i32, %arg1: i32) -> (i32, i32, i32) {
    %c0_i32 = arith.constant 0 : i32
    %c0_i32_0 = arith.constant 0 : i32
    return %arg0, %arg1, %c0_i32 : i32, i32, i32
  }
}

module attributes {stable_mosaic.version = 11 : i64} {
  func.func @_attention_kernel(%arg0: i32, %arg1: i32, %arg2: memref<1x24x32xbf16, #tpu.memory_space<vmem>>, %arg3: memref<1x24x32xbf16, #tpu.memory_space<vmem>>, %arg4: memref<1x24x32xbf16, #tpu.memory_space<vmem>>, %arg5: memref<1x24x32xbf16, #tpu.memory_space<vmem>>) attributes {dimension_semantics = [#tpu.dimension_semantics<parallel>, #tpu.dimension_semantics<parallel>], iteration_bounds = array<i64: 2, 1>, scalar_prefetch = 0 : i64, scratch_operands = 0 : i64, tpu.core_type = #tpu.core_type<tc>, window_params = [{transform_indices = @transform_0, window_bounds = array<i64: 1, 24, 32>}, {transform_indices = @transform_1, window_bounds = array<i64: 1, 24, 32>}, {transform_indices = @transform_2, window_bounds = array<i64: 1, 24, 32>}, {transform_indices = @transform_3, window_bounds = array<i64: 1, 24, 32>}]} {
    %c0 = arith.constant 0 : index
    %c0_0 = arith.constant 0 : index
    %c0_1 = arith.constant 0 : index
    %0 = vector.load %arg2[%c0, %c0_0, %c0_1] : memref<1x24x32xbf16, #tpu.memory_space<vmem>>, vector<1x24x32xbf16>
    %1 = vector.shape_cast %0 : vector<1x24x32xbf16> to vector<24x32xbf16>
    %c0_2 = arith.constant 0 : index
    %c0_3 = arith.constant 0 : index
    %c0_4 = arith.constant 0 : index
    %2 = vector.load %arg3[%c0_2, %c0_3, %c0_4] : memref<1x24x32xbf16, #tpu.memory_space<vmem>>, vector<1x24x32xbf16>
    %3 = vector.shape_cast %2 : vector<1x24x32xbf16> to vector<24x32xbf16>
    %c0_5 = arith.constant 0 : index
    %c0_6 = arith.constant 0 : index
    %c0_7 = arith.constant 0 : index
    %4 = vector.load %arg4[%c0_5, %c0_6, %c0_7] : memref<1x24x32xbf16, #tpu.memory_space<vmem>>, vector<1x24x32xbf16>
    %5 = vector.shape_cast %4 : vector<1x24x32xbf16> to vector<24x32xbf16>
    %6 = tpu.iota {dimensions = array<i32: 1>} : vector<1x24xi32>
    %c20_i32 = arith.constant 20 : i32
    %7 = vector.broadcast %c20_i32 : i32 to vector<1x24xi32>
    %8 = arith.cmpi slt, %6, %7 : vector<1x24xi32>
    %cst = arith.constant 0.000000e+00 : f32
    %cst_8 = arith.constant -1.000000e+30 : f32
    %9 = vector.broadcast %cst : f32 to vector<1x24xf32>
    %10 = vector.broadcast %cst_8 : f32 to vector<1x24xf32>
    %11 = arith.select %8, %9, %10 : vector<1x24xi1>, vector<1x24xf32>
    %12 = vector.extract_strided_slice %1 {offsets = [0, 0], sizes = [24, 8], strides = [1, 1]} : vector<24x32xbf16> to vector<24x8xbf16>
    %13 = vector.extract_strided_slice %3 {offsets = [0, 0], sizes = [24, 8], strides = [1, 1]} : vector<24x32xbf16> to vector<24x8xbf16>
    %cst_9 = arith.constant dense<0.000000e+00> : vector<24x24xf32>
    %14 = tpu.matmul %12, %13, %cst_9 {dimension_numbers = #tpu.dot_dimension_numbers<[1], [1], [0], [0], [0, 0, 1, 0], [], []>} : vector<24x8xbf16>, vector<24x8xbf16>, vector<24x24xf32> -> vector<24x24xf32>
    %15 = vector.broadcast %11 : vector<1x24xf32> to vector<24x24xf32>
    %16 = arith.addf %14, %15 : vector<24x24xf32>
    %cst_10 = arith.constant dense<0xFF800000> : vector<24xf32>
    %17 = vector.multi_reduction <maximumf>, %16, %cst_10 [1] : vector<24x24xf32> to vector<24xf32>
    %18 = vector.shape_cast %17 : vector<24xf32> to vector<24x1xf32>
    %19 = vector.broadcast %18 : vector<24x1xf32> to vector<24x24xf32>
    %20 = arith.subf %16, %19 : vector<24x24xf32>
    %21 = math.exp %20 : vector<24x24xf32>
    %cst_11 = arith.constant dense<0.000000e+00> : vector<24xf32>
    %22 = vector.multi_reduction <add>, %21, %cst_11 [1] : vector<24x24xf32> to vector<24xf32>
    %23 = vector.shape_cast %22 : vector<24xf32> to vector<24x1xf32>
    %24 = tpu.reciprocal %23 {approx = true} : vector<24x1xf32> -> vector<24x1xf32>
    %25 = vector.broadcast %24 : vector<24x1xf32> to vector<24x24xf32>
    %26 = arith.mulf %21, %25 : vector<24x24xf32>
    %27 = arith.truncf %26 : vector<24x24xf32> to vector<24x24xbf16>
    %28 = vector.extract_strided_slice %5 {offsets = [0, 0], sizes = [24, 8], strides = [1, 1]} : vector<24x32xbf16> to vector<24x8xbf16>
    %cst_12 = arith.constant dense<0.000000e+00> : vector<24x8xf32>
    %29 = tpu.matmul %27, %28, %cst_12 {dimension_numbers = #tpu.dot_dimension_numbers<[1], [0], [0], [1], [0, 0, 1, 1], [], []>} : vector<24x24xbf16>, vector<24x8xbf16>, vector<24x8xf32> -> vector<24x8xf32>
    %30 = vector.extract_strided_slice %1 {offsets = [0, 8], sizes = [24, 8], strides = [1, 1]} : vector<24x32xbf16> to vector<24x8xbf16>
    %31 = vector.extract_strided_slice %3 {offsets = [0, 8], sizes = [24, 8], strides = [1, 1]} : vector<24x32xbf16> to vector<24x8xbf16>
    %cst_13 = arith.constant dense<0.000000e+00> : vector<24x24xf32>
    %32 = tpu.matmul %30, %31, %cst_13 {dimension_numbers = #tpu.dot_dimension_numbers<[1], [1], [0], [0], [0, 0, 1, 0], [], []>} : vector<24x8xbf16>, vector<24x8xbf16>, vector<24x24xf32> -> vector<24x24xf32>
    %33 = vector.broadcast %11 : vector<1x24xf32> to vector<24x24xf32>
    %34 = arith.addf %32, %33 : vector<24x24xf32>
    %cst_14 = arith.constant dense<0xFF800000> : vector<24xf32>
    %35 = vector.multi_reduction <maximumf>, %34, %cst_14 [1] : vector<24x24xf32> to vector<24xf32>
    %36 = vector.shape_cast %35 : vector<24xf32> to vector<24x1xf32>
    %37 = vector.broadcast %36 : vector<24x1xf32> to vector<24x24xf32>
    %38 = arith.subf %34, %37 : vector<24x24xf32>
    %39 = math.exp %38 : vector<24x24xf32>
    %cst_15 = arith.constant dense<0.000000e+00> : vector<24xf32>
    %40 = vector.multi_reduction <add>, %39, %cst_15 [1] : vector<24x24xf32> to vector<24xf32>
    %41 = vector.shape_cast %40 : vector<24xf32> to vector<24x1xf32>
    %42 = tpu.reciprocal %41 {approx = true} : vector<24x1xf32> -> vector<24x1xf32>
    %43 = vector.broadcast %42 : vector<24x1xf32> to vector<24x24xf32>
    %44 = arith.mulf %39, %43 : vector<24x24xf32>
    %45 = arith.truncf %44 : vector<24x24xf32> to vector<24x24xbf16>
    %46 = vector.extract_strided_slice %5 {offsets = [0, 8], sizes = [24, 8], strides = [1, 1]} : vector<24x32xbf16> to vector<24x8xbf16>
    %cst_16 = arith.constant dense<0.000000e+00> : vector<24x8xf32>
    %47 = tpu.matmul %45, %46, %cst_16 {dimension_numbers = #tpu.dot_dimension_numbers<[1], [0], [0], [1], [0, 0, 1, 1], [], []>} : vector<24x24xbf16>, vector<24x8xbf16>, vector<24x8xf32> -> vector<24x8xf32>
    %48 = vector.extract_strided_slice %1 {offsets = [0, 16], sizes = [24, 8], strides = [1, 1]} : vector<24x32xbf16> to vector<24x8xbf16>
    %49 = vector.extract_strided_slice %3 {offsets = [0, 16], sizes = [24, 8], strides = [1, 1]} : vector<24x32xbf16> to vector<24x8xbf16>
    %cst_17 = arith.constant dense<0.000000e+00> : vector<24x24xf32>
    %50 = tpu.matmul %48, %49, %cst_17 {dimension_numbers = #tpu.dot_dimension_numbers<[1], [1], [0], [0], [0, 0, 1, 0], [], []>} : vector<24x8xbf16>, vector<24x8xbf16>, vector<24x24xf32> -> vector<24x24xf32>
    %51 = vector.broadcast %11 : vector<1x24xf32> to vector<24x24xf32>
    %52 = arith.addf %50, %51 : vector<24x24xf32>
    %cst_18 = arith.constant dense<0xFF800000> : vector<24xf32>
    %53 = vector.multi_reduction <maximumf>, %52, %cst_18 [1] : vector<24x24xf32> to vector<24xf32>
    %54 = vector.shape_cast %53 : vector<24xf32> to vector<24x1xf32>
    %55 = vector.broadcast %54 : vector<24x1xf32> to vector<24x24xf32>
    %56 = arith.subf %52, %55 : vector<24x24xf32>
    %57 = math.exp %56 : vector<24x24xf32>
    %cst_19 = arith.constant dense<0.000000e+00> : vector<24xf32>
    %58 = vector.multi_reduction <add>, %57, %cst_19 [1] : vector<24x24xf32> to vector<24xf32>
    %59 = vector.shape_cast %58 : vector<24xf32> to vector<24x1xf32>
    %60 = tpu.reciprocal %59 {approx = true} : vector<24x1xf32> -> vector<24x1xf32>
    %61 = vector.broadcast %60 : vector<24x1xf32> to vector<24x24xf32>
    %62 = arith.mulf %57, %61 : vector<24x24xf32>
    %63 = arith.truncf %62 : vector<24x24xf32> to vector<24x24xbf16>
    %64 = vector.extract_strided_slice %5 {offsets = [0, 16], sizes = [24, 8], strides = [1, 1]} : vector<24x32xbf16> to vector<24x8xbf16>
    %cst_20 = arith.constant dense<0.000000e+00> : vector<24x8xf32>
    %65 = tpu.matmul %63, %64, %cst_20 {dimension_numbers = #tpu.dot_dimension_numbers<[1], [0], [0], [1], [0, 0, 1, 1], [], []>} : vector<24x24xbf16>, vector<24x8xbf16>, vector<24x8xf32> -> vector<24x8xf32>
    %66 = vector.extract_strided_slice %1 {offsets = [0, 24], sizes = [24, 8], strides = [1, 1]} : vector<24x32xbf16> to vector<24x8xbf16>
    %67 = vector.extract_strided_slice %3 {offsets = [0, 24], sizes = [24, 8], strides = [1, 1]} : vector<24x32xbf16> to vector<24x8xbf16>
    %cst_21 = arith.constant dense<0.000000e+00> : vector<24x24xf32>
    %68 = tpu.matmul %66, %67, %cst_21 {dimension_numbers = #tpu.dot_dimension_numbers<[1], [1], [0], [0], [0, 0, 1, 0], [], []>} : vector<24x8xbf16>, vector<24x8xbf16>, vector<24x24xf32> -> vector<24x24xf32>
    %69 = vector.broadcast %11 : vector<1x24xf32> to vector<24x24xf32>
    %70 = arith.addf %68, %69 : vector<24x24xf32>
    %cst_22 = arith.constant dense<0xFF800000> : vector<24xf32>
    %71 = vector.multi_reduction <maximumf>, %70, %cst_22 [1] : vector<24x24xf32> to vector<24xf32>
    %72 = vector.shape_cast %71 : vector<24xf32> to vector<24x1xf32>
    %73 = vector.broadcast %72 : vector<24x1xf32> to vector<24x24xf32>
    %74 = arith.subf %70, %73 : vector<24x24xf32>
    %75 = math.exp %74 : vector<24x24xf32>
    %cst_23 = arith.constant dense<0.000000e+00> : vector<24xf32>
    %76 = vector.multi_reduction <add>, %75, %cst_23 [1] : vector<24x24xf32> to vector<24xf32>
    %77 = vector.shape_cast %76 : vector<24xf32> to vector<24x1xf32>
    %78 = tpu.reciprocal %77 {approx = true} : vector<24x1xf32> -> vector<24x1xf32>
    %79 = vector.broadcast %78 : vector<24x1xf32> to vector<24x24xf32>
    %80 = arith.mulf %75, %79 : vector<24x24xf32>
    %81 = arith.truncf %80 : vector<24x24xf32> to vector<24x24xbf16>
    %82 = vector.extract_strided_slice %5 {offsets = [0, 24], sizes = [24, 8], strides = [1, 1]} : vector<24x32xbf16> to vector<24x8xbf16>
    %cst_24 = arith.constant dense<0.000000e+00> : vector<24x8xf32>
    %83 = tpu.matmul %81, %82, %cst_24 {dimension_numbers = #tpu.dot_dimension_numbers<[1], [0], [0], [1], [0, 0, 1, 1], [], []>} : vector<24x24xbf16>, vector<24x8xbf16>, vector<24x8xf32> -> vector<24x8xf32>
    %84 = tpu.concatenate %29, %47, %65, %83 in 1 : vector<24x8xf32>, vector<24x8xf32>, vector<24x8xf32>, vector<24x8xf32> -> vector<24x32xf32>
    %85 = arith.truncf %84 : vector<24x32xf32> to vector<24x32xbf16>
    %c0_25 = arith.constant 0 : index
    %c0_26 = arith.constant 0 : index
    %c0_27 = arith.constant 0 : index
    %86 = vector.load %arg5[%c0_25, %c0_26, %c0_27] : memref<1x24x32xbf16, #tpu.memory_space<vmem>>, vector<1x24x32xbf16>
    %87 = vector.shape_cast %86 : vector<1x24x32xbf16> to vector<24x32xbf16>
    %88 = vector.shape_cast %85 : vector<24x32xbf16> to vector<1x24x32xbf16>
    tpu.vector_store %arg5[%c0_25, %c0_26, %c0_27], %88 {strides = array<i32>} : memref<1x24x32xbf16, #tpu.memory_space<vmem>>, vector<1x24x32xbf16>,
    return
  }
  func.func @transform_0(%arg0: i32, %arg1: i32) -> (i32, i32, i32) {
    %c0_i32 = arith.constant 0 : i32
    %c0_i32_0 = arith.constant 0 : i32
    return %arg0, %arg1, %c0_i32 : i32, i32, i32
  }
  func.func @transform_1(%arg0: i32, %arg1: i32) -> (i32, i32, i32) {
    %c0_i32 = arith.constant 0 : i32
    %c0_i32_0 = arith.constant 0 : i32
    %c0_i32_1 = arith.constant 0 : i32
    return %arg0, %c0_i32, %c0_i32_0 : i32, i32, i32
  }
  func.func @transform_2(%arg0: i32, %arg1: i32) -> (i32, i32, i32) {
    %c0_i32 = arith.constant 0 : i32
    %c0_i32_0 = arith.constant 0 : i32
    %c0_i32_1 = arith.constant 0 : i32
    return %arg0, %c0_i32, %c0_i32_0 : i32, i32, i32
  }
  func.func @transform_3(%arg0: i32, %arg1: i32) -> (i32, i32, i32) {
    %c0_i32 = arith.constant 0 : i32
    %c0_i32_0 = arith.constant 0 : i32
    return %arg0, %arg1, %c0_i32 : i32, i32, i32
  }
}

module attributes {stable_mosaic.version = 11 : i64} {
  func.func @_ln_qkv_kernel(%arg0: i32, %arg1: i32, %arg2: memref<1x24x32xf32, #tpu.memory_space<vmem>>, %arg3: memref<1x32xf32, #tpu.memory_space<vmem>>, %arg4: memref<1x32xf32, #tpu.memory_space<vmem>>, %arg5: memref<32x32xbf16, #tpu.memory_space<vmem>>, %arg6: memref<1x32xf32, #tpu.memory_space<vmem>>, %arg7: memref<32x32xbf16, #tpu.memory_space<vmem>>, %arg8: memref<32x32xbf16, #tpu.memory_space<vmem>>, %arg9: memref<1x32xf32, #tpu.memory_space<vmem>>, %arg10: memref<1x24x32xbf16, #tpu.memory_space<vmem>>, %arg11: memref<1x24x32xbf16, #tpu.memory_space<vmem>>, %arg12: memref<1x24x32xbf16, #tpu.memory_space<vmem>>) attributes {dimension_semantics = [#tpu.dimension_semantics<parallel>, #tpu.dimension_semantics<parallel>], iteration_bounds = array<i64: 2, 1>, scalar_prefetch = 0 : i64, scratch_operands = 0 : i64, tpu.core_type = #tpu.core_type<tc>, window_params = [{transform_indices = @transform_0, window_bounds = array<i64: 1, 24, 32>}, {pipeline_mode = #tpu.pipeline_mode<synchronous>, transform_indices = @transform_1, window_bounds = array<i64: 1, 32>}, {pipeline_mode = #tpu.pipeline_mode<synchronous>, transform_indices = @transform_2, window_bounds = array<i64: 1, 32>}, {pipeline_mode = #tpu.pipeline_mode<synchronous>, transform_indices = @transform_3, window_bounds = array<i64: 32, 32>}, {pipeline_mode = #tpu.pipeline_mode<synchronous>, transform_indices = @transform_4, window_bounds = array<i64: 1, 32>}, {pipeline_mode = #tpu.pipeline_mode<synchronous>, transform_indices = @transform_5, window_bounds = array<i64: 32, 32>}, {pipeline_mode = #tpu.pipeline_mode<synchronous>, transform_indices = @transform_6, window_bounds = array<i64: 32, 32>}, {pipeline_mode = #tpu.pipeline_mode<synchronous>, transform_indices = @transform_7, window_bounds = array<i64: 1, 32>}, {transform_indices = @transform_8, window_bounds = array<i64: 1, 24, 32>}, {transform_indices = @transform_9, window_bounds = array<i64: 1, 24, 32>}, {transform_indices = @transform_10, window_bounds = array<i64: 1, 24, 32>}]} {
    %c0 = arith.constant 0 : index
    %c0_0 = arith.constant 0 : index
    %c0_1 = arith.constant 0 : index
    %0 = vector.load %arg2[%c0, %c0_0, %c0_1] : memref<1x24x32xf32, #tpu.memory_space<vmem>>, vector<1x24x32xf32>
    %1 = vector.shape_cast %0 : vector<1x24x32xf32> to vector<24x32xf32>
    %cst = arith.constant dense<0.000000e+00> : vector<24xf32>
    %2 = vector.multi_reduction <add>, %1, %cst [1] : vector<24x32xf32> to vector<24xf32>
    %3 = vector.shape_cast %2 : vector<24xf32> to vector<24x1xf32>
    %cst_2 = arith.constant 3.200000e+01 : f32
    %4 = vector.broadcast %cst_2 : f32 to vector<24x1xf32>
    %5 = arith.divf %3, %4 : vector<24x1xf32>
    %6 = vector.broadcast %5 : vector<24x1xf32> to vector<24x32xf32>
    %7 = arith.subf %1, %6 : vector<24x32xf32>
    %8 = arith.mulf %7, %7 : vector<24x32xf32>
    %cst_3 = arith.constant dense<0.000000e+00> : vector<24xf32>
    %9 = vector.multi_reduction <add>, %8, %cst_3 [1] : vector<24x32xf32> to vector<24xf32>
    %10 = vector.shape_cast %9 : vector<24xf32> to vector<24x1xf32>
    %cst_4 = arith.constant 3.200000e+01 : f32
    %11 = vector.broadcast %cst_4 : f32 to vector<24x1xf32>
    %12 = arith.divf %10, %11 : vector<24x1xf32>
    %cst_5 = arith.constant 9.99999974E-6 : f32
    %13 = vector.broadcast %cst_5 : f32 to vector<24x1xf32>
    %14 = arith.addf %12, %13 : vector<24x1xf32>
    %15 = math.rsqrt %14 : vector<24x1xf32>
    %16 = vector.broadcast %15 : vector<24x1xf32> to vector<24x32xf32>
    %17 = arith.mulf %7, %16 : vector<24x32xf32>
    %c0_6 = arith.constant 0 : index
    %c0_7 = arith.constant 0 : index
    %18 = vector.load %arg3[%c0_6, %c0_7] : memref<1x32xf32, #tpu.memory_space<vmem>>, vector<1x32xf32>
    %19 = vector.broadcast %18 : vector<1x32xf32> to vector<24x32xf32>
    %20 = arith.mulf %17, %19 : vector<24x32xf32>
    %c0_8 = arith.constant 0 : index
    %c0_9 = arith.constant 0 : index
    %21 = vector.load %arg4[%c0_8, %c0_9] : memref<1x32xf32, #tpu.memory_space<vmem>>, vector<1x32xf32>
    %22 = vector.broadcast %21 : vector<1x32xf32> to vector<24x32xf32>
    %23 = arith.addf %20, %22 : vector<24x32xf32>
    %24 = arith.truncf %23 : vector<24x32xf32> to vector<24x32xbf16>
    %c0_10 = arith.constant 0 : index
    %c0_11 = arith.constant 0 : index
    %25 = vector.load %arg5[%c0_10, %c0_11] : memref<32x32xbf16, #tpu.memory_space<vmem>>, vector<32x32xbf16>
    %cst_12 = arith.constant dense<0.000000e+00> : vector<24x32xf32>
    %26 = tpu.matmul %24, %25, %cst_12 {dimension_numbers = #tpu.dot_dimension_numbers<[1], [0], [0], [1], [0, 0, 1, 1], [], []>} : vector<24x32xbf16>, vector<32x32xbf16>, vector<24x32xf32> -> vector<24x32xf32>
    %c0_13 = arith.constant 0 : index
    %c0_14 = arith.constant 0 : index
    %27 = vector.load %arg6[%c0_13, %c0_14] : memref<1x32xf32, #tpu.memory_space<vmem>>, vector<1x32xf32>
    %28 = vector.broadcast %27 : vector<1x32xf32> to vector<24x32xf32>
    %29 = arith.addf %26, %28 : vector<24x32xf32>
    %c0_15 = arith.constant 0 : index
    %c0_16 = arith.constant 0 : index
    %30 = vector.load %arg7[%c0_15, %c0_16] : memref<32x32xbf16, #tpu.memory_space<vmem>>, vector<32x32xbf16>
    %cst_17 = arith.constant dense<0.000000e+00> : vector<24x32xf32>
    %31 = tpu.matmul %24, %30, %cst_17 {dimension_numbers = #tpu.dot_dimension_numbers<[1], [0], [0], [1], [0, 0, 1, 1], [], []>} : vector<24x32xbf16>, vector<32x32xbf16>, vector<24x32xf32> -> vector<24x32xf32>
    %c0_18 = arith.constant 0 : index
    %c0_19 = arith.constant 0 : index
    %32 = vector.load %arg8[%c0_18, %c0_19] : memref<32x32xbf16, #tpu.memory_space<vmem>>, vector<32x32xbf16>
    %cst_20 = arith.constant dense<0.000000e+00> : vector<24x32xf32>
    %33 = tpu.matmul %24, %32, %cst_20 {dimension_numbers = #tpu.dot_dimension_numbers<[1], [0], [0], [1], [0, 0, 1, 1], [], []>} : vector<24x32xbf16>, vector<32x32xbf16>, vector<24x32xf32> -> vector<24x32xf32>
    %c0_21 = arith.constant 0 : index
    %c0_22 = arith.constant 0 : index
    %34 = vector.load %arg9[%c0_21, %c0_22] : memref<1x32xf32, #tpu.memory_space<vmem>>, vector<1x32xf32>
    %35 = vector.broadcast %34 : vector<1x32xf32> to vector<24x32xf32>
    %36 = arith.addf %33, %35 : vector<24x32xf32>
    %37 = arith.truncf %29 : vector<24x32xf32> to vector<24x32xbf16>
    %c0_23 = arith.constant 0 : index
    %c0_24 = arith.constant 0 : index
    %c0_25 = arith.constant 0 : index
    %38 = vector.load %arg10[%c0_23, %c0_24, %c0_25] : memref<1x24x32xbf16, #tpu.memory_space<vmem>>, vector<1x24x32xbf16>
    %39 = vector.shape_cast %38 : vector<1x24x32xbf16> to vector<24x32xbf16>
    %40 = vector.shape_cast %37 : vector<24x32xbf16> to vector<1x24x32xbf16>
    tpu.vector_store %arg10[%c0_23, %c0_24, %c0_25], %40 {strides = array<i32>} : memref<1x24x32xbf16, #tpu.memory_space<vmem>>, vector<1x24x32xbf16>,
    %41 = arith.truncf %31 : vector<24x32xf32> to vector<24x32xbf16>
    %c0_26 = arith.constant 0 : index
    %c0_27 = arith.constant 0 : index
    %c0_28 = arith.constant 0 : index
    %42 = vector.load %arg11[%c0_26, %c0_27, %c0_28] : memref<1x24x32xbf16, #tpu.memory_space<vmem>>, vector<1x24x32xbf16>
    %43 = vector.shape_cast %42 : vector<1x24x32xbf16> to vector<24x32xbf16>
    %44 = vector.shape_cast %41 : vector<24x32xbf16> to vector<1x24x32xbf16>
    tpu.vector_store %arg11[%c0_26, %c0_27, %c0_28], %44 {strides = array<i32>} : memref<1x24x32xbf16, #tpu.memory_space<vmem>>, vector<1x24x32xbf16>,
    %45 = arith.truncf %36 : vector<24x32xf32> to vector<24x32xbf16>
    %c0_29 = arith.constant 0 : index
    %c0_30 = arith.constant 0 : index
    %c0_31 = arith.constant 0 : index
    %46 = vector.load %arg12[%c0_29, %c0_30, %c0_31] : memref<1x24x32xbf16, #tpu.memory_space<vmem>>, vector<1x24x32xbf16>
    %47 = vector.shape_cast %46 : vector<1x24x32xbf16> to vector<24x32xbf16>
    %48 = vector.shape_cast %45 : vector<24x32xbf16> to vector<1x24x32xbf16>
    tpu.vector_store %arg12[%c0_29, %c0_30, %c0_31], %48 {strides = array<i32>} : memref<1x24x32xbf16, #tpu.memory_space<vmem>>, vector<1x24x32xbf16>,
    return
  }
  func.func @transform_0(%arg0: i32, %arg1: i32) -> (i32, i32, i32) {
    %c0_i32 = arith.constant 0 : i32
    %c0_i32_0 = arith.constant 0 : i32
    return %arg0, %arg1, %c0_i32 : i32, i32, i32
  }
  func.func @transform_1(%arg0: i32, %arg1: i32) -> (i32, i32) {
    %c0_i32 = arith.constant 0 : i32
    %c0_i32_0 = arith.constant 0 : i32
    %c0_i32_1 = arith.constant 0 : i32
    return %c0_i32, %c0_i32_0 : i32, i32
  }
  func.func @transform_2(%arg0: i32, %arg1: i32) -> (i32, i32) {
    %c0_i32 = arith.constant 0 : i32
    %c0_i32_0 = arith.constant 0 : i32
    %c0_i32_1 = arith.constant 0 : i32
    return %c0_i32, %c0_i32_0 : i32, i32
  }
  func.func @transform_3(%arg0: i32, %arg1: i32) -> (i32, i32) {
    %c0_i32 = arith.constant 0 : i32
    %c0_i32_0 = arith.constant 0 : i32
    %c0_i32_1 = arith.constant 0 : i32
    return %c0_i32, %c0_i32_0 : i32, i32
  }
  func.func @transform_4(%arg0: i32, %arg1: i32) -> (i32, i32) {
    %c0_i32 = arith.constant 0 : i32
    %c0_i32_0 = arith.constant 0 : i32
    %c0_i32_1 = arith.constant 0 : i32
    return %c0_i32, %c0_i32_0 : i32, i32
  }
  func.func @transform_5(%arg0: i32, %arg1: i32) -> (i32, i32) {
    %c0_i32 = arith.constant 0 : i32
    %c0_i32_0 = arith.constant 0 : i32
    %c0_i32_1 = arith.constant 0 : i32
    return %c0_i32, %c0_i32_0 : i32, i32
  }
  func.func @transform_6(%arg0: i32, %arg1: i32) -> (i32, i32) {
    %c0_i32 = arith.constant 0 : i32
    %c0_i32_0 = arith.constant 0 : i32
    %c0_i32_1 = arith.constant 0 : i32
    return %c0_i32, %c0_i32_0 : i32, i32
  }
  func.func @transform_7(%arg0: i32, %arg1: i32) -> (i32, i32) {
    %c0_i32 = arith.constant 0 : i32
    %c0_i32_0 = arith.constant 0 : i32
    %c0_i32_1 = arith.constant 0 : i32
    return %c0_i32, %c0_i32_0 : i32, i32
  }
  func.func @transform_8(%arg0: i32, %arg1: i32) -> (i32, i32, i32) {
    %c0_i32 = arith.constant 0 : i32
    %c0_i32_0 = arith.constant 0 : i32
    return %arg0, %arg1, %c0_i32 : i32, i32, i32
  }
  func.func @transform_9(%arg0: i32, %arg1: i32) -> (i32, i32, i32) {
    %c0_i32 = arith.constant 0 : i32
    %c0_i32_0 = arith.constant 0 : i32
    return %arg0, %arg1, %c0_i32 : i32, i32, i32
  }
  func.func @transform_10(%arg0: i32, %arg1: i32) -> (i32, i32, i32) {
    %c0_i32 = arith.constant 0 : i32
    %c0_i32_0 = arith.constant 0 : i32
    return %arg0, %arg1, %c0_i32 : i32, i32, i32
  }
}

module attributes {stable_mosaic.version = 11 : i64} {
  func.func @_conv3_gelu_kernel(%arg0: i32, %arg1: i32, %arg2: memref<1x24x32xbf16, #tpu.memory_space<vmem>>, %arg3: memref<1x24x32xbf16, #tpu.memory_space<vmem>>, %arg4: memref<1x24x32xbf16, #tpu.memory_space<vmem>>, %arg5: memref<3x32x32xbf16, #tpu.memory_space<vmem>>, %arg6: memref<1x32xf32, #tpu.memory_space<vmem>>, %arg7: memref<24x32xf32, #tpu.memory_space<vmem>>, %arg8: memref<1x24x32xf32, #tpu.memory_space<vmem>>) attributes {dimension_semantics = [#tpu.dimension_semantics<parallel>, #tpu.dimension_semantics<parallel>], iteration_bounds = array<i64: 2, 1>, scalar_prefetch = 0 : i64, scratch_operands = 0 : i64, tpu.core_type = #tpu.core_type<tc>, window_params = [{transform_indices = @transform_0, window_bounds = array<i64: 1, 24, 32>}, {transform_indices = @transform_1, window_bounds = array<i64: 1, 24, 32>}, {transform_indices = @transform_2, window_bounds = array<i64: 1, 24, 32>}, {pipeline_mode = #tpu.pipeline_mode<synchronous>, transform_indices = @transform_3, window_bounds = array<i64: 3, 32, 32>}, {pipeline_mode = #tpu.pipeline_mode<synchronous>, transform_indices = @transform_4, window_bounds = array<i64: 1, 32>}, {transform_indices = @transform_5, window_bounds = array<i64: 24, 32>}, {transform_indices = @transform_6, window_bounds = array<i64: 1, 24, 32>}]} {
    %c0 = arith.constant 0 : index
    %c0_0 = arith.constant 0 : index
    %c0_1 = arith.constant 0 : index
    %0 = vector.load %arg2[%c0, %c0_0, %c0_1] : memref<1x24x32xbf16, #tpu.memory_space<vmem>>, vector<1x24x32xbf16>
    %1 = vector.shape_cast %0 : vector<1x24x32xbf16> to vector<24x32xbf16>
    %c0_2 = arith.constant 0 : index
    %c0_3 = arith.constant 0 : index
    %c0_4 = arith.constant 0 : index
    %2 = vector.load %arg5[%c0_2, %c0_3, %c0_4] : memref<3x32x32xbf16, #tpu.memory_space<vmem>>, vector<1x32x32xbf16>
    %3 = vector.shape_cast %2 : vector<1x32x32xbf16> to vector<32x32xbf16>
    %cst = arith.constant dense<0.000000e+00> : vector<24x32xf32>
    %4 = tpu.matmul %1, %3, %cst {dimension_numbers = #tpu.dot_dimension_numbers<[1], [0], [0], [1], [0, 0, 1, 1], [], []>} : vector<24x32xbf16>, vector<32x32xbf16>, vector<24x32xf32> -> vector<24x32xf32>
    %c0_5 = arith.constant 0 : index
    %c0_6 = arith.constant 0 : index
    %c0_7 = arith.constant 0 : index
    %5 = vector.load %arg3[%c0_5, %c0_6, %c0_7] : memref<1x24x32xbf16, #tpu.memory_space<vmem>>, vector<1x24x32xbf16>
    %6 = vector.shape_cast %5 : vector<1x24x32xbf16> to vector<24x32xbf16>
    %c1 = arith.constant 1 : index
    %c0_8 = arith.constant 0 : index
    %c0_9 = arith.constant 0 : index
    %7 = vector.load %arg5[%c1, %c0_8, %c0_9] : memref<3x32x32xbf16, #tpu.memory_space<vmem>>, vector<1x32x32xbf16>
    %8 = vector.shape_cast %7 : vector<1x32x32xbf16> to vector<32x32xbf16>
    %cst_10 = arith.constant dense<0.000000e+00> : vector<24x32xf32>
    %9 = tpu.matmul %6, %8, %cst_10 {dimension_numbers = #tpu.dot_dimension_numbers<[1], [0], [0], [1], [0, 0, 1, 1], [], []>} : vector<24x32xbf16>, vector<32x32xbf16>, vector<24x32xf32> -> vector<24x32xf32>
    %10 = arith.addf %4, %9 : vector<24x32xf32>
    %c0_11 = arith.constant 0 : index
    %c0_12 = arith.constant 0 : index
    %c0_13 = arith.constant 0 : index
    %11 = vector.load %arg4[%c0_11, %c0_12, %c0_13] : memref<1x24x32xbf16, #tpu.memory_space<vmem>>, vector<1x24x32xbf16>
    %12 = vector.shape_cast %11 : vector<1x24x32xbf16> to vector<24x32xbf16>
    %c2 = arith.constant 2 : index
    %c0_14 = arith.constant 0 : index
    %c0_15 = arith.constant 0 : index
    %13 = vector.load %arg5[%c2, %c0_14, %c0_15] : memref<3x32x32xbf16, #tpu.memory_space<vmem>>, vector<1x32x32xbf16>
    %14 = vector.shape_cast %13 : vector<1x32x32xbf16> to vector<32x32xbf16>
    %cst_16 = arith.constant dense<0.000000e+00> : vector<24x32xf32>
    %15 = tpu.matmul %12, %14, %cst_16 {dimension_numbers = #tpu.dot_dimension_numbers<[1], [0], [0], [1], [0, 0, 1, 1], [], []>} : vector<24x32xbf16>, vector<32x32xbf16>, vector<24x32xf32> -> vector<24x32xf32>
    %16 = arith.addf %10, %15 : vector<24x32xf32>
    %c0_17 = arith.constant 0 : index
    %c0_18 = arith.constant 0 : index
    %17 = vector.load %arg6[%c0_17, %c0_18] : memref<1x32xf32, #tpu.memory_space<vmem>>, vector<1x32xf32>
    %18 = vector.broadcast %17 : vector<1x32xf32> to vector<24x32xf32>
    %19 = arith.addf %16, %18 : vector<24x32xf32>
    %20 = arith.mulf %19, %19 : vector<24x32xf32>
    %21 = arith.mulf %19, %20 : vector<24x32xf32>
    %cst_19 = arith.constant 4.471500e-02 : f32
    %22 = vector.broadcast %cst_19 : f32 to vector<24x32xf32>
    %23 = arith.mulf %22, %21 : vector<24x32xf32>
    %24 = arith.addf %19, %23 : vector<24x32xf32>
    %cst_20 = arith.constant 0.797884583 : f32
    %25 = vector.broadcast %cst_20 : f32 to vector<24x32xf32>
    %26 = arith.mulf %25, %24 : vector<24x32xf32>
    %27 = math.tanh %26 : vector<24x32xf32>
    %cst_21 = arith.constant 1.000000e+00 : f32
    %28 = vector.broadcast %cst_21 : f32 to vector<24x32xf32>
    %29 = arith.addf %28, %27 : vector<24x32xf32>
    %cst_22 = arith.constant 5.000000e-01 : f32
    %30 = vector.broadcast %cst_22 : f32 to vector<24x32xf32>
    %31 = arith.mulf %30, %29 : vector<24x32xf32>
    %32 = arith.mulf %19, %31 : vector<24x32xf32>
    %c0_23 = arith.constant 0 : index
    %c0_24 = arith.constant 0 : index
    %33 = vector.load %arg7[%c0_23, %c0_24] : memref<24x32xf32, #tpu.memory_space<vmem>>, vector<24x32xf32>
    %34 = arith.addf %32, %33 : vector<24x32xf32>
    %c0_25 = arith.constant 0 : index
    %c0_26 = arith.constant 0 : index
    %c0_27 = arith.constant 0 : index
    %35 = vector.load %arg8[%c0_25, %c0_26, %c0_27] : memref<1x24x32xf32, #tpu.memory_space<vmem>>, vector<1x24x32xf32>
    %36 = vector.shape_cast %35 : vector<1x24x32xf32> to vector<24x32xf32>
    %37 = vector.shape_cast %34 : vector<24x32xf32> to vector<1x24x32xf32>
    tpu.vector_store %arg8[%c0_25, %c0_26, %c0_27], %37 {strides = array<i32>} : memref<1x24x32xf32, #tpu.memory_space<vmem>>, vector<1x24x32xf32>,
    return
  }
  func.func @transform_0(%arg0: i32, %arg1: i32) -> (i32, i32, i32) {
    %c0_i32 = arith.constant 0 : i32
    %c0_i32_0 = arith.constant 0 : i32
    return %arg0, %arg1, %c0_i32 : i32, i32, i32
  }
  func.func @transform_1(%arg0: i32, %arg1: i32) -> (i32, i32, i32) {
    %c0_i32 = arith.constant 0 : i32
    %c0_i32_0 = arith.constant 0 : i32
    return %arg0, %arg1, %c0_i32 : i32, i32, i32
  }
  func.func @transform_2(%arg0: i32, %arg1: i32) -> (i32, i32, i32) {
    %c0_i32 = arith.constant 0 : i32
    %c0_i32_0 = arith.constant 0 : i32
    return %arg0, %arg1, %c0_i32 : i32, i32, i32
  }
  func.func @transform_3(%arg0: i32, %arg1: i32) -> (i32, i32, i32) {
    %c0_i32 = arith.constant 0 : i32
    %c0_i32_0 = arith.constant 0 : i32
    %c0_i32_1 = arith.constant 0 : i32
    %c0_i32_2 = arith.constant 0 : i32
    return %c0_i32, %c0_i32_0, %c0_i32_1 : i32, i32, i32
  }
  func.func @transform_4(%arg0: i32, %arg1: i32) -> (i32, i32) {
    %c0_i32 = arith.constant 0 : i32
    %c0_i32_0 = arith.constant 0 : i32
    %c0_i32_1 = arith.constant 0 : i32
    return %c0_i32, %c0_i32_0 : i32, i32
  }
  func.func @transform_5(%arg0: i32, %arg1: i32) -> (i32, i32) {
    %c0_i32 = arith.constant 0 : i32
    %c0_i32_0 = arith.constant 0 : i32
    return %arg1, %c0_i32 : i32, i32
  }
  func.func @transform_6(%arg0: i32, %arg1: i32) -> (i32, i32, i32) {
    %c0_i32 = arith.constant 0 : i32
    %c0_i32_0 = arith.constant 0 : i32
    return %arg0, %arg1, %c0_i32 : i32, i32, i32
  }
}

module attributes {stable_mosaic.version = 11 : i64} {
  func.func @_layernorm_kernel(%arg0: i32, %arg1: i32, %arg2: memref<1x24x32xf32, #tpu.memory_space<vmem>>, %arg3: memref<1x32xf32, #tpu.memory_space<vmem>>, %arg4: memref<1x32xf32, #tpu.memory_space<vmem>>, %arg5: memref<1x24x32xf32, #tpu.memory_space<vmem>>) attributes {dimension_semantics = [#tpu.dimension_semantics<parallel>, #tpu.dimension_semantics<parallel>], iteration_bounds = array<i64: 2, 1>, scalar_prefetch = 0 : i64, scratch_operands = 0 : i64, tpu.core_type = #tpu.core_type<tc>, window_params = [{transform_indices = @transform_0, window_bounds = array<i64: 1, 24, 32>}, {pipeline_mode = #tpu.pipeline_mode<synchronous>, transform_indices = @transform_1, window_bounds = array<i64: 1, 32>}, {pipeline_mode = #tpu.pipeline_mode<synchronous>, transform_indices = @transform_2, window_bounds = array<i64: 1, 32>}, {transform_indices = @transform_3, window_bounds = array<i64: 1, 24, 32>}]} {
    %c0 = arith.constant 0 : index
    %c0_0 = arith.constant 0 : index
    %c0_1 = arith.constant 0 : index
    %0 = vector.load %arg2[%c0, %c0_0, %c0_1] : memref<1x24x32xf32, #tpu.memory_space<vmem>>, vector<1x24x32xf32>
    %1 = vector.shape_cast %0 : vector<1x24x32xf32> to vector<24x32xf32>
    %cst = arith.constant dense<0.000000e+00> : vector<24xf32>
    %2 = vector.multi_reduction <add>, %1, %cst [1] : vector<24x32xf32> to vector<24xf32>
    %3 = vector.shape_cast %2 : vector<24xf32> to vector<24x1xf32>
    %cst_2 = arith.constant 3.200000e+01 : f32
    %4 = vector.broadcast %cst_2 : f32 to vector<24x1xf32>
    %5 = arith.divf %3, %4 : vector<24x1xf32>
    %6 = vector.broadcast %5 : vector<24x1xf32> to vector<24x32xf32>
    %7 = arith.subf %1, %6 : vector<24x32xf32>
    %8 = arith.mulf %7, %7 : vector<24x32xf32>
    %cst_3 = arith.constant dense<0.000000e+00> : vector<24xf32>
    %9 = vector.multi_reduction <add>, %8, %cst_3 [1] : vector<24x32xf32> to vector<24xf32>
    %10 = vector.shape_cast %9 : vector<24xf32> to vector<24x1xf32>
    %cst_4 = arith.constant 3.200000e+01 : f32
    %11 = vector.broadcast %cst_4 : f32 to vector<24x1xf32>
    %12 = arith.divf %10, %11 : vector<24x1xf32>
    %cst_5 = arith.constant 9.99999974E-6 : f32
    %13 = vector.broadcast %cst_5 : f32 to vector<24x1xf32>
    %14 = arith.addf %12, %13 : vector<24x1xf32>
    %15 = math.rsqrt %14 : vector<24x1xf32>
    %16 = vector.broadcast %15 : vector<24x1xf32> to vector<24x32xf32>
    %17 = arith.mulf %7, %16 : vector<24x32xf32>
    %c0_6 = arith.constant 0 : index
    %c0_7 = arith.constant 0 : index
    %18 = vector.load %arg3[%c0_6, %c0_7] : memref<1x32xf32, #tpu.memory_space<vmem>>, vector<1x32xf32>
    %19 = vector.broadcast %18 : vector<1x32xf32> to vector<24x32xf32>
    %20 = arith.mulf %17, %19 : vector<24x32xf32>
    %c0_8 = arith.constant 0 : index
    %c0_9 = arith.constant 0 : index
    %21 = vector.load %arg4[%c0_8, %c0_9] : memref<1x32xf32, #tpu.memory_space<vmem>>, vector<1x32xf32>
    %22 = vector.broadcast %21 : vector<1x32xf32> to vector<24x32xf32>
    %23 = arith.addf %20, %22 : vector<24x32xf32>
    %c0_10 = arith.constant 0 : index
    %c0_11 = arith.constant 0 : index
    %c0_12 = arith.constant 0 : index
    %24 = vector.load %arg5[%c0_10, %c0_11, %c0_12] : memref<1x24x32xf32, #tpu.memory_space<vmem>>, vector<1x24x32xf32>
    %25 = vector.shape_cast %24 : vector<1x24x32xf32> to vector<24x32xf32>
    %26 = vector.shape_cast %23 : vector<24x32xf32> to vector<1x24x32xf32>
    tpu.vector_store %arg5[%c0_10, %c0_11, %c0_12], %26 {strides = array<i32>} : memref<1x24x32xf32, #tpu.memory_space<vmem>>, vector<1x24x32xf32>,
    return
  }
  func.func @transform_0(%arg0: i32, %arg1: i32) -> (i32, i32, i32) {
    %c0_i32 = arith.constant 0 : i32
    %c0_i32_0 = arith.constant 0 : i32
    return %arg0, %arg1, %c0_i32 : i32, i32, i32
  }
  func.func @transform_1(%arg0: i32, %arg1: i32) -> (i32, i32) {
    %c0_i32 = arith.constant 0 : i32
    %c0_i32_0 = arith.constant 0 : i32
    %c0_i32_1 = arith.constant 0 : i32
    return %c0_i32, %c0_i32_0 : i32, i32
  }
  func.func @transform_2(%arg0: i32, %arg1: i32) -> (i32, i32) {
    %c0_i32 = arith.constant 0 : i32
    %c0_i32_0 = arith.constant 0 : i32
    %c0_i32_1 = arith.constant 0 : i32
    return %c0_i32, %c0_i32_0 : i32, i32
  }
  func.func @transform_3(%arg0: i32, %arg1: i32) -> (i32, i32, i32) {
    %c0_i32 = arith.constant 0 : i32
    %c0_i32_0 = arith.constant 0 : i32
    return %arg0, %arg1, %c0_i32 : i32, i32, i32
  }
}

module attributes {stable_mosaic.version = 11 : i64} {
  func.func @_proj_mlp_kernel(%arg0: i32, %arg1: i32, %arg2: i32, %arg3: memref<1x24x32xf32, #tpu.memory_space<vmem>>, %arg4: memref<1x24x32xbf16, #tpu.memory_space<vmem>>, %arg5: memref<32x32xbf16, #tpu.memory_space<vmem>>, %arg6: memref<1x32xf32, #tpu.memory_space<vmem>>, %arg7: memref<1x32xf32, #tpu.memory_space<vmem>>, %arg8: memref<1x32xf32, #tpu.memory_space<vmem>>, %arg9: memref<32x128xbf16, #tpu.memory_space<vmem>>, %arg10: memref<1x128xf32, #tpu.memory_space<vmem>>, %arg11: memref<128x32xbf16, #tpu.memory_space<vmem>>, %arg12: memref<1x32xf32, #tpu.memory_space<vmem>>, %arg13: memref<1x24x32xf32, #tpu.memory_space<vmem>>, %arg14: memref<24x32xf32, #tpu.memory_space<vmem>>, %arg15: memref<24x32xbf16, #tpu.memory_space<vmem>>) attributes {dimension_semantics = [#tpu.dimension_semantics<parallel>, #tpu.dimension_semantics<parallel>, #tpu.dimension_semantics<arbitrary>], iteration_bounds = array<i64: 2, 1, 1>, scalar_prefetch = 0 : i64, scratch_operands = 2 : i64, tpu.core_type = #tpu.core_type<tc>, window_params = [{transform_indices = @transform_0, window_bounds = array<i64: 1, 24, 32>}, {transform_indices = @transform_1, window_bounds = array<i64: 1, 24, 32>}, {pipeline_mode = #tpu.pipeline_mode<synchronous>, transform_indices = @transform_2, window_bounds = array<i64: 32, 32>}, {pipeline_mode = #tpu.pipeline_mode<synchronous>, transform_indices = @transform_3, window_bounds = array<i64: 1, 32>}, {pipeline_mode = #tpu.pipeline_mode<synchronous>, transform_indices = @transform_4, window_bounds = array<i64: 1, 32>}, {pipeline_mode = #tpu.pipeline_mode<synchronous>, transform_indices = @transform_5, window_bounds = array<i64: 1, 32>}, {transform_indices = @transform_6, window_bounds = array<i64: 32, 128>}, {transform_indices = @transform_7, window_bounds = array<i64: 1, 128>}, {transform_indices = @transform_8, window_bounds = array<i64: 128, 32>}, {pipeline_mode = #tpu.pipeline_mode<synchronous>, transform_indices = @transform_9, window_bounds = array<i64: 1, 32>}, {transform_indices = @transform_10, window_bounds = array<i64: 1, 24, 32>}]} {
    %c0_i32 = arith.constant 0 : i32
    %0 = arith.cmpi eq, %arg2, %c0_i32 : i32
    %1 = arith.extui %0 : i1 to i32
    %c0_i32_0 = arith.constant 0 : i32
    %2 = arith.cmpi ne, %1, %c0_i32_0 : i32
    scf.if %2 {
      %c0_19 = arith.constant 0 : index
      %c0_20 = arith.constant 0 : index
      %c0_21 = arith.constant 0 : index
      %31 = vector.load %arg3[%c0_19, %c0_20, %c0_21] : memref<1x24x32xf32, #tpu.memory_space<vmem>>, vector<1x24x32xf32>
      %32 = vector.shape_cast %31 : vector<1x24x32xf32> to vector<24x32xf32>
      %c0_22 = arith.constant 0 : index
      %c0_23 = arith.constant 0 : index
      %c0_24 = arith.constant 0 : index
      %33 = vector.load %arg4[%c0_22, %c0_23, %c0_24] : memref<1x24x32xbf16, #tpu.memory_space<vmem>>, vector<1x24x32xbf16>
      %34 = vector.shape_cast %33 : vector<1x24x32xbf16> to vector<24x32xbf16>
      %c0_25 = arith.constant 0 : index
      %c0_26 = arith.constant 0 : index
      %35 = vector.load %arg5[%c0_25, %c0_26] : memref<32x32xbf16, #tpu.memory_space<vmem>>, vector<32x32xbf16>
      %cst_27 = arith.constant dense<0.000000e+00> : vector<24x32xf32>
      %36 = tpu.matmul %34, %35, %cst_27 {dimension_numbers = #tpu.dot_dimension_numbers<[1], [0], [0], [1], [0, 0, 1, 1], [], []>} : vector<24x32xbf16>, vector<32x32xbf16>, vector<24x32xf32> -> vector<24x32xf32>
      %37 = arith.addf %32, %36 : vector<24x32xf32>
      %c0_28 = arith.constant 0 : index
      %c0_29 = arith.constant 0 : index
      %38 = vector.load %arg6[%c0_28, %c0_29] : memref<1x32xf32, #tpu.memory_space<vmem>>, vector<1x32xf32>
      %39 = vector.broadcast %38 : vector<1x32xf32> to vector<24x32xf32>
      %40 = arith.addf %37, %39 : vector<24x32xf32>
      %cst_30 = arith.constant dense<0.000000e+00> : vector<24xf32>
      %41 = vector.multi_reduction <add>, %40, %cst_30 [1] : vector<24x32xf32> to vector<24xf32>
      %42 = vector.shape_cast %41 : vector<24xf32> to vector<24x1xf32>
      %cst_31 = arith.constant 3.200000e+01 : f32
      %43 = vector.broadcast %cst_31 : f32 to vector<24x1xf32>
      %44 = arith.divf %42, %43 : vector<24x1xf32>
      %45 = vector.broadcast %44 : vector<24x1xf32> to vector<24x32xf32>
      %46 = arith.subf %40, %45 : vector<24x32xf32>
      %47 = arith.mulf %46, %46 : vector<24x32xf32>
      %cst_32 = arith.constant dense<0.000000e+00> : vector<24xf32>
      %48 = vector.multi_reduction <add>, %47, %cst_32 [1] : vector<24x32xf32> to vector<24xf32>
      %49 = vector.shape_cast %48 : vector<24xf32> to vector<24x1xf32>
      %cst_33 = arith.constant 3.200000e+01 : f32
      %50 = vector.broadcast %cst_33 : f32 to vector<24x1xf32>
      %51 = arith.divf %49, %50 : vector<24x1xf32>
      %cst_34 = arith.constant 9.99999974E-6 : f32
      %52 = vector.broadcast %cst_34 : f32 to vector<24x1xf32>
      %53 = arith.addf %51, %52 : vector<24x1xf32>
      %54 = math.rsqrt %53 : vector<24x1xf32>
      %55 = vector.broadcast %54 : vector<24x1xf32> to vector<24x32xf32>
      %56 = arith.mulf %46, %55 : vector<24x32xf32>
      %c0_35 = arith.constant 0 : index
      %c0_36 = arith.constant 0 : index
      %57 = vector.load %arg7[%c0_35, %c0_36] : memref<1x32xf32, #tpu.memory_space<vmem>>, vector<1x32xf32>
      %58 = vector.broadcast %57 : vector<1x32xf32> to vector<24x32xf32>
      %59 = arith.mulf %56, %58 : vector<24x32xf32>
      %c0_37 = arith.constant 0 : index
      %c0_38 = arith.constant 0 : index
      %60 = vector.load %arg8[%c0_37, %c0_38] : memref<1x32xf32, #tpu.memory_space<vmem>>, vector<1x32xf32>
      %61 = vector.broadcast %60 : vector<1x32xf32> to vector<24x32xf32>
      %62 = arith.addf %59, %61 : vector<24x32xf32>
      %63 = arith.truncf %62 : vector<24x32xf32> to vector<24x32xbf16>
      %c0_39 = arith.constant 0 : index
      %c0_40 = arith.constant 0 : index
      %64 = vector.load %arg15[%c0_39, %c0_40] : memref<24x32xbf16, #tpu.memory_space<vmem>>, vector<24x32xbf16>
      tpu.vector_store %arg15[%c0_39, %c0_40], %63 {strides = array<i32>} : memref<24x32xbf16, #tpu.memory_space<vmem>>, vector<24x32xbf16>,
      %c0_41 = arith.constant 0 : index
      %c0_42 = arith.constant 0 : index
      %65 = vector.load %arg12[%c0_41, %c0_42] : memref<1x32xf32, #tpu.memory_space<vmem>>, vector<1x32xf32>
      %66 = vector.broadcast %65 : vector<1x32xf32> to vector<24x32xf32>
      %67 = arith.addf %40, %66 : vector<24x32xf32>
      %c0_43 = arith.constant 0 : index
      %c0_44 = arith.constant 0 : index
      %68 = vector.load %arg14[%c0_43, %c0_44] : memref<24x32xf32, #tpu.memory_space<vmem>>, vector<24x32xf32>
      tpu.vector_store %arg14[%c0_43, %c0_44], %67 {strides = array<i32>} : memref<24x32xf32, #tpu.memory_space<vmem>>, vector<24x32xf32>,
    } else {
    }
    %c0 = arith.constant 0 : index
    %c0_1 = arith.constant 0 : index
    %3 = vector.load %arg15[%c0, %c0_1] : memref<24x32xbf16, #tpu.memory_space<vmem>>, vector<24x32xbf16>
    %c0_2 = arith.constant 0 : index
    %c0_3 = arith.constant 0 : index
    %4 = vector.load %arg9[%c0_2, %c0_3] : memref<32x128xbf16, #tpu.memory_space<vmem>>, vector<32x128xbf16>
    %cst = arith.constant dense<0.000000e+00> : vector<24x128xf32>
    %5 = tpu.matmul %3, %4, %cst {dimension_numbers = #tpu.dot_dimension_numbers<[1], [0], [0], [1], [0, 0, 1, 1], [], []>} : vector<24x32xbf16>, vector<32x128xbf16>, vector<24x128xf32> -> vector<24x128xf32>
    %c0_4 = arith.constant 0 : index
    %c0_5 = arith.constant 0 : index
    %6 = vector.load %arg10[%c0_4, %c0_5] : memref<1x128xf32, #tpu.memory_space<vmem>>, vector<1x128xf32>
    %7 = vector.broadcast %6 : vector<1x128xf32> to vector<24x128xf32>
    %8 = arith.addf %5, %7 : vector<24x128xf32>
    %9 = arith.mulf %8, %8 : vector<24x128xf32>
    %10 = arith.mulf %8, %9 : vector<24x128xf32>
    %cst_6 = arith.constant 4.471500e-02 : f32
    %11 = vector.broadcast %cst_6 : f32 to vector<24x128xf32>
    %12 = arith.mulf %11, %10 : vector<24x128xf32>
    %13 = arith.addf %8, %12 : vector<24x128xf32>
    %cst_7 = arith.constant 0.797884583 : f32
    %14 = vector.broadcast %cst_7 : f32 to vector<24x128xf32>
    %15 = arith.mulf %14, %13 : vector<24x128xf32>
    %16 = math.tanh %15 : vector<24x128xf32>
    %cst_8 = arith.constant 1.000000e+00 : f32
    %17 = vector.broadcast %cst_8 : f32 to vector<24x128xf32>
    %18 = arith.addf %17, %16 : vector<24x128xf32>
    %cst_9 = arith.constant 5.000000e-01 : f32
    %19 = vector.broadcast %cst_9 : f32 to vector<24x128xf32>
    %20 = arith.mulf %19, %18 : vector<24x128xf32>
    %21 = arith.mulf %8, %20 : vector<24x128xf32>
    %c0_10 = arith.constant 0 : index
    %c0_11 = arith.constant 0 : index
    %22 = vector.load %arg14[%c0_10, %c0_11] : memref<24x32xf32, #tpu.memory_space<vmem>>, vector<24x32xf32>
    %23 = arith.truncf %21 : vector<24x128xf32> to vector<24x128xbf16>
    %c0_12 = arith.constant 0 : index
    %c0_13 = arith.constant 0 : index
    %24 = vector.load %arg11[%c0_12, %c0_13] : memref<128x32xbf16, #tpu.memory_space<vmem>>, vector<128x32xbf16>
    %cst_14 = arith.constant dense<0.000000e+00> : vector<24x32xf32>
    %25 = tpu.matmul %23, %24, %cst_14 {dimension_numbers = #tpu.dot_dimension_numbers<[1], [0], [0], [1], [0, 0, 1, 1], [], []>} : vector<24x128xbf16>, vector<128x32xbf16>, vector<24x32xf32> -> vector<24x32xf32>
    %26 = arith.addf %22, %25 : vector<24x32xf32>
    %c0_15 = arith.constant 0 : index
    %c0_16 = arith.constant 0 : index
    %27 = vector.load %arg14[%c0_15, %c0_16] : memref<24x32xf32, #tpu.memory_space<vmem>>, vector<24x32xf32>
    tpu.vector_store %arg14[%c0_15, %c0_16], %26 {strides = array<i32>} : memref<24x32xf32, #tpu.memory_space<vmem>>, vector<24x32xf32>,
    %c0_i32_17 = arith.constant 0 : i32
    %28 = arith.cmpi eq, %arg2, %c0_i32_17 : i32
    %29 = arith.extui %28 : i1 to i32
    %c0_i32_18 = arith.constant 0 : i32
    %30 = arith.cmpi ne, %29, %c0_i32_18 : i32
    scf.if %30 {
      %c0_19 = arith.constant 0 : index
      %c0_20 = arith.constant 0 : index
      %31 = vector.load %arg14[%c0_19, %c0_20] : memref<24x32xf32, #tpu.memory_space<vmem>>, vector<24x32xf32>
      %c0_21 = arith.constant 0 : index
      %c0_22 = arith.constant 0 : index
      %c0_23 = arith.constant 0 : index
      %32 = vector.load %arg13[%c0_21, %c0_22, %c0_23] : memref<1x24x32xf32, #tpu.memory_space<vmem>>, vector<1x24x32xf32>
      %33 = vector.shape_cast %32 : vector<1x24x32xf32> to vector<24x32xf32>
      %34 = vector.shape_cast %31 : vector<24x32xf32> to vector<1x24x32xf32>
      tpu.vector_store %arg13[%c0_21, %c0_22, %c0_23], %34 {strides = array<i32>} : memref<1x24x32xf32, #tpu.memory_space<vmem>>, vector<1x24x32xf32>,
    } else {
    }
    return
  }
  func.func @transform_0(%arg0: i32, %arg1: i32, %arg2: i32) -> (i32, i32, i32) {
    %c0_i32 = arith.constant 0 : i32
    %c0_i32_0 = arith.constant 0 : i32
    return %arg0, %arg1, %c0_i32 : i32, i32, i32
  }
  func.func @transform_1(%arg0: i32, %arg1: i32, %arg2: i32) -> (i32, i32, i32) {
    %c0_i32 = arith.constant 0 : i32
    %c0_i32_0 = arith.constant 0 : i32
    return %arg0, %arg1, %c0_i32 : i32, i32, i32
  }
  func.func @transform_2(%arg0: i32, %arg1: i32, %arg2: i32) -> (i32, i32) {
    %c0_i32 = arith.constant 0 : i32
    %c0_i32_0 = arith.constant 0 : i32
    %c0_i32_1 = arith.constant 0 : i32
    return %c0_i32, %c0_i32_0 : i32, i32
  }
  func.func @transform_3(%arg0: i32, %arg1: i32, %arg2: i32) -> (i32, i32) {
    %c0_i32 = arith.constant 0 : i32
    %c0_i32_0 = arith.constant 0 : i32
    %c0_i32_1 = arith.constant 0 : i32
    return %c0_i32, %c0_i32_0 : i32, i32
  }
  func.func @transform_4(%arg0: i32, %arg1: i32, %arg2: i32) -> (i32, i32) {
    %c0_i32 = arith.constant 0 : i32
    %c0_i32_0 = arith.constant 0 : i32
    %c0_i32_1 = arith.constant 0 : i32
    return %c0_i32, %c0_i32_0 : i32, i32
  }
  func.func @transform_5(%arg0: i32, %arg1: i32, %arg2: i32) -> (i32, i32) {
    %c0_i32 = arith.constant 0 : i32
    %c0_i32_0 = arith.constant 0 : i32
    %c0_i32_1 = arith.constant 0 : i32
    return %c0_i32, %c0_i32_0 : i32, i32
  }
  func.func @transform_6(%arg0: i32, %arg1: i32, %arg2: i32) -> (i32, i32) {
    %c0_i32 = arith.constant 0 : i32
    %c0_i32_0 = arith.constant 0 : i32
    return %c0_i32, %arg2 : i32, i32
  }
  func.func @transform_7(%arg0: i32, %arg1: i32, %arg2: i32) -> (i32, i32) {
    %c0_i32 = arith.constant 0 : i32
    %c0_i32_0 = arith.constant 0 : i32
    return %c0_i32, %arg2 : i32, i32
  }
  func.func @transform_8(%arg0: i32, %arg1: i32, %arg2: i32) -> (i32, i32) {
    %c0_i32 = arith.constant 0 : i32
    %c0_i32_0 = arith.constant 0 : i32
    return %arg2, %c0_i32 : i32, i32
  }
  func.func @transform_9(%arg0: i32, %arg1: i32, %arg2: i32) -> (i32, i32) {
    %c0_i32 = arith.constant 0 : i32
    %c0_i32_0 = arith.constant 0 : i32
    %c0_i32_1 = arith.constant 0 : i32
    return %c0_i32, %c0_i32_0 : i32, i32
  }
  func.func @transform_10(%arg0: i32, %arg1: i32, %arg2: i32) -> (i32, i32, i32) {
    %c0_i32 = arith.constant 0 : i32
    %c0_i32_0 = arith.constant 0 : i32
    return %arg0, %arg1, %c0_i32 : i32, i32, i32
  }
}

</mosaic_0001>

<bundles_post_ra>
// kernel: audio_encoder_forward.9
= control target key start
LH: loop header
LB: loop body
LE: loop exit
PB: predicated region body
PF: predicated region fallthrough
CT: control target
= control target key end

     0   :  { %s1864_s0 = inlined_call_operand.hbm [shape: bf16[2,48,16], index: 0, kind: input, shape index: {}]   ;;  %s1865_s1 = inlined_call_operand.hbm [shape: bf16[2,48,16], index: 1, kind: input, shape index: {}]   ;;  %s1866_s2 = inlined_call_operand.hbm [shape: bf16[2,48,16], index: 2, kind: input, shape index: {}]   ;;  %s1867_s3 = inlined_call_operand.hbm [shape: bf16[3,16,32], index: 3, kind: input, shape index: {}]   ;;  %s1868_s4 = inlined_call_operand.hbm [shape: f32[1,32], index: 4, kind: input, shape index: {}]   ;;  %s1869_s5 = inlined_call_operand.hbm [shape: bf16[2,48,32], index: 5, kind: output, shape index: {}]  }
   0x1   :  { %1891 = sst [smem:[#allocation21_spill]] %s1865_s1 }
   0x2   :  { %1892 = sst [smem:[#allocation22_spill]] %s1867_s3 }
   0x3   :  { %1893 = sst [smem:[#allocation23_spill]] %s1868_s4 }
   0x4   :  { %10 = vsyncpa [#allocation3], 0 }
   0x5   :  { %12 = vsyncpa [#allocation3 + $0x1], 0 }
   0x6   :  { %13 = vsyncpa [#allocation6], 0 }
   0x7   :  { %15 = vsyncpa [#allocation6 + $0x1], 0 }
   0x8   :  { %16 = vsyncpa [#allocation9], 0 }
   0x9   :  { %17 = vsyncpa [#allocation4], 0 }
   0xa   :  { %19 = vsyncpa [#allocation4 + $0x1], 0  ;;  %s1457_s18 = smov 0   ;;  %s1459_s19 = smov 0  }
   0xb   :  { %s1461_s20 = smov 0   ;;  %s1463_s21 = smov 0  }
   0xc   :  { %s1465_s22 = smov 0   ;;  %s1467_s23 = smov 0  }
   0xd LB: > { %1894 = sst [smem:[#allocation16_spill]] %s1409_s22  ;;  %s1488_s24 = sadd.s32 4294967295, %s1413_s23   ;;  %s1413_s23 = sphi %s1467_s23, %s25_s23   ;;  %s1409_s22 = sphi %s1465_s22, %s1932_s22   ;;  %s1405_s21 = sphi %s1463_s21, %s1931_s21   ;;  %s1401_s20 = sphi %s1461_s20, %s1935_s20   ;;  %s1397_s19 = sphi %s1459_s19, %s1934_s19   ;;  %s1393_s18 = sphi %s1457_s18, %s1933_s18  }
   0xe   : > { %1895 = sst [smem:[#allocation17_spill]] %s1413_s23  ;;  %s942_s25 = sadd.s32 4294967294, %s1413_s23  }
   0xf   : > { %p53_p0 = scmp.ne.s32.totalorder %s1401_s20, %s1397_s19  ;;  %p54_p1 = scmp.eq.s32.totalorder %s1413_s23, 0 }
  0x10   : > { %p59_p2 = scmp.ne.s32.totalorder %s1397_s19, %s1393_s18  ;;  %p1870_p3 = scmp.eq.s32.totalorder %s1488_s24, 0 }
  0x11   : > { %p183_p4 = scmp.eq.s32.totalorder %s1488_s24, 1  ;;  %p1499_p5 = por %p54_p1, %p53_p0 }
  0x12   : > { %p189_p6 = scmp.eq.s32.totalorder %s942_s25, 1  ;;  %p1505_p7 = por %p1870_p3, %p59_p2 }
  0x13   : > { %p1509_p8 = por %p183_p4, %p53_p0  ;;  %p943_p10 = scmp.ge.s32.totalorder %s1413_s23, 1 }
  0x14   : > { %s1897_s28 = scalar_select %p1505_p7, 1, 0 }
  0x15   : > { %s1898_s29 = scalar_select %p1509_p8, 1, 0 }
  0x16   : > { %p1513_p9 = por %p189_p6, %p59_p2  ;;  %p196_p11 = scmp.lt.s32.totalorder %s1413_s23, 3 }
  0x17   : > { %s1415_s7 = smov [#allocation8]   ;;  %s37_s10 = sadd.s32 1, %s1409_s22 }
  0x18   : > { %s1899_s30 = scalar_select %p1513_p9, 1, 0 }
  0x19   : > { %p1519_p12 = pnand %p943_p10, %p196_p11  ;;  %s208_s8 = sshll.u32 %s1415_s7, 4  ;;  %s1523_s8 = int_to_ptr.vmem [resolvable:$true] %s208_s8 }
  0x1a   : > { %1900 = sst [smem:[#allocation18_spill]] %s1899_s30  ;;  %s1874_s11 = sand.u32 1, %s1401_s20  }
  0x1b   : > { %s1901_s6 = scalar_select %p1519_p12, 1, 0 }
  0x1c   : > { %p1070_p13 = pneg %p1519_p12  ;;  %p1537_p4 = scmp.ge.s32.totalorder %s37_s10, 2 }
  0x1d   : > { %s1904_s3 = sld [smem:[#allocation22_spill]] }
  0x1e   : > { %p1531_p2 = pnand %p1070_p13, %p1870_p3 }
  0x20   : > { %s1902_s9 = scalar_select %p1531_p2, 1, 0 }
  0x21   : > { %p1881_p10 = pneg %p1531_p2 }
  0x23   : > { %s1177_s15 = scalar_lea.hbm %s1904_s3, 384 }
  0x24   : > { %p1178_p6 = scmp.ne.s32.totalorder %s1904_s3, %s1177_s15  ;;  %p1184_p0 = scmp.lt.u32.totalorder %s1177_s15, %s1904_s3 }
  0x26   : > { %p1180_p11 = pnand %p1881_p10, %p1178_p6 }
  0x28   : > { %p1181_p13 = pneg %p1180_p11 }
  0x2a   : > { %p1186_p3 = pnand %p1184_p0, %p1181_p13 }
  0x2c   : > { %1189 = shalt.err (!%p1186_p3)
}
  0x2d   : > { %s1190_s13 = scalar_lea.vmem %s1523_s8, 384  ;;  %p1198_p7 = scmp.lt.s32.totalorder %s1523_s8, %s1523_s8 }
  0x2e   : > { %p1191_p1 = scmp.ne.s32.totalorder %s1523_s8, %s1190_s13  ;;  %p1199_p6 = scmp.lt.s32.totalorder %s1190_s13, %s1190_s13 }
  0x30   : > { %p1193_p9 = pnand %p1191_p1, %p1881_p10  ;;  %p1200_p11 = por %p1199_p6, %p1198_p7 }
  0x32   : > { %p1194_p8 = pneg %p1193_p9 }
  0x34   : > { %p1201_p12 = pnand %p1200_p11, %p1194_p8 }
  0x36   : > { %1204 = shalt.err (!%p1201_p12)
}
  0x37   : > { %s1875_s14 = smov 64   ;;  %s1877_s15 = smov 4  }
  0x38   : > { %1073 = dma.hbm_to_vmem [thread:$0]  (!%p1531_p2), %s1904_s3, 384, %s1523_s8, [#allocation9], %s1875_s14, %s1875_s14, %s1877_s15  }
  0x39   : > { %s1937_s10 = smov (%p1537_p4, %s37_s10), 0  ;;  %s1577_s25 = smul.u32 24, %s1874_s11 }
  0x3a   : > { %1905 = sst [smem:[#allocation19_spill]] %s1937_s10  ;;  %p1906_p3 = scmp.lt.s32.totalorder %s1413_s23, 2 }
  0x3b   : > { %s41_s13 = ssub.s32 %s1409_s22, %s1937_s10  ;;  %s1590_s26 = smul.u32 384, %s1409_s22 }
  0x3c   : > { %p1583_p7 = pnand %p1906_p3, %p1499_p5  ;;  %p44_p8 = scmp.eq.s32.totalorder %s41_s13, 0 }
  0x3d   : > { %s256_s8 = sand.u32 1, %s1413_s23   ;;  %s1908_s12 = sadd.s32 1, %s1401_s20 }
  0x3e   : > { %s1907_s7 = scalar_select %p1583_p7, 1, 0 }
  0x3f   : > { %s1596_s16 = scalar_select %p44_p8, %s1401_s20, %s1908_s12  }
  0x40   : > { %s1910_s1 = sld [smem:[#allocation21_spill]]  ;;  %s260_s14 = scalar_lea.vmem [#allocation5], %s1577_s25 }
  0x41   : > { %1909 = sst [smem:[#allocation20_spill]] %s1596_s16  ;;  %s269_s15 = sshll.u32 %s260_s14, 4  ;;  %s1605_s15 = int_to_ptr.vmem [resolvable:$true] %s269_s15 }
  0x42   : > { %s1418_s3 = smov [#allocation10]   ;;  %s1609_s13 = scalar_lea.sflag [#allocation6], %s256_s8 }
  0x43   : > { %s1607_s10 = sshll.u32 %s1418_s3, 4  ;;  %p1615_p9 = pneg %p1583_p7  ;;  %s223_s10 = int_to_ptr.vmem [resolvable:$true] %s1607_s10 }
  0x45   : > { %s1911_s11 = scalar_select %p1615_p9, 1, 0 }
  0x46   : > { %s1602_s27 = scalar_lea.hbm %s1910_s1, %s1590_s26  ;;  %s1210_s22 = scalar_lea.hbm %s1910_s1, 768 }
  0x47   : > { %s1205_s12 = scalar_lea.hbm %s1602_s27, 384  ;;  %p1211_p1 = scmp.lt.u32.totalorder %s1602_s27, %s1910_s1 }
  0x48   : > { %p1206_p5 = scmp.ne.s32.totalorder %s1602_s27, %s1205_s12  ;;  %p1212_p4 = scmp.lt.u32.totalorder %s1210_s22, %s1205_s12 }
  0x49   : > { %p1214_p6 = scmp.lt.u32.totalorder %s1205_s12, %s1602_s27 }
  0x4a   : > { %p1208_p12 = pnand %p1615_p9, %p1206_p5  ;;  %p1213_p13 = por %p1212_p4, %p1211_p1 }
  0x4c   : > { %p1209_p0 = pneg %p1208_p12  ;;  %p1215_p11 = por %p1214_p6, %p1213_p13 }
  0x4e   : > { %p1216_p3 = pnand %p1215_p11, %p1209_p0 }
  0x50   : > { %1219 = shalt.err (!%p1216_p3)
}
  0x51   : > { %s1220_s8 = scalar_lea.vmem %s1605_s15, 384  ;;  %s1419_s17 = smov [#allocation5]  }
  0x52   : > { %p1221_p8 = scmp.ne.s32.totalorder %s1605_s15, %s1220_s8  ;;  %s1225_s14 = sshll.u32 %s1419_s17, 4  ;;  %s1226_s14 = int_to_ptr.vmem [resolvable:$false] %s1225_s14 }
  0x53   : > { %s1227_s16 = scalar_lea.vmem %s1226_s14, 768  ;;  %p1228_p10 = scmp.lt.s32.totalorder %s1605_s15, %s1226_s14 }
  0x54   : > { %p1223_p5 = pnand %p1221_p8, %p1615_p9  ;;  %p1229_p2 = scmp.lt.s32.totalorder %s1227_s16, %s1220_s8 }
  0x56   : > { %p1224_p12 = pneg %p1223_p5  ;;  %p1230_p1 = por %p1229_p2, %p1228_p10 }
  0x58   : > { %p1231_p4 = pnand %p1230_p1, %p1224_p12 }
  0x5a   : > { %1234 = shalt.err (!%p1231_p4)
}
  0x5b   : > { %s1912_s22 = smov 4   ;;  %s1913_s12 = smov 64  }
  0x5c   : > { %1083 = dma.hbm_to_vmem [thread:$0]  (!%p1583_p7), %s1602_s27, 384, %s1605_s15, %s1609_s13, %s1913_s12, %s1913_s12, %s1912_s22  }
  0x5d   : > { %s1914_s4 = sld [smem:[#allocation23_spill]]  ;;  %p1915_p10 = scmp.ne.s32.totalorder %s1902_s9, 0 }
  0x5f   : > { %p1916_p0 = pneg %p1915_p10 }
  0x63   : > { %s1235_s14 = scalar_lea.hbm %s1914_s4, 16 }
  0x64   : > { %p1236_p2 = scmp.ne.s32.totalorder %s1914_s4, %s1235_s14  ;;  %p1242_p11 = scmp.lt.u32.totalorder %s1235_s14, %s1914_s4 }
  0x66   : > { %p1238_p13 = pnand %p1236_p2, %p1916_p0 }
  0x68   : > { %p1239_p6 = pneg %p1238_p13 }
  0x6a   : > { %p1244_p3 = pnand %p1242_p11, %p1239_p6 }
  0x6c   : > { %1247 = shalt.err (!%p1244_p3)
}
  0x6d   : > { %s1248_s15 = scalar_lea.vmem %s223_s10, 16  ;;  %p1917_p5 = pmov %p1916_p0 }
  0x6e   : > { %p1249_p8 = scmp.ne.s32.totalorder %s223_s10, %s1248_s15  ;;  %s1255_s27 = scalar_lea.vmem %s223_s10, 32 }
  0x6f   : > { %p1256_p4 = scmp.lt.s32.totalorder %s223_s10, %s223_s10  ;;  %p1257_p7 = scmp.lt.s32.totalorder %s1255_s27, %s1248_s15 }
  0x70   : > { %p1251_p12 = pnand %p1249_p8, %p1917_p5 }
  0x71   : > { %p1258_p9 = por %p1257_p7, %p1256_p4 }
  0x72   : > { %p1252_p1 = pneg %p1251_p12 }
  0x74   : > { %p1259_p0 = pnand %p1258_p9, %p1252_p1 }
  0x76   : > { %1262 = shalt.err (!%p1259_p0)
}
  0x77   : > { %1076 = dma.hbm_to_vmem [thread:$0]  (!%p1915_p10), %s1914_s4, 16, %s223_s10, [#allocation9]  }
  0x78   : > { %s1667_s14 = scalar_lea.hbm %s1864_s0, %s1590_s26  ;;  %s237_s8 = scalar_lea.vmem [#allocation2], %s1577_s25 }
  0x79   : > { %s246_s9 = sshll.u32 %s237_s8, 4  ;;  %s1676_s27 = scalar_lea.hbm %s1866_s2, %s1590_s26  ;;  %s1670_s9 = int_to_ptr.vmem [resolvable:$true] %s246_s9 }
  0x7a   : > { %s1918_s3 = sand.u32 1, %s1401_s20   ;;  %s1263_s1 = scalar_lea.hbm %s1667_s14, 384 }
  0x7b   : > { %s1680_s10 = scalar_lea.sflag [#allocation3], %s1918_s3  ;;  %p1264_p7 = scmp.ne.s32.totalorder %s1667_s14, %s1263_s1 }
  0x7c   : > { %p1919_p9 = scmp.ne.s32.totalorder %s1911_s11, 0  ;;  %s1268_s4 = scalar_lea.hbm %s1864_s0, 768 }
  0x7d   : > { %p1269_p13 = scmp.lt.u32.totalorder %s1667_s14, %s1864_s0  ;;  %p1270_p6 = scmp.lt.u32.totalorder %s1268_s4, %s1263_s1 }
  0x7e   : > { %p1266_p2 = pnand %p1264_p7, %p1919_p9  ;;  %p1272_p3 = scmp.lt.u32.totalorder %s1263_s1, %s1667_s14 }
  0x7f   : > { %p1271_p11 = por %p1270_p6, %p1269_p13 }
  0x80   : > { %p1267_p10 = pneg %p1266_p2 }
  0x81   : > { %p1273_p8 = por %p1272_p3, %p1271_p11 }
  0x83   : > { %p1274_p5 = pnand %p1273_p8, %p1267_p10 }
  0x85   : > { %1277 = shalt.err (!%p1274_p5)
}
  0x86   : > { %s1278_s26 = scalar_lea.vmem %s1670_s9, 384  ;;  %s1420_s16 = smov [#allocation2]  }
  0x87   : > { %p1279_p12 = scmp.ne.s32.totalorder %s1670_s9, %s1278_s26  ;;  %s1283_s15 = sshll.u32 %s1420_s16, 4  ;;  %s1284_s15 = int_to_ptr.vmem [resolvable:$false] %s1283_s15 }
  0x88   : > { %s1285_s30 = scalar_lea.vmem %s1284_s15, 768  ;;  %p1286_p0 = scmp.lt.s32.totalorder %s1670_s9, %s1284_s15 }
  0x89   : > { %p1281_p1 = pnand %p1279_p12, %p1919_p9  ;;  %p1287_p7 = scmp.lt.s32.totalorder %s1285_s30, %s1278_s26 }
  0x8b   : > { %p1282_p4 = pneg %p1281_p1  ;;  %p1288_p2 = por %p1287_p7, %p1286_p0 }
  0x8d   : > { %p1289_p13 = pnand %p1288_p2, %p1282_p4 }
  0x8f   : > { %1292 = shalt.err (!%p1289_p13)
}
  0x90   : > { %p1920_p10 = scmp.ne.s32.totalorder %s1907_s7, 0  ;;  %s283_s4 = scalar_lea.vmem [#allocation7], %s1577_s25 }
  0x91   : > { %s292_s3 = sshll.u32 %s283_s4, 4  ;;  %s1293_s1 = scalar_lea.hbm %s1676_s27, 384  ;;  %s1708_s3 = int_to_ptr.vmem [resolvable:$true] %s292_s3 }
  0x92   : > { %1080 = dma.hbm_to_vmem [thread:$0]  (!%p1920_p10), %s1667_s14, 384, %s1670_s9, %s1680_s10, %s1913_s12, %s1913_s12, %s1912_s22  }
  0x93   : > { %p1294_p6 = scmp.ne.s32.totalorder %s1676_s27, %s1293_s1  ;;  %s1298_s8 = scalar_lea.hbm %s1866_s2, 768 }
  0x94   : > { %p1299_p8 = scmp.lt.u32.totalorder %s1676_s27, %s1866_s2  ;;  %p1300_p5 = scmp.lt.u32.totalorder %s1298_s8, %s1293_s1 }
  0x95   : > { %p1296_p11 = pnand %p1294_p6, %p1919_p9  ;;  %p1302_p1 = scmp.lt.u32.totalorder %s1293_s1, %s1676_s27 }
  0x96   : > { %p1301_p12 = por %p1300_p5, %p1299_p8 }
  0x97   : > { %p1297_p3 = pneg %p1296_p11 }
  0x98   : > { %p1303_p4 = por %p1302_p1, %p1301_p12 }
  0x9a   : > { %p1304_p0 = pnand %p1303_p4, %p1297_p3 }
  0x9c   : > { %1307 = shalt.err (!%p1304_p0)
}
  0x9d   : > { %s1308_s25 = scalar_lea.vmem %s1708_s3, 384  ;;  %s1421_s14 = smov [#allocation7]  }
  0x9e   : > { %p1309_p7 = scmp.ne.s32.totalorder %s1708_s3, %s1308_s25  ;;  %s1313_s9 = sshll.u32 %s1421_s14, 4  ;;  %s1314_s9 = int_to_ptr.vmem [resolvable:$false] %s1313_s9 }
  0x9f   : > { %s1315_s10 = scalar_lea.vmem %s1314_s9, 768  ;;  %p1316_p6 = scmp.lt.s32.totalorder %s1708_s3, %s1314_s9 }
  0xa0   : > { %p1311_p2 = pnand %p1309_p7, %p1919_p9  ;;  %p1317_p11 = scmp.lt.s32.totalorder %s1315_s10, %s1308_s25 }
  0xa2   : > { %p1312_p13 = pneg %p1311_p2  ;;  %p1318_p8 = por %p1317_p11, %p1316_p6 }
  0xa4   : > { %p1319_p5 = pnand %p1318_p8, %p1312_p13 }
  0xa6   : > { %1322 = shalt.err (!%p1319_p5)
}
  0xa7   : > { %1086 = dma.hbm_to_vmem [thread:$0]  (!%p1920_p10), %s1676_s27, 384, %s1708_s3, %s1609_s13, %s1913_s12, %s1913_s12, %s1912_s22  }
  0xa8   : > { %p1921_p9 = scmp.ne.s32.totalorder %s1901_s6, 0 }
  0xa9   : > { %s1738_s11 = sand.u32 (!%p1921_p9), 1, %s1397_s19   ;;  %p1922_p3 = scmp.ne.s32.totalorder (!%p1921_p9), %s1897_s28, 0 }
  0xaa   : > { %304 = sbr.rel (%p1921_p9) target bundleno = 486 (0x1e6), region = 40  ;;  %s307_s7 = scalar_lea.sflag (!%p1921_p9), [#allocation3], %s1738_s11 }
  0xab   : > { %s1741_s15 = smul.u32 (!%p1921_p9), 24, %s1738_s11 }
  0xad   : > { %s1745_s30 = scalar_lea.vmem (!%p1921_p9), [#allocation2], %s1741_s15 }
  0xb1   : > { %1376 = dma.done.wait (%p1922_p3), %s307_s7, 384  }
  0xb2   : > { %1378 = vsyncadd (%p1922_p3), %s307_s7, 4294966912  ;;  %s315_s6 = sand.u32 1, %s1488_s24   ;;  %s319_s22 = scalar_lea.vmem [#allocation5], %s1741_s15 }
  0xb3   : > { %s316_s13 = scalar_lea.sflag [#allocation6], %s315_s6 }
  0xb4   : > { %1380 = dma.done.wait (%p1922_p3), %s316_s13, 768  }
  0xb5   : > { %1382 = vsyncadd (%p1922_p3), %s316_s13, 4294966528  ;;  %s1758_s12 = scalar_lea.vmem [#allocation7], %s1741_s15  ;;  %p1923_p10 = scmp.eq.s32.totalorder %s1488_s24, 0 }
  0xb7   : > { %1384 = dma.done.wait (%p1923_p10), [#allocation9], 400   ;;  %p1924_p12 = pmov %p1923_p10 }
  0xb8   : > { %v1422_v0 = vmov 0.0   ;;  %vm1423_vm0 = vmmov 0   ;;  %v1153_v1 = vld [vmem:[#allocation8 + $0x8] sm:$0xff]   ;;  %vm416_vm1 = vcmask 130048   ;;  %v1155_v3 = vld [vmem:[#allocation8] sm:$0xff]   ;;  %v1158_v5 = vld [vmem:[#allocation8 + $0x10] sm:$0xff]  }
  0xb9   : > { %1386 = vsyncadd (%p1924_p12), [#allocation9], 4294966896  ;;  %1044 = vmatprep.subr.bf16.mxu1 %v1422_v0  ;;  %1008 = vmatprep.mubr.msk.bf16.mxu1 %vm1423_vm0, %v1422_v0  ;;  %v1154_v2 = vld [vmem:[%s319_s22 + $0x8] sm:$0xff]   ;;  %v1156_v4 = vld [vmem:[%s319_s22] sm:$0xff]   ;;  %vm763_vm2 = vcmask 257024   ;;  %s372_s24 = scalar_lea.vmem [#allocation11], %s1741_s15 }
  0xba   : > { %1002 = vmatprep.subr.bf16.mxu0 %v1422_v0  ;;  %1004 = vmatprep.mubr.msk.bf16.mxu0 %vm1423_vm0, %v1422_v0  ;;  %v1157_v6 = vld [vmem:[%s319_s22 + $0x10] sm:$0xff]   ;;  %v1162_v9 = vld [vmem:[%s1758_s12 + $0x8] sm:$0xff]   ;;  %v1164_v11 = vld [vmem:[%s1758_s12 + $0x10] sm:$0xff]   ;;  %s1053_s28 = smul.u32 384, %s1405_s21  ;;  %s786_s27 = sshll.u32 %s372_s24, 4  ;;  %s1813_s27 = int_to_ptr.vmem [resolvable:$true] %s786_s27 }
  0xbb   : > { %1045 = vmatpush3.bf16.msra.mxu1 %v1153_v1  ;;  %1003 = vmatpush3.bf16.msra.mxu0 %v1153_v1  ;;  %v1160_v7 = vld [vmem:[%s1758_s12] sm:$0xff]   ;;  %v1161_v10 = vld [vmem:[%s1745_s30 + $0x8] sm:$0xff]   ;;  %v1163_v12 = vld [vmem:[%s1745_s30 + $0x10] sm:$0xff]   ;;  %s771_s21 = scalar_lea.sflag [#allocation4], %s1738_s11  ;;  %s1323_s23 = scalar_lea.vmem %s1813_s27, 384 }
  0xbc   : > { %1016 = vmatprep.subr.bf16.mxu1 %v1422_v0  ;;  %1030 = vmatprep.subr.bf16.mxu0 %v1422_v0  ;;  %v1159_v8 = vld [vmem:[%s1745_s30] sm:$0xff]   ;;  %v974_v34 = vld [vmem:[#allocation10] ss:$0 sm:$0xff]  ;;  %s1811_s1 = scalar_lea.hbm %s1869_s5, %s1053_s28  ;;  %p1324_p1 = scmp.ne.s32.totalorder %s1813_s27, %s1323_s23 }
  0xbd   : > { %p1925_p4 = scmp.ne.s32.totalorder %s1898_s29, 0  ;;  %s1424_s17 = smov [#allocation11]  }
  0xbe   : > { %1009 = vmatmul.mubr.msk.bf16.vlgmr.msra.gmra.mrb[0].mxu1 %vm416_vm1, %v1154_v2  ;;  %1005 = vmatmul.mubr.msk.bf16.vlgmr.msra.gmra.mrb[0].mxu0 %vm416_vm1, %v1156_v4  ;;  %s1327_s8 = sshll.u32 %s1424_s17, 4  ;;  %s1328_s8 = int_to_ptr.vmem [resolvable:$false] %s1327_s8 }
  0xbf   : > { %1017 = vmatpush3.bf16.msra.mxu1 %v1155_v3  ;;  %1012 = vmatprep.mubr.msk.bf16.mxu1 %vm1423_vm0, %v1422_v0  ;;  %p1325_p0 = pnand %p1324_p1, %p1925_p4  ;;  %s1329_s26 = scalar_lea.vmem %s1328_s8, 768 }
  0xc0   : > { %1031 = vmatpush3.bf16.msra.mxu0 %v1158_v5  ;;  %1032 = vmatprep.mubr.msk.bf16.mxu0 %vm1423_vm0, %v1422_v0  ;;  %p1330_p2 = scmp.lt.s32.totalorder %s1813_s27, %s1328_s8  ;;  %p1331_p13 = scmp.lt.s32.totalorder %s1329_s26, %s1323_s23 }
  0xc1   : > { %p1326_p7 = pneg %p1325_p0 }
  0xc2   : > { %p1332_p6 = por %p1331_p13, %p1330_p2 }
  0xc4   : > { %p1333_p11 = pnand %p1332_p6, %p1326_p7 }
  0xc6   : > { %1013 = vmatmul.mubr.msk.bf16.gmra.mrb[4].mxu1 %vm416_vm1, %v1157_v6  ;;  %1033 = vmatmul.mubr.msk.bf16.vlgmr.msra.gmra.mrb[4].mxu0 %vm416_vm1, %v1160_v7 }
  0xc7   : > { %1018 = vmatprep.mubr.msk.bf16.mxu1 %vm1423_vm0, %v1422_v0  ;;  %1036 = vmatprep.mubr.msk.bf16.mxu0 %vm1423_vm0, %v1422_v0 }
  0xce   : > { %1019 = vmatmul.mubr.msk.bf16.vlgmr.msra.gmra.mrb[8].mxu1 %vm416_vm1, %v1159_v8  ;;  %1037 = vmatmul.mubr.msk.bf16.gmra.mrb[8].mxu0 %vm416_vm1, %v1162_v9 }
  0xcf   : > { %1022 = vmatprep.mubr.msk.bf16.mxu1 %vm1423_vm0, %v1422_v0  ;;  %1040 = vmatprep.mubr.msk.bf16.mxu0 %vm1423_vm0, %v1422_v0 }
  0xd6   : > { %1023 = vmatmul.mubr.msk.bf16.gmra.mrb[12].mxu1 %vm416_vm1, %v1161_v10  ;;  %1041 = vmatmul.mubr.msk.bf16.gmra.mrb[12].mxu0 %vm416_vm1, %v1164_v11 }
  0xd7   : > { %1026 = vmatprep.mubr.msk.bf16.mxu1 %vm1423_vm0, %v1422_v0 }
  0xde   : > { %1027 = vmatmul.mubr.msk.bf16.gmra.mrb[16].mxu1 %vm416_vm1, %v1163_v12 }
 0x191   : > { %v468_v13 = vpop.f32.mrb[0].mxu1  ;;  %v460_v14 = vpop.f32.mrb[0].mxu0 }
 0x192   : > { %v1010_v15 = vpop.f32.mrb[1].mxu1  ;;  %v1006_v16 = vpop.f32.mrb[1].mxu0 }
 0x193   : > { %v471_v17 = vpop.f32.mrb[2].mxu1  ;;  %v463_v18 = vpop.f32.mrb[2].mxu0 }
 0x194   : > { %v1011_v19 = vpop.f32.mrb[3].mxu1  ;;  %v1007_v20 = vpop.f32.mrb[3].mxu0 }
 0x199   : > { %v476_v21 = vpop.f32.mrb[4].mxu1  ;;  %v643_v22 = vpop.f32.mrb[4].mxu0 }
 0x19a   : > { %v1014_v23 = vpop.f32.mrb[5].mxu1  ;;  %v1034_v24 = vpop.f32.mrb[5].mxu0 }
 0x19b   : > { %v479_v25 = vpop.f32.mrb[6].mxu1  ;;  %v646_v26 = vpop.f32.mrb[6].mxu0 }
 0x19c   : > { %v1015_v27 = vpop.f32.mrb[7].mxu1  ;;  %v1035_v28 = vpop.f32.mrb[7].mxu0 }
 0x1a1   : > { %v547_v29 = vpop.f32.mrb[8].mxu1  ;;  %v651_v30 = vpop.f32.mrb[8].mxu0 }
 0x1a2   : > { %v548_v31 = vadd.f32 %v547_v29, %v460_v14  ;;  %v1020_v32 = vpop.f32.mrb[9].mxu1  ;;  %v1038_v33 = vpop.f32.mrb[9].mxu0 }
 0x1a3   : > { %v550_v35 = vpop.f32.mrb[10].mxu1  ;;  %v654_v36 = vpop.f32.mrb[10].mxu0 }
 0x1a4   : > { %v666_v37 = vadd.f32 %v643_v22, %v548_v31  ;;  %v551_v38 = vadd.f32 %v550_v35, %v463_v18  ;;  %v1021_v39 = vpop.f32.mrb[11].mxu1  ;;  %v1039_v40 = vpop.f32.mrb[11].mxu0 }
 0x1a6   : > { %v1788_v41 = vadd.f32 %v974_v34, %v666_v37  ;;  %v667_v42 = vadd.f32 %v646_v26, %v551_v38 }
 0x1a8   : > { %v685_v43 = vmul.f32 %v1788_v41, %v1788_v41  ;;  %v1792_v44 = vadd.f32 %v974_v34, %v667_v42 }
 0x1a9   : > { %v555_v45 = vpop.f32.mrb[12].mxu1  ;;  %v659_v46 = vpop.f32.mrb[12].mxu0 }
 0x1aa   : > { %v691_v47 = vmul.f32 %v685_v43, %v1788_v41  ;;  %v686_v48 = vmul.f32 %v1792_v44, %v1792_v44  ;;  %v556_v49 = vadd.f32 %v555_v45, %v468_v13  ;;  %v1024_v50 = vpop.f32.mrb[13].mxu1  ;;  %v1042_v51 = vpop.f32.mrb[13].mxu0 }
 0x1ab   : > { %v558_v52 = vpop.f32.mrb[14].mxu1  ;;  %v662_v53 = vpop.f32.mrb[14].mxu0 }
 0x1ac   : > { %v697_v54 = vmul.f32 0.044715, %v691_v47  ;;  %v692_v55 = vmul.f32 %v686_v48, %v1792_v44  ;;  %v668_v56 = vadd.f32 %v651_v30, %v556_v49  ;;  %v559_v57 = vadd.f32 %v558_v52, %v471_v17  ;;  %v1025_v58 = vpop.f32.mrb[15].mxu1  ;;  %v1043_v59 = vpop.f32.mrb[15].mxu0 }
 0x1ae   : > { %v703_v60 = vadd.f32 %v697_v54, %v1788_v41  ;;  %v698_v61 = vmul.f32 0.044715, %v692_v55  ;;  %v681_v62 = vadd.f32 %v974_v34, %v668_v56  ;;  %v669_v63 = vadd.f32 %v654_v36, %v559_v57 }
 0x1b0   : > { %v709_v0 = vmul.f32 0.7978846, %v703_v60  ;;  %v704_v1 = vadd.f32 %v698_v61, %v1792_v44  ;;  %v687_v2 = vmul.f32 %v681_v62, %v681_v62  ;;  %v682_v3 = vadd.f32 %v974_v34, %v669_v63 }
 0x1b1   : > { %v563_v4 = vpop.f32.mrb[16].mxu1 }
 0x1b2   : > { %1165 = vtanh.f32 %v709_v0  ;;  %v710_v5 = vmul.f32 0.7978846, %v704_v1  ;;  %v693_v6 = vmul.f32 %v687_v2, %v681_v62  ;;  %v688_v7 = vmul.f32 %v682_v3, %v682_v3  ;;  %v1028_v8 = vpop.f32.mrb[17].mxu1 }
 0x1b3   : > { %v564_v9 = vadd.f32 %v563_v4, %v476_v21  ;;  %v566_v10 = vpop.f32.mrb[18].mxu1 }
 0x1b4   : > { %1167 = vtanh.f32 %v710_v5  ;;  %v699_v11 = vmul.f32 0.044715, %v693_v6  ;;  %v694_v12 = vmul.f32 %v688_v7, %v682_v3  ;;  %v567_v13 = vadd.f32 %v566_v10, %v479_v25  ;;  %v1029_v14 = vpop.f32.mrb[19].mxu1 }
 0x1b5   : > { %v670_v15 = vadd.f32 %v659_v46, %v564_v9 }
 0x1b6   : > { %v705_v16 = vadd.f32 %v699_v11, %v681_v62  ;;  %v700_v17 = vmul.f32 0.044715, %v694_v12  ;;  %v671_v18 = vadd.f32 %v662_v53, %v567_v13 }
 0x1b7   : > { %v683_v19 = vadd.f32 %v974_v34, %v670_v15 }
 0x1b8   : > { %v711_v20 = vmul.f32 0.7978846, %v705_v16  ;;  %v706_v22 = vadd.f32 %v700_v17, %v682_v3  ;;  %v684_v23 = vadd.f32 %v974_v34, %v671_v18 }
 0x1b9   : > { %v689_v24 = vmul.f32 %v683_v19, %v683_v19 }
 0x1ba   : > { %1169 = vtanh.f32 %v711_v20  ;;  %v712_v26 = vmul.f32 0.7978846, %v706_v22  ;;  %v690_v27 = vmul.f32 %v684_v23, %v684_v23 }
 0x1bb   : > { %v695_v28 = vmul.f32 %v689_v24, %v683_v19 }
 0x1bc   : > { %v1166_v21 = vpop.eup %1165  ;;  %1171 = vtanh.f32 %v712_v26  ;;  %v696_v29 = vmul.f32 %v690_v27, %v684_v23 }
 0x1bd   : > { %v721_v30 = vadd.f32 1.0, %v1166_v21  ;;  %v701_v31 = vmul.f32 0.044715, %v695_v28 }
 0x1be   : > { %v1168_v25 = vpop.eup %1167  ;;  %v702_v32 = vmul.f32 0.044715, %v696_v29 }
 0x1bf   : > { %v727_v33 = vmul.f32 0.5, %v721_v30  ;;  %v722_v35 = vadd.f32 1.0, %v1168_v25  ;;  %v707_v36 = vadd.f32 %v701_v31, %v683_v19 }
 0x1c0   : > { %v708_v37 = vadd.f32 %v702_v32, %v684_v23 }
 0x1c1   : > { %v733_v38 = vmul.f32 %v727_v33, %v1788_v41  ;;  %v728_v34 = vmul.f32 0.5, %v722_v35  ;;  %v713_v39 = vmul.f32 0.7978846, %v707_v36 }
 0x1c2   : > { %v714_v40 = vmul.f32 0.7978846, %v708_v37 }
 0x1c3   : > { %v984_v42 = vpack.c.bf16 %v733_v38, %v733_v38  ;;  %v734_v43 = vmul.f32 %v728_v34, %v1792_v44  ;;  %1173 = vtanh.f32 %v713_v39 }
 0x1c4   : > { %v1170_v45 = vpop.eup %1169  ;;  %1175 = vtanh.f32 %v714_v40 }
 0x1c5   : > { %764 = vst.msk [vmem:[%s372_s24] sm:$0xf] %vm763_vm2, %v984_v42  ;;  %v985_v46 = vpack.c.bf16 %v734_v43, %v734_v43  ;;  %v723_v47 = vadd.f32 1.0, %v1170_v45 }
 0x1c6   : > { %v1172_v48 = vpop.eup %1171 }
 0x1c7   : > { %765 = vst.msk [vmem:[%s372_s24 + $0x4] sm:$0xf] %vm763_vm2, %v985_v46  ;;  %v729_v41 = vmul.f32 0.5, %v723_v47  ;;  %v724_v49 = vadd.f32 1.0, %v1172_v48 }
 0x1c9   : > { %v735_v50 = vmul.f32 %v729_v41, %v681_v62  ;;  %v730_v51 = vmul.f32 0.5, %v724_v49 }
 0x1cb   : > { %v986_v52 = vpack.c.bf16 %v735_v50, %v735_v50  ;;  %v736_v53 = vmul.f32 %v730_v51, %v682_v3 }
 0x1cd   : > { %v1174_v54 = vpop.eup %1173  ;;  %766 = vst.msk [vmem:[%s372_s24 + $0x8] sm:$0xf] %vm763_vm2, %v986_v52  ;;  %v987_v44 = vpack.c.bf16 %v736_v53, %v736_v53 }
 0x1ce   : > { %v1176_v55 = vpop.eup %1175  ;;  %v725_v56 = vadd.f32 1.0, %v1174_v54 }
 0x1cf   : > { %767 = vst.msk [vmem:[%s372_s24 + $0xc] sm:$0xf] %vm763_vm2, %v987_v44  ;;  %v726_v57 = vadd.f32 1.0, %v1176_v55 }
 0x1d0   : > { %v731_v58 = vmul.f32 0.5, %v725_v56 }
 0x1d1   : > { %v732_v59 = vmul.f32 0.5, %v726_v57 }
 0x1d2   : > { %v737_v60 = vmul.f32 %v731_v58, %v683_v19 }
 0x1d3   : > { %v738_v61 = vmul.f32 %v732_v59, %v684_v23 }
 0x1d4   : > { %v988_v62 = vpack.c.bf16 %v737_v60, %v737_v60 }
 0x1d5   : > { %v989_v63 = vpack.c.bf16 %v738_v61, %v738_v61 }
 0x1d6   : > { %768 = vst.msk [vmem:[%s372_s24 + $0x10] sm:$0xf] %vm763_vm2, %v988_v62 }
 0x1d7   : > { %769 = vst.msk [vmem:[%s372_s24 + $0x14] sm:$0xf] %vm763_vm2, %v989_v63 }
 0x1d8   : > { %1336 = shalt.err (!%p1333_p11)
}
 0x1d9   : > { %s1337_s16 = scalar_lea.hbm %s1811_s1, 384  ;;  %s1341_s9 = scalar_lea.hbm %s1869_s5, 768 }
 0x1da   : > { %p1338_p8 = scmp.ne.s32.totalorder %s1811_s1, %s1337_s16  ;;  %p1342_p3 = scmp.lt.u32.totalorder %s1811_s1, %s1869_s5 }
 0x1db   : > { %p1343_p10 = scmp.lt.u32.totalorder %s1341_s9, %s1337_s16  ;;  %p1345_p1 = scmp.lt.u32.totalorder %s1337_s16, %s1811_s1 }
 0x1dc   : > { %p1339_p5 = pnand %p1338_p8, %p1925_p4 }
 0x1dd   : > { %p1344_p12 = por %p1343_p10, %p1342_p3 }
 0x1de   : > { %p1340_p9 = pneg %p1339_p5 }
 0x1df   : > { %p1346_p0 = por %p1345_p1, %p1344_p12 }
 0x1e1   : > { %p1347_p7 = pnand %p1346_p0, %p1340_p9 }
 0x1e3   : > { %1350 = shalt.err (!%p1347_p7)
}
 0x1e4   : > { %s1425_s7 = smov 64   ;;  %s1426_s30 = smov 4  }
 0x1e5   : > { %1068 = dma.vmem_to_hbm [thread:$0]  (%p1925_p4), %s1813_s27, 384, %s1811_s1, %s771_s21, %s1425_s7, %s1425_s7, %s1426_s30  }
 0x1e6 PF: > { %s1926_s6 = sld [smem:[#allocation18_spill]]  ;;  %s1927_s13 = sld [smem:[#allocation17_spill]] }
 0x1e7   : > { %s801_s22 = sand.u32 1, %s1393_s18  }
 0x1e8   : > { %s802_s12 = scalar_lea.sflag [#allocation4], %s801_s22 }
 0x1ec   : > { %p1928_p2 = scmp.ne.s32.totalorder %s1926_s6, 0  ;;  %p1929_p13 = scmp.ge.s32.totalorder %s1927_s13, 2 }
 0x1ee   : > { %p1088_p6 = pnand %p1929_p13, %p1928_p2 }
 0x1f0   : > { %1388 = dma.done.wait (!%p1088_p6), %s802_s12, 384  }
 0x1f1   : > { %1390 = vsyncadd (!%p1088_p6), %s802_s12, 4294966912  ;;  %s25_s23 = sadd.s32 1, %s1927_s13   ;;  %s1930_s24 = sld [smem:[#allocation20_spill]] }
 0x1f2   : > { %p22_p11 = scmp.ge.s32.totalorder %s25_s23, 4   ;;  %s1931_s21 = sld [smem:[#allocation16_spill]] }
 0x1f3   : > { %s1932_s22 = sld [smem:[#allocation19_spill]]  ;;  %s1933_s18 = smov %s1397_s19 }
 0x1f4   : > { %s1934_s19 = smov %s1401_s20  ;;  %24 = sbr.rel (!%p22_p11) target bundleno = 13 (0xd), region = 119 }
 0x1f7   : > { %s1935_s20 = smov %s1930_s24 }
 0x1fb   :  { %807 = vsyncpa [#allocation3], 1 }
 0x1fc   :  { %809 = vsyncpa [#allocation3 + $0x1], 1 }
 0x1fd   :  { %810 = vsyncpa [#allocation6], 1 }
 0x1fe   :  { %812 = vsyncpa [#allocation6 + $0x1], 1 }
 0x1ff   :  { %813 = vsyncpa [#allocation9], 1 }
 0x200   :  { %814 = vsyncpa [#allocation4], 1 }
 0x201   :  { %816 = vsyncpa [#allocation4 + $0x1], 1 }

// kernel: audio_encoder_forward.11
= control target key start
LH: loop header
LB: loop body
LE: loop exit
PB: predicated region body
PF: predicated region fallthrough
CT: control target
= control target key end

     0   :  { %s2333_s0 = inlined_call_operand.hbm [shape: f32[2,24,32], index: 0, kind: input, shape index: {}]   ;;  %s2334_s1 = inlined_call_operand.hbm [shape: f32[1,32], index: 1, kind: input, shape index: {}]   ;;  %s2335_s2 = inlined_call_operand.hbm [shape: f32[1,32], index: 2, kind: input, shape index: {}]   ;;  %s2336_s3 = inlined_call_operand.hbm [shape: bf16[32,32], index: 3, kind: input, shape index: {}]   ;;  %s2337_s4 = inlined_call_operand.hbm [shape: f32[1,32], index: 4, kind: input, shape index: {}]   ;;  %s2338_s5 = inlined_call_operand.hbm [shape: bf16[32,32], index: 5, kind: input, shape index: {}]   ;;  %s2339_s6 = inlined_call_operand.hbm [shape: bf16[32,32], index: 6, kind: input, shape index: {}]   ;;  %s2340_s7 = inlined_call_operand.hbm [shape: f32[1,32], index: 7, kind: input, shape index: {}]   ;;  %s2341_s8 = inlined_call_operand.hbm [shape: bf16[2,24,32], index: 8, kind: output, shape index: {0}]   ;;  %s2342_s9 = inlined_call_operand.hbm [shape: bf16[2,24,32], index: 9, kind: output, shape index: {1}]   ;;  %s2343_s10 = inlined_call_operand.hbm [shape: bf16[2,24,32], index: 10, kind: output, shape index: {2}]  }
   0x1   :  { %2351 = sst [smem:[#allocation27_spill]] %s2333_s0 }
   0x2   :  { %2352 = sst [smem:[#allocation28_spill]] %s2334_s1 }
   0x3   :  { %2353 = sst [smem:[#allocation29_spill]] %s2335_s2 }
   0x4   :  { %2354 = sst [smem:[#allocation30_spill]] %s2336_s3 }
   0x5   :  { %2355 = sst [smem:[#allocation31_spill]] %s2337_s4 }
   0x6   :  { %2356 = sst [smem:[#allocation32_spill]] %s2338_s5 }
   0x7   :  { %2357 = sst [smem:[#allocation33_spill]] %s2341_s8 }
   0x8   :  { %2358 = sst [smem:[#allocation34_spill]] %s2342_s9 }
   0x9   :  { %2359 = sst [smem:[#allocation35_spill]] %s2343_s10 }
   0xa   :  { %16 = vsyncpa [#allocation3], 0 }
   0xb   :  { %18 = vsyncpa [#allocation3 + $0x1], 0 }
   0xc   :  { %19 = vsyncpa [#allocation6], 0 }
   0xd   :  { %20 = vsyncpa [#allocation9], 0 }
   0xe   :  { %21 = vsyncpa [#allocation12], 0 }
   0xf   :  { %22 = vsyncpa [#allocation15], 0 }
  0x10   :  { %23 = vsyncpa [#allocation4], 0 }
  0x11   :  { %25 = vsyncpa [#allocation4 + $0x1], 0 }
  0x12   :  { %26 = vsyncpa [#allocation18], 0 }
  0x13   :  { %28 = vsyncpa [#allocation18 + $0x1], 0  ;;  %s1848_s13 = smov 0   ;;  %s1850_s14 = smov 0  }
  0x14   :  { %s1852_s15 = smov 0   ;;  %s1854_s16 = smov 0  }
  0x15   :  { %s1856_s17 = smov 0   ;;  %s1858_s18 = smov 0  }
  0x16 LB: > { %s1879_s19 = sadd.s32 4294967295, %s1774_s18   ;;  %p1129_p0 = scmp.ge.s32.totalorder %s1774_s18, 1  ;;  %s1774_s18 = sphi %s1858_s18, %s34_s18   ;;  %s1770_s17 = sphi %s1856_s17, %s2395_s17   ;;  %s1766_s16 = sphi %s1854_s16, %s2394_s16   ;;  %s1762_s15 = sphi %s1852_s15, %s2393_s15   ;;  %s1758_s14 = sphi %s1850_s14, %s2392_s14   ;;  %s1754_s13 = sphi %s1848_s13, %s2391_s13  }
  0x17   : > { %p2344_p1 = scmp.eq.s32.totalorder %s1879_s19, 0  ;;  %p310_p2 = scmp.lt.s32.totalorder %s1774_s18, 3 }
  0x18   : > { %s1776_s21 = smov [#allocation5]   ;;  %s1777_s23 = smov [#allocation8]  }
  0x19   : > { %p1884_p3 = pnand %p1129_p0, %p310_p2  ;;  %s323_s22 = sshll.u32 %s1776_s21, 4  ;;  %s324_s22 = int_to_ptr.vmem [resolvable:$true] %s323_s22 }
  0x1a   : > { %s344_s24 = sshll.u32 %s1777_s23, 4  ;;  %s1778_s26 = smov [#allocation11]   ;;  %s1897_s24 = int_to_ptr.vmem [resolvable:$true] %s344_s24 }
  0x1b   : > { %s2360_s20 = scalar_select %p1884_p3, 1, 0 }
  0x1c   : > { %p1265_p5 = pneg %p1884_p3  ;;  %s1899_s27 = sshll.u32 %s1778_s26, 4  ;;  %s369_s27 = int_to_ptr.vmem [resolvable:$true] %s1899_s27 }
  0x1d   : > { %s2362_s1 = sld [smem:[#allocation28_spill]] }
  0x1e   : > { %p1893_p6 = pnand %p1265_p5, %p2344_p1 }
  0x20   : > { %p1909_p8 = pneg %p1893_p6 }
  0x23   : > { %s1390_s30 = scalar_lea.hbm %s2362_s1, 16 }
  0x24   : > { %p1391_p7 = scmp.ne.s32.totalorder %s2362_s1, %s1390_s30  ;;  %p1397_p11 = scmp.lt.u32.totalorder %s1390_s30, %s2362_s1 }
  0x26   : > { %p1393_p9 = pnand %p1909_p8, %p1391_p7 }
  0x28   : > { %p1394_p10 = pneg %p1393_p9 }
  0x2a   : > { %p1399_p12 = pnand %p1397_p11, %p1394_p10 }
  0x2c   : > { %1402 = shalt.err (!%p1399_p12)
}
  0x2d   : > { %s1403_s28 = scalar_lea.vmem %s324_s22, 16  ;;  %s1410_s29 = scalar_lea.vmem %s324_s22, 32 }
  0x2e   : > { %p1404_p13 = scmp.ne.s32.totalorder %s324_s22, %s1403_s28  ;;  %p1411_p5 = scmp.lt.s32.totalorder %s324_s22, %s324_s22 }
  0x2f   : > { %p1412_p4 = scmp.lt.s32.totalorder %s1410_s29, %s1403_s28 }
  0x30   : > { %p1406_p0 = pnand %p1404_p13, %p1909_p8 }
  0x31   : > { %p1413_p1 = por %p1412_p4, %p1411_p5 }
  0x32   : > { %p1407_p2 = pneg %p1406_p0 }
  0x34   : > { %p1414_p3 = pnand %p1413_p1, %p1407_p2 }
  0x36   : > { %1417 = shalt.err (!%p1414_p3)
}
  0x37   : > { %1268 = dma.hbm_to_vmem [thread:$0]  (!%p1893_p6), %s2362_s1, 16, %s324_s22, [#allocation6]  }
  0x38   : > { %s2364_s3 = sld [smem:[#allocation30_spill]] }
  0x3e   : > { %s1418_s26 = scalar_lea.hbm %s2364_s3, 256 }
  0x3f   : > { %p1419_p7 = scmp.ne.s32.totalorder %s2364_s3, %s1418_s26  ;;  %p1425_p1 = scmp.lt.u32.totalorder %s1418_s26, %s2364_s3 }
  0x41   : > { %p1421_p9 = pnand %p1419_p7, %p1909_p8 }
  0x43   : > { %p1422_p4 = pneg %p1421_p9 }
  0x45   : > { %p1427_p3 = pnand %p1425_p1, %p1422_p4 }
  0x47   : > { %1430 = shalt.err (!%p1427_p3)
}
  0x48   : > { %s1431_s22 = scalar_lea.vmem %s1897_s24, 256  ;;  %p1439_p13 = scmp.lt.s32.totalorder %s1897_s24, %s1897_s24 }
  0x49   : > { %p1432_p10 = scmp.ne.s32.totalorder %s1897_s24, %s1431_s22  ;;  %p1440_p0 = scmp.lt.s32.totalorder %s1431_s22, %s1431_s22 }
  0x4b   : > { %p1434_p11 = pnand %p1432_p10, %p1909_p8  ;;  %p1441_p2 = por %p1440_p0, %p1439_p13 }
  0x4d   : > { %p1435_p12 = pneg %p1434_p11 }
  0x4f   : > { %p1442_p5 = pnand %p1441_p2, %p1435_p12 }
  0x51   : > { %1445 = shalt.err (!%p1442_p5)
}
  0x52   : > { %s1779_s8 = smov 64   ;;  %s1780_s10 = smov 4  }
  0x53   : > { %1274 = dma.hbm_to_vmem [thread:$0]  (!%p1893_p6), %s2364_s3, 256, %s1897_s24, [#allocation9], %s1779_s8, %s1779_s8, %s1780_s10  }
  0x54   : > { %s2365_s5 = sld [smem:[#allocation32_spill]] }
  0x5a   : > { %s1446_s26 = scalar_lea.hbm %s2365_s5, 256 }
  0x5b   : > { %p1447_p7 = scmp.ne.s32.totalorder %s2365_s5, %s1446_s26  ;;  %p1453_p1 = scmp.lt.u32.totalorder %s1446_s26, %s2365_s5 }
  0x5d   : > { %p1449_p9 = pnand %p1447_p7, %p1909_p8 }
  0x5f   : > { %p1450_p4 = pneg %p1449_p9 }
  0x61   : > { %p1455_p3 = pnand %p1453_p1, %p1450_p4 }
  0x63   : > { %1458 = shalt.err (!%p1455_p3)
}
  0x64   : > { %s1459_s11 = scalar_lea.vmem %s369_s27, 256  ;;  %p1467_p13 = scmp.lt.s32.totalorder %s369_s27, %s369_s27 }
  0x65   : > { %p1460_p10 = scmp.ne.s32.totalorder %s369_s27, %s1459_s11  ;;  %p1468_p0 = scmp.lt.s32.totalorder %s1459_s11, %s1459_s11 }
  0x67   : > { %p1462_p11 = pnand %p1460_p10, %p1909_p8  ;;  %p1469_p2 = por %p1468_p0, %p1467_p13 }
  0x69   : > { %p1463_p12 = pneg %p1462_p11 }
  0x6b   : > { %p1470_p5 = pnand %p1469_p2, %p1463_p12 }
  0x6d   : > { %1473 = shalt.err (!%p1470_p5)
}
  0x6e   : > { %1280 = dma.hbm_to_vmem [thread:$0]  (!%p1893_p6), %s2365_s5, 256, %s369_s27, [#allocation12], %s1779_s8, %s1779_s8, %s1780_s10  }
  0x6f   : > { %s1781_s12 = smov [#allocation7]   ;;  %s1782_s23 = smov [#allocation10]  }
  0x70   : > { %s334_s30 = sshll.u32 %s1781_s12, 4  ;;  %s358_s26 = sshll.u32 %s1782_s23, 4  ;;  %s335_s30 = int_to_ptr.vmem [resolvable:$true] %s334_s30  ;;  %s359_s26 = int_to_ptr.vmem [resolvable:$true] %s358_s26 }
  0x71   : > { %s2366_s2 = sld [smem:[#allocation29_spill]] }
  0x77   : > { %s1474_s22 = scalar_lea.hbm %s2366_s2, 16 }
  0x78   : > { %p1475_p7 = scmp.ne.s32.totalorder %s2366_s2, %s1474_s22  ;;  %p1481_p1 = scmp.lt.u32.totalorder %s1474_s22, %s2366_s2 }
  0x7a   : > { %p1477_p9 = pnand %p1475_p7, %p1909_p8 }
  0x7c   : > { %p1478_p4 = pneg %p1477_p9 }
  0x7e   : > { %p1483_p3 = pnand %p1481_p1, %p1478_p4 }
  0x80   : > { %1486 = shalt.err (!%p1483_p3)
}
  0x81   : > { %s1487_s27 = scalar_lea.vmem %s335_s30, 16  ;;  %s1494_s24 = scalar_lea.vmem %s335_s30, 32 }
  0x82   : > { %p1488_p10 = scmp.ne.s32.totalorder %s335_s30, %s1487_s27  ;;  %p1495_p13 = scmp.lt.s32.totalorder %s335_s30, %s335_s30 }
  0x83   : > { %p1496_p0 = scmp.lt.s32.totalorder %s1494_s24, %s1487_s27 }
  0x84   : > { %p1490_p11 = pnand %p1488_p10, %p1909_p8 }
  0x85   : > { %p1497_p2 = por %p1496_p0, %p1495_p13 }
  0x86   : > { %p1491_p12 = pneg %p1490_p11 }
  0x88   : > { %p1498_p5 = pnand %p1497_p2, %p1491_p12 }
  0x8a   : > { %1501 = shalt.err (!%p1498_p5)
}
  0x8b   : > { %1271 = dma.hbm_to_vmem [thread:$0]  (!%p1893_p6), %s2366_s2, 16, %s335_s30, [#allocation6]  }
  0x8c   : > { %s2367_s4 = sld [smem:[#allocation31_spill]] }
  0x92   : > { %s1502_s28 = scalar_lea.hbm %s2367_s4, 16 }
  0x93   : > { %p1503_p7 = scmp.ne.s32.totalorder %s2367_s4, %s1502_s28  ;;  %p1509_p1 = scmp.lt.u32.totalorder %s1502_s28, %s2367_s4 }
  0x95   : > { %p1505_p9 = pnand %p1503_p7, %p1909_p8 }
  0x97   : > { %p1506_p4 = pneg %p1505_p9 }
  0x99   : > { %p1511_p3 = pnand %p1509_p1, %p1506_p4 }
  0x9b   : > { %1514 = shalt.err (!%p1511_p3)
}
  0x9c   : > { %s1515_s27 = scalar_lea.vmem %s359_s26, 16  ;;  %s1522_s30 = scalar_lea.vmem %s359_s26, 32 }
  0x9d   : > { %p1516_p10 = scmp.ne.s32.totalorder %s359_s26, %s1515_s27  ;;  %p1523_p13 = scmp.lt.s32.totalorder %s359_s26, %s359_s26 }
  0x9e   : > { %p1524_p0 = scmp.lt.s32.totalorder %s1522_s30, %s1515_s27 }
  0x9f   : > { %p1518_p11 = pnand %p1516_p10, %p1909_p8 }
  0xa0   : > { %p1525_p2 = por %p1524_p0, %p1523_p13 }
  0xa1   : > { %p1519_p12 = pneg %p1518_p11 }
  0xa3   : > { %p1526_p5 = pnand %p1525_p2, %p1519_p12 }
  0xa5   : > { %1529 = shalt.err (!%p1526_p5)
}
  0xa6   : > { %1277 = dma.hbm_to_vmem [thread:$0]  (!%p1893_p6), %s2367_s4, 16, %s359_s26, [#allocation9]  }
  0xa7   : > { %s1783_s12 = smov [#allocation13]   ;;  %s1784_s23 = smov [#allocation14]  }
  0xa8   : > { %s381_s9 = sshll.u32 %s1783_s12, 4  ;;  %s395_s28 = sshll.u32 %s1784_s23, 4  ;;  %s382_s9 = int_to_ptr.vmem [resolvable:$true] %s381_s9  ;;  %s396_s28 = int_to_ptr.vmem [resolvable:$true] %s395_s28 }
  0xa9   : > { %s1530_s11 = scalar_lea.hbm %s2339_s6, 256 }
  0xaa   : > { %p1531_p7 = scmp.ne.s32.totalorder %s2339_s6, %s1530_s11  ;;  %p1537_p1 = scmp.lt.u32.totalorder %s1530_s11, %s2339_s6 }
  0xac   : > { %p1533_p9 = pnand %p1531_p7, %p1909_p8 }
  0xae   : > { %p1534_p4 = pneg %p1533_p9 }
  0xb0   : > { %p1539_p3 = pnand %p1537_p1, %p1534_p4 }
  0xb2   : > { %1542 = shalt.err (!%p1539_p3)
}
  0xb3   : > { %s1543_s26 = scalar_lea.vmem %s382_s9, 256  ;;  %p1551_p13 = scmp.lt.s32.totalorder %s382_s9, %s382_s9 }
  0xb4   : > { %p1544_p10 = scmp.ne.s32.totalorder %s382_s9, %s1543_s26  ;;  %p1552_p0 = scmp.lt.s32.totalorder %s1543_s26, %s1543_s26 }
  0xb6   : > { %p1546_p11 = pnand %p1544_p10, %p1909_p8  ;;  %p1553_p2 = por %p1552_p0, %p1551_p13 }
  0xb8   : > { %p1547_p12 = pneg %p1546_p11 }
  0xba   : > { %p1554_p5 = pnand %p1553_p2, %p1547_p12 }
  0xbc   : > { %1557 = shalt.err (!%p1554_p5)
}
  0xbd   : > { %1283 = dma.hbm_to_vmem [thread:$0]  (!%p1893_p6), %s2339_s6, 256, %s382_s9, [#allocation12], %s1779_s8, %s1779_s8, %s1780_s10  }
  0xbe   : > { %s1558_s22 = scalar_lea.hbm %s2340_s7, 16 }
  0xbf   : > { %p1559_p7 = scmp.ne.s32.totalorder %s2340_s7, %s1558_s22  ;;  %p1565_p1 = scmp.lt.u32.totalorder %s1558_s22, %s2340_s7 }
  0xc1   : > { %p1561_p9 = pnand %p1559_p7, %p1909_p8 }
  0xc3   : > { %p1562_p4 = pneg %p1561_p9 }
  0xc5   : > { %p1567_p3 = pnand %p1565_p1, %p1562_p4 }
  0xc7   : > { %1570 = shalt.err (!%p1567_p3)
}
  0xc8   : > { %s1571_s24 = scalar_lea.vmem %s396_s28, 16  ;;  %s1578_s8 = scalar_lea.vmem %s396_s28, 32 }
  0xc9   : > { %p1572_p10 = scmp.ne.s32.totalorder %s396_s28, %s1571_s24  ;;  %p1579_p13 = scmp.lt.s32.totalorder %s396_s28, %s396_s28 }
  0xca   : > { %p1580_p0 = scmp.lt.s32.totalorder %s1578_s8, %s1571_s24 }
  0xcb   : > { %p1574_p11 = pnand %p1572_p10, %p1909_p8 }
  0xcc   : > { %p1581_p2 = por %p1580_p0, %p1579_p13 }
  0xcd   : > { %p1575_p12 = pneg %p1574_p11 }
  0xcf   : > { %p1582_p5 = pnand %p1581_p2, %p1575_p12 }
  0xd1   : > { %1585 = shalt.err (!%p1582_p5)
}
  0xd2   : > { %1286 = dma.hbm_to_vmem [thread:$0]  (!%p1893_p6), %s2340_s7, 16, %s396_s28, [#allocation15]  }
  0xd3   : > { %s2349_s21 = sadd.s32 4294967294, %s1774_s18   ;;  %s46_s25 = sadd.s32 1, %s1770_s17 }
  0xd4   : > { %s55_s26 = sadd.s32 1, %s1762_s15  ;;  %p48_p8 = scmp.ge.s32.totalorder %s46_s25, 2 }
  0xd5   : > { %p62_p7 = scmp.ne.s32.totalorder %s1762_s15, %s1758_s14  ;;  %p63_p9 = scmp.eq.s32.totalorder %s1774_s18, 0 }
  0xd6   : > { %p68_p4 = scmp.ne.s32.totalorder %s1758_s14, %s1754_s13  ;;  %s2397_s25 = smov (%p48_p8, %s46_s25), 0 }
  0xd7   : > { %p2058_p1 = por %p63_p9, %p62_p7  ;;  %p2369_p3 = scmp.eq.s32.totalorder %s1879_s19, 0 }
  0xd8   : > { %s50_s12 = ssub.s32 %s1770_s17, %s2397_s25  ;;  %p241_p10 = scmp.eq.s32.totalorder %s1879_s19, 1 }
  0xd9   : > { %p2064_p6 = por %p2369_p3, %p68_p4  ;;  %p53_p11 = scmp.eq.s32.totalorder %s50_s12, 0 }
  0xda   : > { %p247_p12 = scmp.eq.s32.totalorder %s2349_s21, 1  ;;  %p2073_p13 = por %p241_p10, %p62_p7 }
  0xdb   : > { %p1308_p0 = scmp.lt.s32.totalorder %s1774_s18, 2  ;;  %s406_s11 = sand.u32 1, %s1762_s15  }
  0xdc   : > { %s2371_s23 = scalar_select %p2073_p13, 1, 0 }
  0xdd   : > { %s2079_s29 = scalar_select %p53_p11, %s1762_s15, %s55_s26  }
  0xde   : > { %p2081_p2 = por %p247_p12, %p68_p4  ;;  %s1222_s1 = smul.u32 24, %s406_s11 }
  0xdf   : > { %s1223_s27 = smul.u32 384, %s1770_s17  ;;  %p2089_p5 = pnand %p1308_p0, %p2058_p1 }
  0xe0   : > { %s2372_s22 = scalar_select %p2081_p2, 1, 0 }
  0xe1   : > { %s2374_s0 = sld [smem:[#allocation27_spill]]  ;;  %s410_s9 = scalar_lea.vmem [#allocation2], %s1222_s1 }
  0xe2   : > { %s419_s26 = sshll.u32 %s410_s9, 4  ;;  %s2100_s3 = scalar_lea.sflag [#allocation3], %s406_s11  ;;  %s2098_s26 = int_to_ptr.vmem [resolvable:$true] %s419_s26 }
  0xe3   : > { %p1588_p7 = pneg %p2089_p5 }
  0xe7   : > { %s2096_s10 = scalar_lea.hbm %s2374_s0, %s1223_s27  ;;  %s1591_s8 = scalar_lea.hbm %s2374_s0, 768 }
  0xe8   : > { %s1586_s12 = scalar_lea.hbm %s2096_s10, 384  ;;  %p1592_p1 = scmp.lt.u32.totalorder %s2096_s10, %s2374_s0 }
  0xe9   : > { %p1587_p8 = scmp.ne.s32.totalorder %s2096_s10, %s1586_s12  ;;  %p1593_p3 = scmp.lt.u32.totalorder %s1591_s8, %s1586_s12 }
  0xea   : > { %p1595_p11 = scmp.lt.u32.totalorder %s1586_s12, %s2096_s10 }
  0xeb   : > { %p1589_p9 = pnand %p1588_p7, %p1587_p8  ;;  %p1594_p10 = por %p1593_p3, %p1592_p1 }
  0xed   : > { %p1590_p4 = pneg %p1589_p9  ;;  %p1596_p12 = por %p1595_p11, %p1594_p10 }
  0xef   : > { %p1597_p0 = pnand %p1596_p12, %p1590_p4 }
  0xf1   : > { %1600 = shalt.err (!%p1597_p0)
}
  0xf2   : > { %s1601_s11 = scalar_lea.vmem %s2098_s26, 384  ;;  %s1785_s1 = smov [#allocation2]  }
  0xf3   : > { %p1602_p8 = scmp.ne.s32.totalorder %s2098_s26, %s1601_s11  ;;  %s1606_s9 = sshll.u32 %s1785_s1, 4  ;;  %s1607_s9 = int_to_ptr.vmem [resolvable:$false] %s1606_s9 }
  0xf4   : > { %s1608_s2 = scalar_lea.vmem %s1607_s9, 768  ;;  %p1609_p13 = scmp.lt.s32.totalorder %s2098_s26, %s1607_s9 }
  0xf5   : > { %p1604_p9 = pnand %p1602_p8, %p1588_p7  ;;  %p1610_p1 = scmp.lt.s32.totalorder %s1608_s2, %s1601_s11 }
  0xf7   : > { %p1605_p2 = pneg %p1604_p9  ;;  %p1611_p3 = por %p1610_p1, %p1609_p13 }
  0xf9   : > { %p1612_p10 = pnand %p1611_p3, %p1605_p2 }
  0xfb   : > { %1615 = shalt.err (!%p1612_p10)
}
  0xfc   : > { %s1786_s21 = smov 128   ;;  %s1787_s12 = smov 8  }
  0xfd   : > { %1290 = dma.hbm_to_vmem [thread:$0]  (!%p2089_p5), %s2096_s10, 384, %s2098_s26, %s2100_s3, %s1786_s21, %s1786_s21, %s1787_s12  }
  0xfe   : > { %p2375_p7 = scmp.ne.s32.totalorder %s2360_s20, 0 }
  0xff   : > { %s2131_s27 = sand.u32 (!%p2375_p7), 1, %s1758_s14  }
 0x100   : > { %431 = sbr.rel (%p2375_p7) target bundleno = 878 (0x36e), region = 52  ;;  %s434_s8 = scalar_lea.sflag (!%p2375_p7), [#allocation3], %s2131_s27 }
 0x101   : > { %s1224_s24 = smul.u32 (!%p2375_p7), 24, %s2131_s27 }
 0x103   : > { %s437_s11 = scalar_lea.vmem (!%p2375_p7), [#allocation2], %s1224_s24 }
 0x107   : > { %1725 = dma.done.wait (%p2064_p6), %s434_s8, 384  }
 0x108   : > { %1727 = vsyncadd (%p2064_p6), %s434_s8, 4294966912  ;;  %p2376_p13 = scmp.eq.s32.totalorder %s1879_s19, 0 }
 0x10a   : > { %1729 = dma.done.wait (%p2376_p13), [#allocation6], 32   ;;  %p2377_p2 = pmov %p2376_p13 }
 0x10c   : > { %1731 = vsyncadd (%p2377_p2), [#allocation6], 4294967264  ;;  %p2378_p5 = pmov %p2377_p2 }
 0x10d   : > { %p2379_p4 = pmov %p2377_p2 }
 0x10e   : > { %1733 = dma.done.wait (%p2378_p5), [#allocation9], 272  }
 0x10f   : > { %1735 = vsyncadd (%p2379_p4), [#allocation9], 4294967024  ;;  %p2380_p11 = pmov %p2377_p2 }
 0x110   : > { %p2381_p12 = pmov %p2377_p2 }
 0x111   : > { %1737 = dma.done.wait (%p2380_p11), [#allocation12], 512  }
 0x112   : > { %1739 = vsyncadd (%p2381_p12), [#allocation12], 4294966784  ;;  %p2382_p6 = pmov %p2377_p2 }
 0x113   : > { %p2383_p0 = pmov %p2377_p2 }
 0x114   : > { %1741 = dma.done.wait (%p2382_p6), [#allocation15], 16  }
 0x115   : > { %1743 = vsyncadd (%p2383_p0), [#allocation15], 4294967280  ;;  %vm520_vm0 = vcmask 261120   ;;  %v517_v0 = vld [vmem:[%s437_s11] sm:$0xff]  ;;  %v519_v1 = vld [vmem:[%s437_s11 + $0x10] sm:$0xff]  ;;  %s2168_s20 = smul.u32 12, %s2131_s27 }
 0x116   : > { %v518_v2 = vld [vmem:[%s437_s11 + $0x8] sm:$0xff]  ;;  %v521_v3 = vsel %vm520_vm0, %v517_v0, 0.0  ;;  %v527_v4 = vsel %vm520_vm0, %v519_v1, 0.0  ;;  %v1378_v21 = vld [vmem:[#allocation8] sm:$0xff]   ;;  %v1147_v37 = vld [vmem:[#allocation5] ss:$0 sm:$0xff] }
 0x117   : > { %v524_v5 = vsel %vm520_vm0, %v518_v2, 0.0  ;;  %522 = vadd.xlane.f32.xlu0 %v521_v3  ;;  %528 = vadd.xlane.f32.xlu1 %v527_v4  ;;  %v1379_v22 = vld [vmem:[#allocation11] sm:$0xff]   ;;  %v1380_v23 = vld [vmem:[#allocation8 + $0x8] sm:$0xff]   ;;  %v1381_v24 = vld [vmem:[#allocation11 + $0x8] sm:$0xff]   ;;  %s2171_s28 = scalar_lea.vmem [#allocation17], %s2168_s20  ;;  %vm808_vm1 = vcmask 257024  }
 0x118   : > { %1198 = vmatprep.subr.bf16.mxu0 %v1378_v21  ;;  %1206 = vmatprep.subr.bf16.mxu1 %v1379_v22  ;;  %v1382_v25 = vld [vmem:[#allocation13] sm:$0xff]   ;;  %v1148_v43 = vld [vmem:[#allocation7] ss:$0 sm:$0xff]  ;;  %v1383_v51 = vld [vmem:[#allocation13 + $0x8] sm:$0xff]   ;;  %s888_s30 = sshll.u32 %s2171_s28, 4  ;;  %s849_s10 = sand.u32 1, %s1879_s19   ;;  %s2182_s30 = int_to_ptr.vmem [resolvable:$true] %s888_s30 }
 0x119   : > { %1199 = vmatpush3.bf16.msra.mxu0 %v1378_v21  ;;  %1207 = vmatpush3.bf16.msra.mxu1 %v1379_v22  ;;  %v1149_v52 = vld [vmem:[#allocation10] ss:$0 sm:$0xff]  ;;  %s2176_s26 = smul.u32 192, %s1766_s16  ;;  %s2179_s3 = scalar_lea.vmem [#allocation16], %s2168_s20 }
 0x11a   : > { %1200 = vmatprep.subr.bf16.mxu0 %v1380_v23  ;;  %1208 = vmatprep.subr.bf16.mxu1 %v1381_v24  ;;  %s870_s1 = sshll.u32 %s2179_s3, 4  ;;  %s2384_s2 = sld [smem:[#allocation34_spill]]  ;;  %s2196_s1 = int_to_ptr.vmem [resolvable:$true] %s870_s1 }
 0x11b   : > { %525 = vadd.xlane.f32.xlu0 %v524_v5  ;;  %s2385_s8 = sld [smem:[#allocation33_spill]]  ;;  %s2212_s16 = scalar_lea.sflag [#allocation18], %s849_s10 }
 0x11c   : > { %s1616_s9 = scalar_lea.vmem %s2182_s30, 192  ;;  %p2386_p9 = scmp.ne.s32.totalorder %s2371_s23, 0 }
 0x11d   : > { %1201 = vmatpush3.bf16.msra.mxu0 %v1380_v23  ;;  %1209 = vmatpush3.bf16.msra.mxu1 %v1381_v24  ;;  %p1617_p8 = scmp.ne.s32.totalorder %s2182_s30, %s1616_s9  ;;  %s1788_s0 = smov [#allocation17]  }
 0x11e   : > { %1214 = vmatprep.subr.bf16.mxu0 %v1382_v25  ;;  %s1620_s4 = sshll.u32 %s1788_s0, 4  ;;  %s1621_s4 = int_to_ptr.vmem [resolvable:$false] %s1620_s4 }
 0x11f   : > { %p1618_p1 = pnand %p1617_p8, %p2386_p9  ;;  %s1622_s5 = scalar_lea.vmem %s1621_s4, 384 }
 0x120   : > { %s2192_s21 = scalar_lea.hbm %s2384_s2, %s2176_s26  ;;  %p1623_p10 = scmp.lt.s32.totalorder %s2182_s30, %s1621_s4 }
 0x121   : > { %s2208_s11 = scalar_lea.hbm %s2385_s8, %s2176_s26  ;;  %p1619_p3 = pneg %p1618_p1 }
 0x122   : > { %p1624_p7 = scmp.lt.s32.totalorder %s1622_s5, %s1616_s9 }
 0x124   : > { %p1625_p13 = por %p1624_p7, %p1623_p10 }
 0x126   : > { %p1626_p2 = pnand %p1625_p13, %p1619_p3 }
 0x1a4   : > { %v523_v6 = vpop.xlane.xlu0 %522  ;;  %v529_v7 = vpop.xlane.xlu1 %528 }
 0x1a5   : > { %v531_v8 = vmul.f32 0.03125, %v523_v6  ;;  %v533_v9 = vmul.f32 0.03125, %v529_v7  ;;  %v2202_v6 = vld [vmem:[#allocation14] ss:$0 sm:$0xff] }
 0x1a7   : > { %v534_v10 = vsub.f32 %v517_v0, %v531_v8  ;;  %v536_v11 = vsub.f32 %v519_v1, %v533_v9 }
 0x1a8   : > { %v526_v12 = vpop.xlane.xlu0 %525 }
 0x1a9   : > { %v532_v13 = vmul.f32 0.03125, %v526_v12  ;;  %v537_v14 = vmul.f32 %v534_v10, %v534_v10  ;;  %v539_v15 = vmul.f32 %v536_v11, %v536_v11 }
 0x1ab   : > { %v535_v16 = vsub.f32 %v518_v2, %v532_v13  ;;  %v540_v17 = vsel %vm520_vm0, %v537_v14, 0.0  ;;  %v546_v18 = vsel %vm520_vm0, %v539_v15, 0.0 }
 0x1ac   : > { %541 = vadd.xlane.f32.xlu1 %v540_v17 }
 0x1ad   : > { %v538_v19 = vmul.f32 %v535_v16, %v535_v16 }
 0x1af   : > { %v543_v20 = vsel %vm520_vm0, %v538_v19, 0.0 }
 0x1b0   : > { %547 = vadd.xlane.f32.xlu1 %v546_v18  ;;  %544 = vadd.xlane.f32.xlu0 %v543_v20 }
 0x239   : > { %v542_v26 = vpop.xlane.xlu1 %541 }
 0x23a   : > { %v549_v27 = vmul.f32 0.03125, %v542_v26 }
 0x23c   : > { %v552_v28 = vadd.f32 1e-05, %v549_v27 }
 0x23d   : > { %v548_v29 = vpop.xlane.xlu1 %547  ;;  %v545_v30 = vpop.xlane.xlu0 %544 }
 0x23e   : > { %1384 = vrsqrt.f32 %v552_v28  ;;  %v551_v31 = vmul.f32 0.03125, %v548_v29  ;;  %v550_v32 = vmul.f32 0.03125, %v545_v30 }
 0x240   : > { %v554_v33 = vadd.f32 1e-05, %v551_v31  ;;  %v553_v34 = vadd.f32 1e-05, %v550_v32 }
 0x242   : > { %1386 = vrsqrt.f32 %v554_v33 }
 0x243   : > { %1388 = vrsqrt.f32 %v553_v34 }
 0x248   : > { %v1385_v35 = vpop.eup %1384 }
 0x249   : > { %v558_v36 = vmul.f32 %v1385_v35, %v534_v10 }
 0x24b   : > { %v568_v42 = vmul.f32 %v1147_v37, %v558_v36 }
 0x24c   : > { %v1387_v38 = vpop.eup %1386 }
 0x24d   : > { %v1389_v39 = vpop.eup %1388  ;;  %v560_v40 = vmul.f32 %v1387_v38, %v536_v11  ;;  %v578_v47 = vadd.f32 %v1148_v43, %v568_v42 }
 0x24e   : > { %v559_v41 = vmul.f32 %v1389_v39, %v535_v16 }
 0x24f   : > { %v570_v44 = vmul.f32 %v1147_v37, %v560_v40 }
 0x250   : > { %v569_v45 = vmul.f32 %v1147_v37, %v559_v41 }
 0x251   : > { %v580_v46 = vadd.f32 %v1148_v43, %v570_v44 }
 0x252   : > { %v579_v48 = vadd.f32 %v1148_v43, %v569_v45 }
 0x253   : > { %v582_v49 = vpack.c.bf16 %v580_v46, %v580_v46 }
 0x254   : > { %v581_v50 = vpack.c.bf16 %v579_v48, %v578_v47 }
 0x256   : > { %1202 = vmatprep.mubr.msk.bf16.mxu0 %vm520_vm0, %v581_v50  ;;  %1210 = vmatprep.mubr.msk.bf16.mxu1 %vm520_vm0, %v581_v50 }
 0x257   : > { %1203 = vmatmul.mubr.msk.bf16.vlgmr.msra.gmra.mrb[0].mxu0 %vm520_vm0, %v582_v49  ;;  %1211 = vmatmul.mubr.msk.bf16.vlgmr.msra.gmra.mrb[0].mxu1 %vm520_vm0, %v582_v49 }
 0x258   : > { %1215 = vmatpush3.bf16.msra.mxu0 %v1382_v25  ;;  %1218 = vmatprep.mubr.msk.bf16.mxu0 %vm520_vm0, %v581_v50 }
 0x259   : > { %1216 = vmatprep.subr.bf16.mxu0 %v1383_v51 }
 0x25c   : > { %1217 = vmatpush3.bf16.msra.mxu0 %v1383_v51 }
 0x25f   : > { %1219 = vmatmul.mubr.msk.bf16.vlgmr.msra.gmra.mrb[4].mxu0 %vm520_vm0, %v582_v49 }
 0x32a   : > { %v1204_v53 = vpop.f32.mrb[0].mxu0  ;;  %v1212_v54 = vpop.f32.mrb[0].mxu1 }
 0x32b   : > { %v655_v55 = vadd.f32 %v1204_v53, %v1149_v52  ;;  %v1182_v56 = vpack.c.bf16 %v1212_v54, %v1212_v54  ;;  %v646_v57 = vpop.f32.mrb[1].mxu0  ;;  %v710_v58 = vpop.f32.mrb[1].mxu1 }
 0x32c   : > { %v647_v59 = vadd.f32 %v1149_v52, %v646_v57  ;;  %v1180_v60 = vpack.c.bf16 %v710_v58, %v710_v58  ;;  %v1205_v61 = vpop.f32.mrb[2].mxu0  ;;  %v1213_v62 = vpop.f32.mrb[2].mxu1 }
 0x32d   : > { %v1179_v63 = vpack.c.bf16 %v655_v55, %v655_v55  ;;  %827 = vst.msk [vmem:[%s2171_s28 + $0x8] sm:$0xf] %vm808_vm1, %v1182_v56  ;;  %v649_v0 = vpop.f32.mrb[3].mxu0  ;;  %v713_v1 = vpop.f32.mrb[3].mxu1 }
 0x32e   : > { %v1177_v2 = vpack.c.bf16 %v647_v59, %v647_v59  ;;  %825 = vst.msk [vmem:[%s2171_s28] sm:$0xf] %vm808_vm1, %v1180_v60  ;;  %v650_v3 = vadd.f32 %v1149_v52, %v649_v0  ;;  %v1181_v4 = vpack.c.bf16 %v713_v1, %v713_v1 }
 0x32f   : > { %811 = vst.msk [vmem:[%s2179_s3 + $0x8] sm:$0xf] %vm808_vm1, %v1179_v63 }
 0x330   : > { %809 = vst.msk [vmem:[%s2179_s3] sm:$0xf] %vm808_vm1, %v1177_v2  ;;  %v1178_v5 = vpack.c.bf16 %v650_v3, %v650_v3  ;;  %826 = vst.msk [vmem:[%s2171_s28 + $0x4] sm:$0xf] %vm808_vm1, %v1181_v4 }
 0x331   : > { %1629 = shalt.err (!%p1626_p2)
}
 0x332   : > { %s1630_s19 = scalar_lea.hbm %s2192_s21, 192  ;;  %s1634_s0 = scalar_lea.hbm %s2384_s2, 384 }
 0x333   : > { %p1631_p5 = scmp.ne.s32.totalorder %s2192_s21, %s1630_s19  ;;  %p1635_p12 = scmp.lt.u32.totalorder %s2192_s21, %s2384_s2 }
 0x334   : > { %p1636_p6 = scmp.lt.u32.totalorder %s1634_s0, %s1630_s19  ;;  %p1638_p8 = scmp.lt.u32.totalorder %s1630_s19, %s2192_s21 }
 0x335   : > { %p1632_p4 = pnand %p1631_p5, %p2386_p9 }
 0x336   : > { %p1637_p0 = por %p1636_p6, %p1635_p12 }
 0x337   : > { %p1633_p11 = pneg %p1632_p4 }
 0x338   : > { %p1639_p1 = por %p1638_p8, %p1637_p0 }
 0x33a   : > { %p1640_p3 = pnand %p1639_p1, %p1633_p11 }
 0x33c   : > { %1643 = shalt.err (!%p1640_p3)
}
 0x33d   : > { %s1789_s5 = smov 64   ;;  %s1790_s24 = smov 4   ;;  %810 = vst.msk [vmem:[%s2179_s3 + $0x4] sm:$0xf] %vm808_vm1, %v1178_v5  ;;  %v1220_v7 = vpop.f32.mrb[4].mxu0 }
 0x33e   : > { %1260 = dma.vmem_to_hbm [thread:$0]  (%p2386_p9), %s2182_s30, 192, %s2192_s21, %s2212_s16, %s1789_s5, %s1789_s5, %s1790_s24   ;;  %v790_v8 = vadd.f32 %v1220_v7, %v2202_v6  ;;  %v781_v9 = vpop.f32.mrb[5].mxu0 }
 0x33f   : > { %s845_s9 = scalar_lea.sflag [#allocation4], %s2131_s27  ;;  %s1644_s19 = scalar_lea.vmem %s2196_s1, 192 }
 0x340   : > { %p1645_p10 = scmp.ne.s32.totalorder %s2196_s1, %s1644_s19  ;;  %s1791_s28 = smov [#allocation16]  }
 0x341   : > { %s1648_s10 = sshll.u32 %s1791_s28, 4  ;;  %s1649_s10 = int_to_ptr.vmem [resolvable:$false] %s1648_s10 }
 0x342   : > { %p1646_p7 = pnand %p1645_p10, %p2386_p9  ;;  %s1650_s0 = scalar_lea.vmem %s1649_s10, 384 }
 0x343   : > { %p1651_p2 = scmp.lt.s32.totalorder %s2196_s1, %s1649_s10  ;;  %p1652_p5 = scmp.lt.s32.totalorder %s1650_s0, %s1644_s19 }
 0x344   : > { %p1647_p13 = pneg %p1646_p7 }
 0x345   : > { %p1653_p4 = por %p1652_p5, %p1651_p2 }
 0x347   : > { %p1654_p11 = pnand %p1653_p4, %p1647_p13 }
 0x349   : > { %1657 = shalt.err (!%p1654_p11)
}
 0x34a   : > { %s1658_s30 = scalar_lea.hbm %s2208_s11, 192  ;;  %s1662_s12 = scalar_lea.hbm %s2385_s8, 384 }
 0x34b   : > { %p1659_p12 = scmp.ne.s32.totalorder %s2208_s11, %s1658_s30  ;;  %p1663_p8 = scmp.lt.u32.totalorder %s2208_s11, %s2385_s8 }
 0x34c   : > { %p1664_p1 = scmp.lt.u32.totalorder %s1662_s12, %s1658_s30  ;;  %p1666_p10 = scmp.lt.u32.totalorder %s1658_s30, %s2208_s11 }
 0x34d   : > { %p1660_p6 = pnand %p1659_p12, %p2386_p9 }
 0x34e   : > { %p1665_p3 = por %p1664_p1, %p1663_p8 }
 0x34f   : > { %p1661_p0 = pneg %p1660_p6 }
 0x350   : > { %p1667_p7 = por %p1666_p10, %p1665_p3 }
 0x352   : > { %p1668_p13 = pnand %p1667_p7, %p1661_p0 }
 0x354   : > { %1671 = shalt.err (!%p1668_p13)
}
 0x355   : > { %1259 = dma.vmem_to_hbm [thread:$0]  (%p2386_p9), %s2196_s1, 192, %s2208_s11, %s845_s9, %s1789_s5, %s1789_s5, %s1790_s24   ;;  %v782_v10 = vadd.f32 %v2202_v6, %v781_v9  ;;  %v1221_v11 = vpop.f32.mrb[6].mxu0  ;;  %v1185_v12 = vpack.c.bf16 %v790_v8, %v790_v8 }
 0x356   : > { %s511_s19 = scalar_lea.vmem [#allocation19], %s2168_s20  ;;  %v784_v13 = vpop.f32.mrb[7].mxu0  ;;  %s2387_s11 = sld [smem:[#allocation35_spill]] }
 0x357   : > { %s906_s10 = sshll.u32 %s511_s19, 4  ;;  %v1183_v14 = vpack.c.bf16 %v782_v10, %v782_v10  ;;  %v785_v15 = vadd.f32 %v2202_v6, %v784_v13  ;;  %843 = vst.msk [vmem:[%s511_s19 + $0x8] sm:$0xf] %vm808_vm1, %v1185_v12  ;;  %s1792_s0 = smov [#allocation19]   ;;  %s2273_s10 = int_to_ptr.vmem [resolvable:$true] %s906_s10 }
 0x358   : > { %s1672_s20 = scalar_lea.vmem %s2273_s10, 192  ;;  %s1676_s30 = sshll.u32 %s1792_s0, 4  ;;  %s1677_s30 = int_to_ptr.vmem [resolvable:$false] %s1676_s30 }
 0x359   : > { %841 = vst.msk [vmem:[%s511_s19] sm:$0xf] %vm808_vm1, %v1183_v14  ;;  %v1184_v16 = vpack.c.bf16 %v785_v15, %v785_v15  ;;  %p1673_p2 = scmp.ne.s32.totalorder %s2273_s10, %s1672_s20  ;;  %s1678_s3 = scalar_lea.vmem %s1677_s30, 384 }
 0x35a   : > { %p1679_p11 = scmp.lt.s32.totalorder %s2273_s10, %s1677_s30  ;;  %p1680_p12 = scmp.lt.s32.totalorder %s1678_s3, %s1672_s20 }
 0x35b   : > { %842 = vst.msk [vmem:[%s511_s19 + $0x4] sm:$0xf] %vm808_vm1, %v1184_v16  ;;  %p1674_p5 = pnand %p1673_p2, %p2386_p9 }
 0x35c   : > { %s2280_s9 = scalar_lea.hbm %s2387_s11, %s2176_s26  ;;  %p1681_p6 = por %p1680_p12, %p1679_p11 }
 0x35d   : > { %p1675_p4 = pneg %p1674_p5 }
 0x35f   : > { %p1682_p0 = pnand %p1681_p6, %p1675_p4 }
 0x361   : > { %1685 = shalt.err (!%p1682_p0)
}
 0x362   : > { %s1686_s26 = scalar_lea.hbm %s2280_s9, 192  ;;  %s1690_s4 = scalar_lea.hbm %s2387_s11, 384 }
 0x363   : > { %p1687_p8 = scmp.ne.s32.totalorder %s2280_s9, %s1686_s26  ;;  %p1691_p10 = scmp.lt.u32.totalorder %s2280_s9, %s2387_s11 }
 0x364   : > { %p1692_p7 = scmp.lt.u32.totalorder %s1690_s4, %s1686_s26  ;;  %p1694_p2 = scmp.lt.u32.totalorder %s1686_s26, %s2280_s9 }
 0x365   : > { %p1688_p1 = pnand %p1687_p8, %p2386_p9 }
 0x366   : > { %p1693_p13 = por %p1692_p7, %p1691_p10 }
 0x367   : > { %p1689_p3 = pneg %p1688_p1 }
 0x368   : > { %p1695_p5 = por %p1694_p2, %p1693_p13 }
 0x36a   : > { %p1696_p4 = pnand %p1695_p5, %p1689_p3 }
 0x36c   : > { %1699 = shalt.err (!%p1696_p4)
}
 0x36d   : > { %1261 = dma.vmem_to_hbm [thread:$0]  (%p2386_p9), %s2273_s10, 192, %s2280_s9, %s2212_s16, %s1789_s5, %s1789_s5, %s1790_s24  }
 0x36e PF: > { %s921_s27 = sand.u32 1, %s1754_s13   ;;  %p2388_p11 = scmp.ne.s32.totalorder %s2372_s22, 0 }
 0x36f   : > { %p2389_p12 = scmp.ge.s32.totalorder %s1774_s18, 2  ;;  %s922_s1 = scalar_lea.sflag [#allocation4], %s921_s27 }
 0x371   : > { %p1292_p6 = pnand %p2389_p12, %p2388_p11 }
 0x373   : > { %1745 = dma.done.wait (!%p1292_p6), %s922_s1, 192  }
 0x374   : > { %1747 = vsyncadd (!%p1292_p6), %s922_s1, 4294967104  ;;  %s2390_s23 = sadd.s32 4294967294, %s1774_s18  }
 0x375   : > { %s930_s20 = sand.u32 1, %s2390_s23  }
 0x376   : > { %s931_s0 = scalar_lea.sflag [#allocation18], %s930_s20 }
 0x377   : > { %1749 = dma.done.wait (!%p1292_p6), %s931_s0, 384  }
 0x378   : > { %1751 = vsyncadd (!%p1292_p6), %s931_s0, 4294966912  ;;  %s34_s18 = sadd.s32 1, %s1774_s18   ;;  %s2391_s13 = smov %s1758_s14 }
 0x379   : > { %p31_p9 = scmp.ge.s32.totalorder %s34_s18, 4   ;;  %s2392_s14 = smov %s1762_s15 }
 0x37a   : > { %s2393_s15 = smov %s2079_s29  ;;  %s2394_s16 = smov %s1770_s17 }
 0x37b   : > { %s2395_s17 = smov %s2397_s25  ;;  %33 = sbr.rel (!%p31_p9) target bundleno = 22 (0x16), region = 157 }
 0x382   :  { %945 = vsyncpa [#allocation3], 1 }
 0x383   :  { %947 = vsyncpa [#allocation3 + $0x1], 1 }
 0x384   :  { %948 = vsyncpa [#allocation6], 1 }
 0x385   :  { %949 = vsyncpa [#allocation9], 1 }
 0x386   :  { %950 = vsyncpa [#allocation12], 1 }
 0x387   :  { %951 = vsyncpa [#allocation15], 1 }
 0x388   :  { %952 = vsyncpa [#allocation4], 1 }
 0x389   :  { %954 = vsyncpa [#allocation4 + $0x1], 1 }
 0x38a   :  { %955 = vsyncpa [#allocation18], 1 }
 0x38b   :  { %957 = vsyncpa [#allocation18 + $0x1], 1 }

// kernel: audio_encoder_forward.12
= control target key start
LH: loop header
LB: loop body
LE: loop exit
PB: predicated region body
PF: predicated region fallthrough
CT: control target
= control target key end

     0   :  { %s2157_s0 = inlined_call_operand.hbm [shape: bf16[2,24,32], index: 0, kind: input, shape index: {}]   ;;  %s2158_s1 = inlined_call_operand.hbm [shape: bf16[2,24,32], index: 1, kind: input, shape index: {}]   ;;  %s2159_s2 = inlined_call_operand.hbm [shape: bf16[2,24,32], index: 2, kind: input, shape index: {}]   ;;  %s2160_s3 = inlined_call_operand.hbm [shape: bf16[2,24,32], index: 3, kind: output, shape index: {}]  }
   0x1   :  { %2170 = sst [smem:[#allocation15_spill]] %s2158_s1 }
   0x2   :  { %8 = vsyncpa [#allocation3], 0 }
   0x3   :  { %10 = vsyncpa [#allocation3 + $0x1], 0 }
   0x4   :  { %11 = vsyncpa [#allocation6], 0 }
   0x5   :  { %13 = vsyncpa [#allocation6 + $0x1], 0 }
   0x6   :  { %14 = vsyncpa [#allocation4], 0 }
   0x7   :  { %16 = vsyncpa [#allocation4 + $0x1], 0  ;;  %s1704_s12 = smov 0   ;;  %s1706_s13 = smov 0  }
   0x8   :  { %s1708_s14 = smov 0   ;;  %s1710_s15 = smov 0  }
   0x9   :  { %s1712_s16 = smov 0   ;;  %s1714_s17 = smov 0  }
   0xa LB: > { %2171 = sst [smem:[#allocation12_spill]] %s1663_s16  ;;  %s1735_s18 = sadd.s32 4294967295, %s1667_s17   ;;  %s1667_s17 = sphi %s1714_s17, %s22_s17   ;;  %s1663_s16 = sphi %s1712_s16, %s2194_s16   ;;  %s1659_s15 = sphi %s1710_s15, %s2193_s15   ;;  %s1655_s14 = sphi %s1708_s14, %s2197_s14   ;;  %s1651_s13 = sphi %s1706_s13, %s2196_s13   ;;  %s1647_s12 = sphi %s1704_s12, %s2195_s12  }
   0xb   : > { %s1185_s19 = sadd.s32 4294967294, %s1667_s17   ;;  %s34_s20 = sadd.s32 1, %s1663_s16 }
   0xc   : > { %s43_s21 = sadd.s32 1, %s1655_s14  ;;  %p36_p0 = scmp.ge.s32.totalorder %s34_s20, 2 }
   0xd   : > { %p50_p1 = scmp.ne.s32.totalorder %s1655_s14, %s1651_s13  ;;  %p51_p2 = scmp.eq.s32.totalorder %s1667_s17, 0 }
   0xe   : > { %p56_p3 = scmp.ne.s32.totalorder %s1651_s13, %s1647_s12  ;;  %s2199_s20 = smov (%p36_p0, %s34_s20), 0 }
   0xf   : > { %2172 = sst [smem:[#allocation13_spill]] %s2199_s20  ;;  %p1747_p4 = por %p51_p2, %p50_p1 }
  0x10   : > { %p57_p5 = scmp.eq.s32.totalorder %s1735_s18, 0  ;;  %s38_s23 = ssub.s32 %s1663_s16, %s2199_s20 }
  0x11   : > { %p134_p6 = scmp.eq.s32.totalorder %s1735_s18, 1  ;;  %p41_p7 = scmp.eq.s32.totalorder %s38_s23, 0 }
  0x12   : > { %p1755_p8 = por %p57_p5, %p56_p3  ;;  %p140_p10 = scmp.eq.s32.totalorder %s1185_s19, 1 }
  0x13   : > { %p1759_p9 = por %p134_p6, %p50_p1  ;;  %p1361_p13 = scmp.lt.s32.totalorder %s1667_s17, 2 }
  0x14   : > { %s2174_s24 = scalar_select %p1755_p8, 1, 0 }
  0x15   : > { %s2175_s25 = scalar_select %p1759_p9, 1, 0 }
  0x16   : > { %s1764_s26 = scalar_select %p41_p7, %s1655_s14, %s43_s21  }
  0x17   : > { %p1766_p11 = por %p140_p10, %p56_p3  ;;  %s2163_s28 = sand.u32 1, %s1655_s14  }
  0x18   : > { %2176 = sst [smem:[#allocation14_spill]] %s1764_s26  ;;  %s1775_s29 = smul.u32 12, %s2163_s28 }
  0x19   : > { %s2177_s27 = scalar_select %p1766_p11, 1, 0 }
  0x1a   : > { %s1778_s30 = smul.u32 192, %s1663_s16  ;;  %p1782_p0 = pnand %p1361_p13, %p1747_p4 }
  0x1b   : > { %s183_s5 = sand.u32 1, %s1667_s17   ;;  %s2179_s1 = sld [smem:[#allocation15_spill]] }
  0x1c   : > { %s187_s9 = scalar_lea.vmem [#allocation5], %s1775_s29  ;;  %s1798_s11 = scalar_lea.sflag [#allocation6], %s183_s5 }
  0x1d   : > { %s194_s10 = sshll.u32 %s187_s9, 4  ;;  %p1804_p4 = pneg %p1782_p0  ;;  %s1795_s10 = int_to_ptr.vmem [resolvable:$true] %s194_s10 }
  0x21   : > { %s1791_s8 = scalar_lea.hbm %s2179_s1, %s1778_s30  ;;  %s1496_s6 = scalar_lea.hbm %s2179_s1, 384 }
  0x22   : > { %s1491_s19 = scalar_lea.hbm %s1791_s8, 192  ;;  %p1497_p7 = scmp.lt.u32.totalorder %s1791_s8, %s2179_s1 }
  0x23   : > { %p1492_p3 = scmp.ne.s32.totalorder %s1791_s8, %s1491_s19  ;;  %p1498_p10 = scmp.lt.u32.totalorder %s1496_s6, %s1491_s19 }
  0x24   : > { %p1500_p12 = scmp.lt.u32.totalorder %s1491_s19, %s1791_s8 }
  0x25   : > { %p1494_p5 = pnand %p1804_p4, %p1492_p3  ;;  %p1499_p13 = por %p1498_p10, %p1497_p7 }
  0x27   : > { %p1495_p6 = pneg %p1494_p5  ;;  %p1501_p1 = por %p1500_p12, %p1499_p13 }
  0x29   : > { %p1502_p2 = pnand %p1501_p1, %p1495_p6 }
  0x2b   : > { %1505 = shalt.err (!%p1502_p2)
}
  0x2c   : > { %s1506_s5 = scalar_lea.vmem %s1795_s10, 192  ;;  %s1669_s22 = smov [#allocation5]  }
  0x2d   : > { %p1507_p3 = scmp.ne.s32.totalorder %s1795_s10, %s1506_s5  ;;  %s1511_s23 = sshll.u32 %s1669_s22, 4  ;;  %s1512_s23 = int_to_ptr.vmem [resolvable:$false] %s1511_s23 }
  0x2e   : > { %s1513_s7 = scalar_lea.vmem %s1512_s23, 384  ;;  %p1514_p9 = scmp.lt.s32.totalorder %s1795_s10, %s1512_s23 }
  0x2f   : > { %p1509_p5 = pnand %p1507_p3, %p1804_p4  ;;  %p1515_p8 = scmp.lt.s32.totalorder %s1513_s7, %s1506_s5 }
  0x31   : > { %p1510_p11 = pneg %p1509_p5  ;;  %p1516_p7 = por %p1515_p8, %p1514_p9 }
  0x33   : > { %p1517_p10 = pnand %p1516_p7, %p1510_p11 }
  0x35   : > { %1520 = shalt.err (!%p1517_p10)
}
  0x36   : > { %s2164_s19 = smov 64   ;;  %s2166_s6 = smov 4  }
  0x37   : > { %1353 = dma.hbm_to_vmem [thread:$0]  (!%p1782_p0), %s1791_s8, 192, %s1795_s10, %s1798_s11, %s2164_s19, %s2164_s19, %s2166_s6  }
  0x38   : > { %p2181_p8 = scmp.lt.s32.totalorder %s1667_s17, 3  ;;  %p2182_p9 = scmp.ge.s32.totalorder %s1667_s17, 1 }
  0x39   : > { %s1843_s23 = scalar_lea.hbm %s2157_s0, %s1778_s30  ;;  %s164_s7 = scalar_lea.vmem [#allocation2], %s1775_s29 }
  0x3a   : > { %p1835_p11 = pnand %p2182_p9, %p2181_p8  ;;  %s173_s28 = sshll.u32 %s164_s7, 4  ;;  %s1846_s28 = int_to_ptr.vmem [resolvable:$true] %s173_s28 }
  0x3b   : > { %s1852_s19 = scalar_lea.hbm %s2159_s2, %s1778_s30  ;;  %s2184_s6 = sand.u32 1, %s1655_s14  }
  0x3c   : > { %s2183_s9 = scalar_select %p1835_p11, 1, 0 }
  0x3d   : > { %s1856_s1 = scalar_lea.sflag [#allocation3], %s2184_s6  ;;  %s1521_s20 = scalar_lea.hbm %s1843_s23, 192 }
  0x3e   : > { %p1522_p12 = scmp.ne.s32.totalorder %s1843_s23, %s1521_s20  ;;  %s1526_s16 = scalar_lea.hbm %s2157_s0, 384 }
  0x3f   : > { %p1527_p6 = scmp.lt.u32.totalorder %s1843_s23, %s2157_s0  ;;  %p1528_p13 = scmp.lt.u32.totalorder %s1526_s16, %s1521_s20 }
  0x40   : > { %p1524_p1 = pnand %p1522_p12, %p1804_p4  ;;  %p1530_p5 = scmp.lt.u32.totalorder %s1521_s20, %s1843_s23 }
  0x41   : > { %p1529_p3 = por %p1528_p13, %p1527_p6 }
  0x42   : > { %p1525_p2 = pneg %p1524_p1 }
  0x43   : > { %p1531_p7 = por %p1530_p5, %p1529_p3 }
  0x45   : > { %p1532_p10 = pnand %p1531_p7, %p1525_p2 }
  0x47   : > { %1535 = shalt.err (!%p1532_p10)
}
  0x48   : > { %s1536_s30 = scalar_lea.vmem %s1846_s28, 192  ;;  %s1672_s6 = smov [#allocation2]  }
  0x49   : > { %p1537_p8 = scmp.ne.s32.totalorder %s1846_s28, %s1536_s30  ;;  %s1541_s8 = sshll.u32 %s1672_s6, 4  ;;  %s1542_s8 = int_to_ptr.vmem [resolvable:$false] %s1541_s8 }
  0x4a   : > { %s1543_s26 = scalar_lea.vmem %s1542_s8, 384  ;;  %p1544_p1 = scmp.lt.s32.totalorder %s1846_s28, %s1542_s8 }
  0x4b   : > { %p1539_p9 = pnand %p1537_p8, %p1804_p4  ;;  %p1545_p11 = scmp.lt.s32.totalorder %s1543_s26, %s1536_s30 }
  0x4d   : > { %p1540_p12 = pneg %p1539_p9  ;;  %p1546_p6 = por %p1545_p11, %p1544_p1 }
  0x4f   : > { %p1547_p13 = pnand %p1546_p6, %p1540_p12 }
  0x51   : > { %1550 = shalt.err (!%p1547_p13)
}
  0x52   : > { %s2185_s16 = smov 4   ;;  %s2186_s20 = smov 64  }
  0x53   : > { %1350 = dma.hbm_to_vmem [thread:$0]  (!%p1782_p0), %s1843_s23, 192, %s1846_s28, %s1856_s1, %s2186_s20, %s2186_s20, %s2185_s16  }
  0x54   : > { %s208_s10 = scalar_lea.vmem [#allocation7], %s1775_s29  ;;  %s1551_s22 = scalar_lea.hbm %s1852_s19, 192 }
  0x55   : > { %s215_s5 = sshll.u32 %s208_s10, 4  ;;  %p1552_p11 = scmp.ne.s32.totalorder %s1852_s19, %s1551_s22  ;;  %s1884_s5 = int_to_ptr.vmem [resolvable:$true] %s215_s5 }
  0x56   : > { %s1556_s6 = scalar_lea.hbm %s2159_s2, 384  ;;  %p1557_p5 = scmp.lt.u32.totalorder %s1852_s19, %s2159_s2 }
  0x57   : > { %p1554_p2 = pnand %p1552_p11, %p1804_p4  ;;  %p1558_p7 = scmp.lt.u32.totalorder %s1556_s6, %s1551_s22 }
  0x58   : > { %p1560_p8 = scmp.lt.u32.totalorder %s1551_s22, %s1852_s19 }
  0x59   : > { %p1555_p3 = pneg %p1554_p2  ;;  %p1559_p10 = por %p1558_p7, %p1557_p5 }
  0x5b   : > { %p1561_p9 = por %p1560_p8, %p1559_p10 }
  0x5d   : > { %p1562_p12 = pnand %p1561_p9, %p1555_p3 }
  0x5f   : > { %1565 = shalt.err (!%p1562_p12)
}
  0x60   : > { %s1566_s1 = scalar_lea.vmem %s1884_s5, 192  ;;  %s1673_s28 = smov [#allocation7]  }
  0x61   : > { %p1567_p1 = scmp.ne.s32.totalorder %s1884_s5, %s1566_s1  ;;  %s1571_s29 = sshll.u32 %s1673_s28, 4  ;;  %s1572_s29 = int_to_ptr.vmem [resolvable:$false] %s1571_s29 }
  0x62   : > { %s1573_s23 = scalar_lea.vmem %s1572_s29, 384  ;;  %p1574_p11 = scmp.lt.s32.totalorder %s1884_s5, %s1572_s29 }
  0x63   : > { %p1569_p6 = pnand %p1567_p1, %p1804_p4  ;;  %p1575_p2 = scmp.lt.s32.totalorder %s1573_s23, %s1566_s1 }
  0x65   : > { %p1570_p13 = pneg %p1569_p6  ;;  %p1576_p5 = por %p1575_p2, %p1574_p11 }
  0x67   : > { %p1577_p7 = pnand %p1576_p5, %p1570_p13 }
  0x69   : > { %1580 = shalt.err (!%p1577_p7)
}
  0x6a   : > { %1356 = dma.hbm_to_vmem [thread:$0]  (!%p1782_p0), %s1852_s19, 192, %s1884_s5, %s1798_s11, %s2186_s20, %s2186_s20, %s2185_s16  }
  0x6b   : > { %p2187_p4 = scmp.ne.s32.totalorder %s2183_s9, 0 }
  0x6c   : > { %s1914_s21 = sand.u32 (!%p2187_p4), 1, %s1651_s13   ;;  %p2188_p3 = scmp.ne.s32.totalorder (!%p2187_p4), %s2174_s24, 0 }
  0x6d   : > { %227 = sbr.rel (%p2187_p4) target bundleno = 2685 (0xa7d), region = 32  ;;  %s230_s4 = scalar_lea.sflag (!%p2187_p4), [#allocation3], %s1914_s21 }
  0x6e   : > { %s1917_s10 = smul.u32 (!%p2187_p4), 12, %s1914_s21 }
  0x70   : > { %s233_s22 = scalar_lea.vmem (!%p2187_p4), [#allocation2], %s1917_s10 }
  0x74   : > { %1634 = dma.done.wait (%p2188_p3), %s230_s4, 192  }
  0x75   : > { %1636 = vsyncadd (%p2188_p3), %s230_s4, 4294967104  ;;  %s238_s11 = sand.u32 1, %s1735_s18   ;;  %s242_s9 = scalar_lea.vmem [#allocation5], %s1917_s10 }
  0x76   : > { %s239_s19 = scalar_lea.sflag [#allocation6], %s238_s11 }
  0x77   : > { %1638 = dma.done.wait (%p2188_p3), %s239_s19, 384  }
  0x78   : > { %1640 = vsyncadd (%p2188_p3), %s239_s19, 4294966912  ;;  %vm316_vm0 = vcmask 64512   ;;  %v1931_v0 = vld [vmem:[%s242_s9] sm:$0xff]   ;;  %v1933_v1 = vld [vmem:[%s242_s9 + $0x8] ss:$0 sps:$4 sm:$0xff]   ;;  %v296_v6 = vlaneseq  ;;  %vm377_vm2 = vcmask 195584  }
  0x79   : > { %1319 = vmatprep.subr.msk.bf16.mxu0 %vm316_vm0, %v1931_v0  ;;  %v324_v2 = vsel %vm316_vm0, %v1931_v0, 0  ;;  %v1939_v3 = vld [vmem:[%s233_s22] sm:$0xff]   ;;  %v327_v4 = vsel %vm316_vm0, %v1933_v1, 0  ;;  %v1947_v5 = vld [vmem:[%s233_s22 + $0x8] ss:$0 sps:$4 sm:$0xff]   ;;  %s251_s18 = scalar_lea.vmem [#allocation7], %s1917_s10 }
  0x7a   : > { %1256 = vmatpush3.bf16.xpose.msra.mxu0 %v324_v2  ;;  %1259 = vmatprep.mubr.msk.bf16.mxu0 %vm316_vm0, %v1939_v3  ;;  %v297_v7 = vand.u32 127, %v296_v6  ;;  %v1674_v8 = vmov -1e+30   ;;  %v1963_v35 = vld [vmem:[%s251_s18] sm:$0xff]   ;;  %v1965_v36 = vld [vmem:[%s251_s18 + $0x8] ss:$0 sps:$4 sm:$0xff]  }
  0x7b   : > { %1320 = vmatprep.subr.msk.bf16.mxu0 %vm316_vm0, %v1933_v1  ;;  %vm428_vm3 = vcmask 1043456   ;;  %s1675_s24 = smov 120   ;;  %1263 = vmatprep.subr.bf16.mxu1 %v1963_v35  ;;  %s1676_s16 = smov 112   ;;  %vm1014_vm4 = vcmask 130048   ;;  %vm1034_vm5 = vcmask 257024  }
  0x7c   : > { %vm298_vm1 = vcmp.lt.s32.totalorder %v297_v7, 20  ;;  %1264 = vmatpush3.bf16.msra.mxu1 %v1963_v35  ;;  %v430_v37 = vsel %vm428_vm3, %v1965_v36, 0  ;;  %s1677_s20 = smov 104   ;;  %s1678_s5 = smov 8  }
  0x7d   : > { %v1951_v9 = vsel %vm298_vm1, 0.0, %v1674_v8  ;;  %1321 = vmatprep.subr.msk.bf16.mxu1 %vm428_vm3, %v1965_v36  ;;  %s1679_s7 = smov 16   ;;  %s1680_s30 = smov 24  }
  0x7e   : > { %s283_s6 = scalar_lea.vmem [#allocation8], %s1917_s10  ;;  %s1338_s26 = smul.u32 192, %s1659_s15 }
  0x7f   : > { %s1054_s8 = sshll.u32 %s283_s6, 4  ;;  %s1039_s29 = scalar_lea.sflag [#allocation4], %s1914_s21  ;;  %s2099_s8 = int_to_ptr.vmem [resolvable:$true] %s1054_s8 }
  0x80   : > { %1266 = vmatpush3.bf16.msra.mxu1 %v430_v37  ;;  %s2106_s15 = scalar_lea.hbm %s2160_s3, %s1338_s26  ;;  %s1581_s23 = scalar_lea.vmem %s2099_s8, 192 }
  0x81   : > { %p1582_p0 = scmp.ne.s32.totalorder %s2099_s8, %s1581_s23  ;;  %p2189_p10 = scmp.ne.s32.totalorder %s2175_s25, 0 }
  0x82   : > { %1258 = vmatpush3.bf16.xpose.msra.mxu0 %v327_v4  ;;  %s1681_s10 = smov [#allocation8]  }
  0x83   : > { %p1583_p8 = pnand %p1582_p0, %p2189_p10  ;;  %s1585_s4 = sshll.u32 %s1681_s10, 4  ;;  %s1586_s4 = int_to_ptr.vmem [resolvable:$false] %s1585_s4 }
  0x84   : > { %s1587_s22 = scalar_lea.vmem %s1586_s4, 384  ;;  %p1588_p12 = scmp.lt.s32.totalorder %s2099_s8, %s1586_s4 }
  0x85   : > { %p1584_p9 = pneg %p1583_p8  ;;  %p1589_p1 = scmp.lt.s32.totalorder %s1587_s22, %s1581_s23 }
  0x87   : > { %p1590_p6 = por %p1589_p1, %p1588_p12 }
  0x89   : > { %1260 = vmatmul.mubr.msk.bf16.vlgmr.msra.gmra.mrb[0].mxu0 %vm316_vm0, %v1947_v5  ;;  %p1591_p13 = pnand %p1590_p6, %p1584_p9 }
 0x15c   : > { %v1261_v10 = vpop.f32.mrb[0].mxu0 }
 0x15d   : > { %v372_v11 = vadd.f32 %v1261_v10, %v1951_v9  ;;  %v363_v12 = vpop.f32.mrb[1].mxu0 }
 0x15e   : > { %v364_v13 = vadd.f32 %v363_v12, %v1951_v9  ;;  %v1262_v14 = vpop.f32.mrb[2].mxu0 }
 0x15f   : > { %v366_v15 = vpop.f32.mrb[3].mxu0  ;;  %v384_v16 = vsel %vm377_vm2, %v372_v11, -inf }
 0x160   : > { %v367_v17 = vadd.f32 %v366_v15, %v1951_v9  ;;  %385 = vmax.xlane.f32.xlu1 %v384_v16  ;;  %v378_v18 = vsel %vm377_vm2, %v364_v13, -inf }
 0x161   : > { %379 = vmax.xlane.f32.xlu0 %v378_v18 }
 0x162   : > { %v381_v19 = vsel %vm377_vm2, %v367_v17, -inf }
 0x165   : > { %382 = vmax.xlane.f32.xlu0 %v381_v19 }
 0x1ed   : > { %v386_v20 = vpop.xlane.xlu1 %385 }
 0x1ee   : > { %v389_v21 = vsub.f32 %v372_v11, %v386_v20  ;;  %v380_v22 = vpop.xlane.xlu0 %379 }
 0x1ef   : > { %v387_v23 = vsub.f32 %v364_v13, %v380_v22 }
 0x1f0   : > { %v394_v24 = vmul.f32 1.442695, %v389_v21 }
 0x1f1   : > { %v390_v25 = vmul.f32 1.442695, %v387_v23 }
 0x1f2   : > { %v383_v26 = vpop.xlane.xlu0 %382 }
 0x1f3   : > { %1443 = vpow2.f32 %v390_v25  ;;  %v388_v27 = vsub.f32 %v367_v17, %v383_v26 }
 0x1f4   : > { %1445 = vpow2.f32 %v394_v24 }
 0x1f5   : > { %v392_v28 = vmul.f32 1.442695, %v388_v27 }
 0x1f7   : > { %1447 = vpow2.f32 %v392_v28 }
 0x1fd   : > { %v1444_v29 = vpop.eup %1443 }
 0x1fe   : > { %v396_v30 = vsel %vm377_vm2, %v1444_v29, 0.0  ;;  %v1446_v31 = vpop.eup %1445 }
 0x1ff   : > { %397 = vadd.xlane.f32.xlu1 %v396_v30  ;;  %v402_v33 = vsel %vm377_vm2, %v1446_v31, 0.0 }
 0x201   : > { %v1448_v32 = vpop.eup %1447 }
 0x202   : > { %v399_v34 = vsel %vm377_vm2, %v1448_v32, 0.0 }
 0x203   : > { %403 = vadd.xlane.f32.xlu1 %v402_v33  ;;  %400 = vadd.xlane.f32.xlu0 %v399_v34 }
 0x214   : > { %486 = vrot.lane.b32.xlu1 %v1933_v1, %s1675_s24 }
 0x218   : > { %480 = vrot.lane.b32.xlu1 %v1939_v3, %s1675_s24 }
 0x219   : > { %484 = vrot.lane.b32.xlu0 %v1931_v0, %s1675_s24 }
 0x21c   : > { %482 = vrot.lane.b32.xlu1 %v1947_v5, %s1675_s24 }
 0x28c   : > { %v398_v38 = vpop.xlane.xlu1 %397 }
 0x28d   : > { %1449 = vrcp.f32 %v398_v38 }
 0x290   : > { %v404_v39 = vpop.xlane.xlu1 %403  ;;  %v401_v40 = vpop.xlane.xlu0 %400 }
 0x291   : > { %1451 = vrcp.f32 %v404_v39 }
 0x292   : > { %1453 = vrcp.f32 %v401_v40 }
 0x294   : > { %v485_v41 = vpop.permute.xlu0 %484  ;;  %v487_v43 = vpop.permute.xlu1 %486 }
 0x295   : > { %1322 = vmatprep.subr.msk.bf16.mxu1 %vm316_vm0, %v485_v41  ;;  %v495_v51 = vsel %vm316_vm0, %v485_v41, 0  ;;  %v498_v53 = vsel %vm316_vm0, %v487_v43, 0 }
 0x297   : > { %v1450_v42 = vpop.eup %1449 }
 0x298   : > { %v408_v47 = vmul.f32 %v1450_v42, %v1444_v29  ;;  %v481_v52 = vpop.permute.xlu1 %480 }
 0x29b   : > { %v1452_v44 = vpop.eup %1451 }
 0x29c   : > { %v1454_v45 = vpop.eup %1453  ;;  %v410_v46 = vmul.f32 %v1452_v44, %v1446_v31  ;;  %v483_v54 = vpop.permute.xlu1 %482 }
 0x29d   : > { %v409_v48 = vmul.f32 %v1454_v45, %v1448_v32 }
 0x29e   : > { %v412_v49 = vpack.c.bf16 %v410_v46, %v410_v46 }
 0x29f   : > { %v411_v50 = vpack.c.bf16 %v409_v48, %v408_v47 }
 0x2a1   : > { %1267 = vmatprep.mubr.msk.bf16.mxu1 %vm377_vm2, %v411_v50 }
 0x2a2   : > { %1268 = vmatmul.mubr.msk.bf16.vlgmr.msra.gmra.mrb[0].mxu1 %vm377_vm2, %v412_v49 }
 0x2a3   : > { %1272 = vmatpush3.bf16.xpose.msra.mxu1 %v495_v51  ;;  %1275 = vmatprep.mubr.msk.bf16.mxu1 %vm316_vm0, %v481_v52 }
 0x2a4   : > { %1323 = vmatprep.subr.msk.bf16.mxu1 %vm316_vm0, %v487_v43 }
 0x2ab   : > { %1274 = vmatpush3.bf16.xpose.msra.mxu1 %v498_v53 }
 0x2b2   : > { %1276 = vmatmul.mubr.msk.bf16.vlgmr.msra.gmra.mrb[4].mxu1 %vm316_vm0, %v483_v54 }
 0x375   : > { %v1989_v55 = vpop.f32.mrb[0].mxu1 }
 0x376   : > { %v1991_v56 = vpop.f32.mrb[1].mxu1 }
 0x377   : > { %v1270_v57 = vpop.f32.mrb[2].mxu1 }
 0x378   : > { %v1993_v58 = vpop.f32.mrb[3].mxu1 }
 0x385   : > { %v1277_v59 = vpop.f32.mrb[4].mxu1 }
 0x386   : > { %v534_v60 = vpop.f32.mrb[5].mxu1  ;;  %v543_v2 = vadd.f32 %v1277_v59, %v1951_v9 }
 0x387   : > { %v535_v61 = vadd.f32 %v534_v60, %v1951_v9  ;;  %v1278_v62 = vpop.f32.mrb[6].mxu1 }
 0x388   : > { %v537_v63 = vpop.f32.mrb[7].mxu1  ;;  %v554_v8 = vsel %vm377_vm2, %v543_v2, -inf }
 0x389   : > { %v538_v4 = vadd.f32 %v537_v63, %v1951_v9  ;;  %v548_v6 = vsel %vm377_vm2, %v535_v61, -inf }
 0x38a   : > { %549 = vmax.xlane.f32.xlu0 %v548_v6 }
 0x38b   : > { %v551_v7 = vsel %vm377_vm2, %v538_v4, -inf }
 0x38c   : > { %552 = vmax.xlane.f32.xlu1 %v551_v7 }
 0x38e   : > { %555 = vmax.xlane.f32.xlu0 %v554_v8 }
 0x417   : > { %v550_v10 = vpop.xlane.xlu0 %549 }
 0x418   : > { %v557_v11 = vsub.f32 %v535_v61, %v550_v10 }
 0x419   : > { %v553_v12 = vpop.xlane.xlu1 %552 }
 0x41a   : > { %v560_v13 = vmul.f32 1.442695, %v557_v11  ;;  %v558_v14 = vsub.f32 %v538_v4, %v553_v12 }
 0x41b   : > { %v556_v15 = vpop.xlane.xlu0 %555 }
 0x41c   : > { %1455 = vpow2.f32 %v560_v13  ;;  %v562_v16 = vmul.f32 1.442695, %v558_v14  ;;  %v559_v17 = vsub.f32 %v543_v2, %v556_v15 }
 0x41e   : > { %1457 = vpow2.f32 %v562_v16  ;;  %v564_v18 = vmul.f32 1.442695, %v559_v17 }
 0x420   : > { %1459 = vpow2.f32 %v564_v18 }
 0x426   : > { %v1456_v19 = vpop.eup %1455 }
 0x427   : > { %v566_v20 = vsel %vm377_vm2, %v1456_v19, 0.0 }
 0x428   : > { %v1458_v21 = vpop.eup %1457  ;;  %567 = vadd.xlane.f32.xlu0 %v566_v20 }
 0x429   : > { %v569_v23 = vsel %vm377_vm2, %v1458_v21, 0.0 }
 0x42a   : > { %v1460_v22 = vpop.eup %1459 }
 0x42b   : > { %v572_v24 = vsel %vm377_vm2, %v1460_v22, 0.0 }
 0x42c   : > { %570 = vadd.xlane.f32.xlu0 %v569_v23  ;;  %573 = vadd.xlane.f32.xlu1 %v572_v24 }
 0x43d   : > { %585 = vrot.lane.b32.xlu1 %v1965_v36, %s1675_s24 }
 0x441   : > { %649 = vrot.lane.b32.xlu1 %v1931_v0, %s1676_s16 }
 0x442   : > { %583 = vrot.lane.b32.xlu0 %v1963_v35, %s1675_s24 }
 0x445   : > { %651 = vrot.lane.b32.xlu1 %v1933_v1, %s1676_s16 }
 0x446   : > { %645 = vrot.lane.b32.xlu0 %v1939_v3, %s1676_s16 }
 0x449   : > { %647 = vrot.lane.b32.xlu1 %v1947_v5, %s1676_s16 }
 0x4b5   : > { %v568_v25 = vpop.xlane.xlu0 %567 }
 0x4b6   : > { %1461 = vrcp.f32 %v568_v25 }
 0x4b9   : > { %v574_v26 = vpop.xlane.xlu1 %573  ;;  %v571_v27 = vpop.xlane.xlu0 %570 }
 0x4ba   : > { %1463 = vrcp.f32 %v574_v26 }
 0x4bb   : > { %1465 = vrcp.f32 %v571_v27 }
 0x4bd   : > { %v584_v28 = vpop.permute.xlu0 %583  ;;  %v586_v29 = vpop.permute.xlu1 %585 }
 0x4be   : > { %1279 = vmatprep.subr.bf16.mxu0 %v584_v28  ;;  %v595_v30 = vsel %vm428_vm3, %v586_v29, 0 }
 0x4bf   : > { %1280 = vmatpush3.bf16.msra.mxu0 %v584_v28 }
 0x4c0   : > { %1324 = vmatprep.subr.msk.bf16.mxu0 %vm428_vm3, %v586_v29  ;;  %v1462_v32 = vpop.eup %1461 }
 0x4c1   : > { %v650_v31 = vpop.permute.xlu1 %649  ;;  %v578_v38 = vmul.f32 %v1462_v32, %v1456_v19  ;;  %v646_v43 = vpop.permute.xlu0 %645 }
 0x4c2   : > { %v660_v42 = vsel %vm316_vm0, %v650_v31, 0 }
 0x4c3   : > { %1282 = vmatpush3.bf16.msra.mxu0 %v595_v30 }
 0x4c4   : > { %v1464_v33 = vpop.eup %1463  ;;  %1325 = vmatprep.subr.msk.bf16.mxu0 %vm316_vm0, %v650_v31 }
 0x4c5   : > { %v1466_v34 = vpop.eup %1465  ;;  %v580_v37 = vmul.f32 %v1464_v33, %v1460_v22  ;;  %v652_v44 = vpop.permute.xlu1 %651 }
 0x4c6   : > { %v579_v39 = vmul.f32 %v1466_v34, %v1458_v21  ;;  %v663_v45 = vsel %vm316_vm0, %v652_v44, 0 }
 0x4c7   : > { %v582_v40 = vpack.c.bf16 %v580_v37, %v580_v37 }
 0x4c8   : > { %v581_v41 = vpack.c.bf16 %v579_v39, %v578_v38 }
 0x4c9   : > { %v648_v46 = vpop.permute.xlu1 %647 }
 0x4ca   : > { %1283 = vmatprep.mubr.msk.bf16.mxu0 %vm377_vm2, %v581_v41 }
 0x4cb   : > { %1284 = vmatmul.mubr.msk.bf16.vlgmr.msra.gmra.mrb[4].mxu0 %vm377_vm2, %v582_v40 }
 0x4cc   : > { %1288 = vmatpush3.bf16.xpose.msra.mxu0 %v660_v42  ;;  %1291 = vmatprep.mubr.msk.bf16.mxu0 %vm316_vm0, %v646_v43 }
 0x4cd   : > { %1326 = vmatprep.subr.msk.bf16.mxu0 %vm316_vm0, %v652_v44 }
 0x4d4   : > { %1290 = vmatpush3.bf16.xpose.msra.mxu0 %v663_v45 }
 0x4db   : > { %1292 = vmatmul.mubr.msk.bf16.vlgmr.msra.gmra.mrb[8].mxu0 %vm316_vm0, %v648_v46 }
 0x59e   : > { %v2026_v47 = vpop.f32.mrb[4].mxu0 }
 0x59f   : > { %v2028_v48 = vpop.f32.mrb[5].mxu0 }
 0x5a0   : > { %v1286_v49 = vpop.f32.mrb[6].mxu0 }
 0x5a1   : > { %v2030_v50 = vpop.f32.mrb[7].mxu0 }
 0x5a2   : > { %v1422_v51 = vpack.i.bf16 %v2030_v50, %v2028_v48 }
 0x5ae   : > { %v1293_v52 = vpop.f32.mrb[8].mxu0 }
 0x5af   : > { %v699_v53 = vpop.f32.mrb[9].mxu0  ;;  %v708_v60 = vadd.f32 %v1293_v52, %v1951_v9 }
 0x5b0   : > { %v700_v54 = vadd.f32 %v699_v53, %v1951_v9  ;;  %v1294_v57 = vpop.f32.mrb[10].mxu0 }
 0x5b1   : > { %v702_v59 = vpop.f32.mrb[11].mxu0  ;;  %v719_v2 = vsel %vm377_vm2, %v708_v60, -inf }
 0x5b2   : > { %v703_v61 = vadd.f32 %v702_v59, %v1951_v9  ;;  %v713_v62 = vsel %vm377_vm2, %v700_v54, -inf }
 0x5b3   : > { %714 = vmax.xlane.f32.xlu0 %v713_v62 }
 0x5b4   : > { %v716_v63 = vsel %vm377_vm2, %v703_v61, -inf }
 0x5b5   : > { %717 = vmax.xlane.f32.xlu1 %v716_v63 }
 0x5b7   : > { %720 = vmax.xlane.f32.xlu0 %v719_v2 }
 0x640   : > { %v715_v4 = vpop.xlane.xlu0 %714 }
 0x641   : > { %v722_v6 = vsub.f32 %v700_v54, %v715_v4 }
 0x642   : > { %v718_v7 = vpop.xlane.xlu1 %717 }
 0x643   : > { %v725_v8 = vmul.f32 1.442695, %v722_v6  ;;  %v723_v10 = vsub.f32 %v703_v61, %v718_v7 }
 0x644   : > { %v721_v11 = vpop.xlane.xlu0 %720 }
 0x645   : > { %1467 = vpow2.f32 %v725_v8  ;;  %v727_v12 = vmul.f32 1.442695, %v723_v10  ;;  %v724_v13 = vsub.f32 %v708_v60, %v721_v11 }
 0x647   : > { %1469 = vpow2.f32 %v727_v12  ;;  %v729_v14 = vmul.f32 1.442695, %v724_v13 }
 0x649   : > { %1471 = vpow2.f32 %v729_v14 }
 0x64f   : > { %v1468_v15 = vpop.eup %1467 }
 0x650   : > { %v731_v16 = vsel %vm377_vm2, %v1468_v15, 0.0 }
 0x651   : > { %v1470_v17 = vpop.eup %1469  ;;  %732 = vadd.xlane.f32.xlu0 %v731_v16 }
 0x652   : > { %v734_v19 = vsel %vm377_vm2, %v1470_v17, 0.0 }
 0x653   : > { %v1472_v18 = vpop.eup %1471 }
 0x654   : > { %v737_v20 = vsel %vm377_vm2, %v1472_v18, 0.0 }
 0x655   : > { %735 = vadd.xlane.f32.xlu0 %v734_v19  ;;  %738 = vadd.xlane.f32.xlu1 %v737_v20 }
 0x666   : > { %750 = vrot.lane.b32.xlu1 %v1965_v36, %s1676_s16 }
 0x66a   : > { %814 = vrot.lane.b32.xlu1 %v1931_v0, %s1677_s20 }
 0x66b   : > { %748 = vrot.lane.b32.xlu0 %v1963_v35, %s1676_s16 }
 0x66e   : > { %816 = vrot.lane.b32.xlu1 %v1933_v1, %s1677_s20 }
 0x66f   : > { %810 = vrot.lane.b32.xlu0 %v1939_v3, %s1677_s20 }
 0x672   : > { %812 = vrot.lane.b32.xlu1 %v1947_v5, %s1677_s20 }
 0x6de   : > { %v733_v21 = vpop.xlane.xlu0 %732 }
 0x6df   : > { %1473 = vrcp.f32 %v733_v21 }
 0x6e2   : > { %v739_v22 = vpop.xlane.xlu1 %738  ;;  %v736_v23 = vpop.xlane.xlu0 %735 }
 0x6e3   : > { %1475 = vrcp.f32 %v739_v22 }
 0x6e4   : > { %1477 = vrcp.f32 %v736_v23 }
 0x6e6   : > { %v749_v24 = vpop.permute.xlu0 %748  ;;  %v751_v0 = vpop.permute.xlu1 %750 }
 0x6e7   : > { %1295 = vmatprep.subr.bf16.mxu1 %v749_v24  ;;  %v760_v25 = vsel %vm428_vm3, %v751_v0, 0 }
 0x6e8   : > { %1296 = vmatpush3.bf16.msra.mxu1 %v749_v24 }
 0x6e9   : > { %1327 = vmatprep.subr.msk.bf16.mxu1 %vm428_vm3, %v751_v0  ;;  %v1474_v26 = vpop.eup %1473 }
 0x6ea   : > { %v815_v1 = vpop.permute.xlu1 %814  ;;  %v743_v28 = vmul.f32 %v1474_v26, %v1468_v15  ;;  %v811_v33 = vpop.permute.xlu0 %810 }
 0x6eb   : > { %v825_v32 = vsel %vm316_vm0, %v815_v1, 0 }
 0x6ec   : > { %1298 = vmatpush3.bf16.msra.mxu1 %v760_v25 }
 0x6ed   : > { %v1476_v3 = vpop.eup %1475  ;;  %1328 = vmatprep.subr.msk.bf16.mxu1 %vm316_vm0, %v815_v1 }
 0x6ee   : > { %v1478_v5 = vpop.eup %1477  ;;  %v745_v27 = vmul.f32 %v1476_v3, %v1472_v18  ;;  %v817_v34 = vpop.permute.xlu1 %816 }
 0x6ef   : > { %v744_v29 = vmul.f32 %v1478_v5, %v1470_v17  ;;  %v828_v37 = vsel %vm316_vm0, %v817_v34, 0 }
 0x6f0   : > { %v747_v30 = vpack.c.bf16 %v745_v27, %v745_v27 }
 0x6f1   : > { %v746_v31 = vpack.c.bf16 %v744_v29, %v743_v28 }
 0x6f2   : > { %v813_v38 = vpop.permute.xlu1 %812 }
 0x6f3   : > { %1299 = vmatprep.mubr.msk.bf16.mxu1 %vm377_vm2, %v746_v31 }
 0x6f4   : > { %1300 = vmatmul.mubr.msk.bf16.vlgmr.msra.gmra.mrb[8].mxu1 %vm377_vm2, %v747_v30 }
 0x6f5   : > { %1304 = vmatpush3.bf16.xpose.msra.mxu1 %v825_v32  ;;  %1307 = vmatprep.mubr.msk.bf16.mxu1 %vm316_vm0, %v811_v33 }
 0x6f6   : > { %1329 = vmatprep.subr.msk.bf16.mxu1 %vm316_vm0, %v817_v34 }
 0x6fd   : > { %1306 = vmatpush3.bf16.xpose.msra.mxu1 %v828_v37 }
 0x704   : > { %1308 = vmatmul.mubr.msk.bf16.vlgmr.msra.gmra.mrb[12].mxu1 %vm316_vm0, %v813_v38 }
 0x7c7   : > { %v1301_v39 = vpop.f32.mrb[8].mxu1 }
 0x7c8   : > { %v796_v40 = vpop.f32.mrb[9].mxu1 }
 0x7c9   : > { %v1302_v41 = vpop.f32.mrb[10].mxu1 }
 0x7ca   : > { %v799_v42 = vpop.f32.mrb[11].mxu1 }
 0x7cb   : > { %v1427_v43 = vpack.i.bf16 %v799_v42, %v796_v40 }
 0x7d7   : > { %v1309_v44 = vpop.f32.mrb[12].mxu1 }
 0x7d8   : > { %v864_v45 = vpop.f32.mrb[13].mxu1  ;;  %v873_v53 = vadd.f32 %v1309_v44, %v1951_v9 }
 0x7d9   : > { %v865_v46 = vadd.f32 %v864_v45, %v1951_v9  ;;  %v1310_v49 = vpop.f32.mrb[14].mxu1 }
 0x7da   : > { %v867_v52 = vpop.f32.mrb[15].mxu1  ;;  %v884_v60 = vsel %vm377_vm2, %v873_v53, -inf }
 0x7db   : > { %v868_v54 = vadd.f32 %v867_v52, %v1951_v9  ;;  %v878_v57 = vsel %vm377_vm2, %v865_v46, -inf }
 0x7dc   : > { %879 = vmax.xlane.f32.xlu0 %v878_v57 }
 0x7dd   : > { %v881_v59 = vsel %vm377_vm2, %v868_v54, -inf }
 0x7de   : > { %882 = vmax.xlane.f32.xlu1 %v881_v59 }
 0x7e0   : > { %885 = vmax.xlane.f32.xlu0 %v884_v60 }
 0x869   : > { %v880_v61 = vpop.xlane.xlu0 %879 }
 0x86a   : > { %v887_v62 = vsub.f32 %v865_v46, %v880_v61 }
 0x86b   : > { %v883_v63 = vpop.xlane.xlu1 %882 }
 0x86c   : > { %v890_v2 = vmul.f32 1.442695, %v887_v62  ;;  %v888_v4 = vsub.f32 %v868_v54, %v883_v63 }
 0x86d   : > { %v886_v6 = vpop.xlane.xlu0 %885 }
 0x86e   : > { %1479 = vpow2.f32 %v890_v2  ;;  %v892_v7 = vmul.f32 1.442695, %v888_v4  ;;  %v889_v8 = vsub.f32 %v873_v53, %v886_v6 }
 0x870   : > { %1481 = vpow2.f32 %v892_v7  ;;  %v894_v9 = vmul.f32 1.442695, %v889_v8 }
 0x872   : > { %1483 = vpow2.f32 %v894_v9 }
 0x878   : > { %v1480_v10 = vpop.eup %1479 }
 0x879   : > { %v896_v11 = vsel %vm377_vm2, %v1480_v10, 0.0 }
 0x87a   : > { %v1482_v12 = vpop.eup %1481  ;;  %897 = vadd.xlane.f32.xlu0 %v896_v11 }
 0x87b   : > { %v899_v14 = vsel %vm377_vm2, %v1482_v12, 0.0 }
 0x87c   : > { %v1484_v13 = vpop.eup %1483 }
 0x87d   : > { %v902_v15 = vsel %vm377_vm2, %v1484_v13, 0.0 }
 0x87e   : > { %900 = vadd.xlane.f32.xlu0 %v899_v14  ;;  %903 = vadd.xlane.f32.xlu1 %v902_v15 }
 0x88f   : > { %915 = vrot.lane.b32.xlu1 %v1965_v36, %s1677_s20 }
 0x893   : > { %1423 = vrot.lane.b32.xlu1 %v1422_v51, %s1678_s5 }
 0x894   : > { %913 = vrot.lane.b32.xlu0 %v1963_v35, %s1677_s20 }
 0x897   : > { %982 = vrot.lane.b32.xlu1 %v2026_v47, %s1678_s5 }
 0x898   : > { %1428 = vrot.lane.b32.xlu0 %v1427_v43, %s1679_s7 }
 0x89b   : > { %994 = vrot.lane.b32.xlu1 %v1301_v39, %s1679_s7 }
 0x907   : > { %v898_v16 = vpop.xlane.xlu0 %897 }
 0x908   : > { %1485 = vrcp.f32 %v898_v16 }
 0x90b   : > { %v904_v17 = vpop.xlane.xlu1 %903  ;;  %v901_v18 = vpop.xlane.xlu0 %900 }
 0x90c   : > { %1487 = vrcp.f32 %v904_v17 }
 0x90d   : > { %1489 = vrcp.f32 %v901_v18 }
 0x90f   : > { %v914_v36 = vpop.permute.xlu0 %913  ;;  %v916_v19 = vpop.permute.xlu1 %915 }
 0x910   : > { %1311 = vmatprep.subr.bf16.mxu0 %v914_v36  ;;  %v925_v48 = vsel %vm428_vm3, %v916_v19, 0 }
 0x911   : > { %1312 = vmatpush3.bf16.msra.mxu0 %v914_v36 }
 0x912   : > { %1330 = vmatprep.subr.msk.bf16.mxu0 %vm428_vm3, %v916_v19  ;;  %v1486_v35 = vpop.eup %1485 }
 0x913   : > { %v908_v20 = vmul.f32 %v1486_v35, %v1480_v10  ;;  %v1424_v3 = vpop.permute.xlu1 %1423  ;;  %v1429_v31 = vpop.permute.xlu0 %1428 }
 0x914   : > { %v1426_v29 = vunpack.i.h.bf16 %v1424_v3  ;;  %v1425_v30 = vunpack.i.l.bf16 %v1424_v3  ;;  %v1431_v38 = vunpack.i.h.bf16 %v1429_v31  ;;  %v1430_v39 = vunpack.i.l.bf16 %v1429_v31 }
 0x915   : > { %1314 = vmatpush3.bf16.msra.mxu0 %v925_v48 }
 0x916   : > { %v1488_v47 = vpop.eup %1487  ;;  %v1012_v40 = vsel %vm316_vm0, %v1993_v58, %v1426_v29 }
 0x917   : > { %v1490_v50 = vpop.eup %1489  ;;  %v910_v51 = vmul.f32 %v1488_v47, %v1484_v13  ;;  %v983_v5 = vpop.permute.xlu1 %982  ;;  %v1016_v45 = vsel %vm1014_vm4, %v1012_v40, %v1431_v38 }
 0x918   : > { %v909_v21 = vmul.f32 %v1490_v50, %v1482_v12  ;;  %v1013_v28 = vsel %vm316_vm0, %v1989_v55, %v983_v5  ;;  %v1011_v55 = vsel %vm316_vm0, %v1991_v56, %v1425_v30 }
 0x919   : > { %v912_v22 = vpack.c.bf16 %v910_v51, %v910_v51  ;;  %v1015_v44 = vsel %vm1014_vm4, %v1011_v55, %v1430_v39 }
 0x91a   : > { %v911_v23 = vpack.c.bf16 %v909_v21, %v908_v20 }
 0x91b   : > { %v995_v27 = vpop.permute.xlu1 %994 }
 0x91c   : > { %1315 = vmatprep.mubr.msk.bf16.mxu0 %vm377_vm2, %v911_v23  ;;  %v1017_v32 = vsel %vm1014_vm4, %v1013_v28, %v995_v27 }
 0x91d   : > { %1316 = vmatmul.mubr.msk.bf16.vlgmr.msra.gmra.mrb[12].mxu0 %vm377_vm2, %v912_v22 }
 0x9f0   : > { %v1317_v24 = vpop.f32.mrb[12].mxu0 }
 0x9f1   : > { %1006 = vrot.lane.b32.xlu1 %v1317_v24, %s1680_s30  ;;  %v961_v0 = vpop.f32.mrb[13].mxu0 }
 0x9f2   : > { %v1318_v25 = vpop.f32.mrb[14].mxu0 }
 0x9f3   : > { %v964_v1 = vpop.f32.mrb[15].mxu0 }
 0x9f4   : > { %v1432_v26 = vpack.i.bf16 %v964_v1, %v961_v0 }
 0x9f6   : > { %1433 = vrot.lane.b32.xlu0 %v1432_v26, %s1680_s30 }
 0xa63   : > { %v1007_v33 = vpop.permute.xlu1 %1006 }
 0xa64   : > { %v1020_v34 = vsel %vm377_vm2, %v1017_v32, %v1007_v33 }
 0xa65   : > { %v1222_v37 = vpack.c.bf16 %v1020_v34, %v1020_v34 }
 0xa67   : > { %1037 = vst.msk [vmem:[%s283_s6 + $0x8] sm:$0xf] %vm1034_vm5, %v1222_v37 }
 0xa68   : > { %v1434_v41 = vpop.permute.xlu0 %1433 }
 0xa69   : > { %v1436_v42 = vunpack.i.h.bf16 %v1434_v41  ;;  %v1435_v43 = vunpack.i.l.bf16 %v1434_v41 }
 0xa6b   : > { %v1018_v56 = vsel %vm377_vm2, %v1015_v44, %v1435_v43  ;;  %v1019_v58 = vsel %vm377_vm2, %v1016_v45, %v1436_v42 }
 0xa6c   : > { %v1220_v46 = vpack.c.bf16 %v1018_v56, %v1018_v56  ;;  %v1221_v49 = vpack.c.bf16 %v1019_v58, %v1019_v58 }
 0xa6e   : > { %1035 = vst.msk [vmem:[%s283_s6] sm:$0xf] %vm1034_vm5, %v1220_v46  ;;  %1036 = vst.msk [vmem:[%s283_s6 + $0x4] sm:$0xf] %vm1034_vm5, %v1221_v49 }
 0xa6f   : > { %1594 = shalt.err (!%p1591_p13)
}
 0xa70   : > { %s1595_s11 = scalar_lea.hbm %s2106_s15, 192  ;;  %s1599_s18 = scalar_lea.hbm %s2160_s3, 384 }
 0xa71   : > { %p1596_p11 = scmp.ne.s32.totalorder %s2106_s15, %s1595_s11  ;;  %p1600_p7 = scmp.lt.u32.totalorder %s2106_s15, %s2160_s3 }
 0xa72   : > { %p1601_p4 = scmp.lt.u32.totalorder %s1599_s18, %s1595_s11  ;;  %p1603_p0 = scmp.lt.u32.totalorder %s1595_s11, %s2106_s15 }
 0xa73   : > { %p1597_p2 = pnand %p1596_p11, %p2189_p10 }
 0xa74   : > { %p1602_p3 = por %p1601_p4, %p1600_p7 }
 0xa75   : > { %p1598_p5 = pneg %p1597_p2 }
 0xa76   : > { %p1604_p8 = por %p1603_p0, %p1602_p3 }
 0xa78   : > { %p1605_p9 = pnand %p1604_p8, %p1598_p5 }
 0xa7a   : > { %1608 = shalt.err (!%p1605_p9)
}
 0xa7b   : > { %s1682_s20 = smov 64   ;;  %s1683_s5 = smov 4  }
 0xa7c   : > { %1345 = dma.vmem_to_hbm [thread:$0]  (%p2189_p10), %s2099_s8, 192, %s2106_s15, %s1039_s29, %s1682_s20, %s1682_s20, %s1683_s5  }
 0xa7d PF: > { %s1069_s7 = sand.u32 1, %s1647_s12   ;;  %p2190_p12 = scmp.ne.s32.totalorder %s2177_s27, 0 }
 0xa7e   : > { %p2191_p1 = scmp.ge.s32.totalorder %s1667_s17, 2  ;;  %s1070_s30 = scalar_lea.sflag [#allocation4], %s1069_s7 }
 0xa80   : > { %p1358_p6 = pnand %p2191_p1, %p2190_p12 }
 0xa82   : > { %1642 = dma.done.wait (!%p1358_p6), %s1070_s30, 192  }
 0xa83   : > { %1644 = vsyncadd (!%p1358_p6), %s1070_s30, 4294967104  ;;  %s22_s17 = sadd.s32 1, %s1667_s17   ;;  %s2192_s6 = sld [smem:[#allocation14_spill]] }
 0xa84   : > { %p19_p13 = scmp.ge.s32.totalorder %s22_s17, 4   ;;  %s2193_s15 = sld [smem:[#allocation12_spill]] }
 0xa85   : > { %s2194_s16 = sld [smem:[#allocation13_spill]]  ;;  %s2195_s12 = smov %s1651_s13 }
 0xa86   : > { %s2196_s13 = smov %s1655_s14  ;;  %21 = sbr.rel (!%p19_p13) target bundleno = 10 (0xa), region = 101 }
 0xa89   : > { %s2197_s14 = smov %s2192_s6 }
 0xa8d   :  { %1075 = vsyncpa [#allocation3], 1 }
 0xa8e   :  { %1077 = vsyncpa [#allocation3 + $0x1], 1 }
 0xa8f   :  { %1078 = vsyncpa [#allocation6], 1 }
 0xa90   :  { %1080 = vsyncpa [#allocation6 + $0x1], 1 }
 0xa91   :  { %1081 = vsyncpa [#allocation4], 1 }
 0xa92   :  { %1083 = vsyncpa [#allocation4 + $0x1], 1 }

// kernel: audio_encoder_forward.10
= control target key start
LH: loop header
LB: loop body
LE: loop exit
PB: predicated region body
PF: predicated region fallthrough
CT: control target
= control target key end

     0   :  { %s1827_s0 = inlined_call_operand.hbm [shape: bf16[2,24,32], index: 0, kind: input, shape index: {}]   ;;  %s1828_s1 = inlined_call_operand.hbm [shape: bf16[2,24,32], index: 1, kind: input, shape index: {}]   ;;  %s1829_s2 = inlined_call_operand.hbm [shape: bf16[2,24,32], index: 2, kind: input, shape index: {}]   ;;  %s1830_s3 = inlined_call_operand.hbm [shape: bf16[3,32,32], index: 3, kind: input, shape index: {}]   ;;  %s1831_s4 = inlined_call_operand.hbm [shape: f32[1,32], index: 4, kind: input, shape index: {}]   ;;  %s1832_s5 = inlined_call_operand.hbm [shape: f32[24,32], index: 5, kind: input, shape index: {}]   ;;  %s1833_s6 = inlined_call_operand.hbm [shape: f32[2,24,32], index: 6, kind: output, shape index: {}]  }
   0x1   :  { %1859 = sst [smem:[#allocation26_spill]] %s1828_s1 }
   0x2   :  { %1860 = sst [smem:[#allocation27_spill]] %s1830_s3 }
   0x3   :  { %1861 = sst [smem:[#allocation28_spill]] %s1833_s6 }
   0x4   :  { %11 = vsyncpa [#allocation3], 0 }
   0x5   :  { %13 = vsyncpa [#allocation3 + $0x1], 0 }
   0x6   :  { %14 = vsyncpa [#allocation6], 0 }
   0x7   :  { %16 = vsyncpa [#allocation6 + $0x1], 0 }
   0x8   :  { %17 = vsyncpa [#allocation9], 0 }
   0x9   :  { %18 = vsyncpa [#allocation12], 0 }
   0xa   :  { %19 = vsyncpa [#allocation4], 0 }
   0xb   :  { %21 = vsyncpa [#allocation4 + $0x1], 0  ;;  %s1433_s21 = smov 0   ;;  %s1435_s22 = smov 0  }
   0xc   :  { %s1437_s23 = smov 0   ;;  %s1439_s24 = smov 0  }
   0xd   :  { %s1441_s25 = smov 0   ;;  %s1443_s26 = smov 0  }
   0xe LB: > { %1862 = sst [smem:[#allocation19_spill]] %s1363_s21  ;;  %s1464_s27 = sadd.s32 4294967295, %s1383_s26   ;;  %s1383_s26 = sphi %s1443_s26, %s27_s26   ;;  %s1379_s25 = sphi %s1441_s25, %s1907_s25   ;;  %s1375_s24 = sphi %s1439_s24, %s1906_s24   ;;  %s1371_s23 = sphi %s1437_s23, %s1910_s23   ;;  %s1367_s22 = sphi %s1435_s22, %s1909_s22   ;;  %s1363_s21 = sphi %s1433_s21, %s1908_s21  }
   0xf   : > { %1863 = sst [smem:[#allocation20_spill]] %s1379_s25  ;;  %s908_s28 = sadd.s32 4294967294, %s1383_s26  }
  0x10   : > { %1864 = sst [smem:[#allocation21_spill]] %s1383_s26  ;;  %p55_p0 = scmp.ne.s32.totalorder %s1371_s23, %s1367_s22 }
  0x11   : > { %p56_p1 = scmp.eq.s32.totalorder %s1383_s26, 0  ;;  %p61_p2 = scmp.ne.s32.totalorder %s1367_s22, %s1363_s21 }
  0x12   : > { %p1834_p3 = scmp.eq.s32.totalorder %s1464_s27, 0  ;;  %p211_p4 = scmp.eq.s32.totalorder %s1464_s27, 1 }
  0x13   : > { %p1475_p5 = por %p56_p1, %p55_p0  ;;  %p217_p6 = scmp.eq.s32.totalorder %s908_s28, 1 }
  0x14   : > { %p1481_p7 = por %p1834_p3, %p61_p2  ;;  %p1485_p8 = por %p211_p4, %p55_p0 }
  0x15   : > { %p1489_p9 = por %p217_p6, %p61_p2  ;;  %p909_p10 = scmp.ge.s32.totalorder %s1383_s26, 1 }
  0x16   : > { %s1866_s7 = scalar_select %p1481_p7, 1, 0 }
  0x17   : > { %s1867_s8 = scalar_select %p1485_p8, 1, 0 }
  0x18   : > { %s1869_s9 = scalar_select %p1489_p9, 1, 0 }
  0x19   : > { %1868 = sst [smem:[#allocation22_spill]] %s1867_s8  ;;  %p224_p11 = scmp.lt.s32.totalorder %s1383_s26, 3 }
  0x1a   : > { %1870 = sst [smem:[#allocation23_spill]] %s1869_s9  ;;  %s1385_s11 = smov [#allocation8]  }
  0x1b   : > { %p1495_p12 = pnand %p909_p10, %p224_p11  ;;  %s236_s12 = sshll.u32 %s1385_s11, 4  ;;  %s1499_s12 = int_to_ptr.vmem [resolvable:$true] %s236_s12 }
  0x1c   : > { %s39_s14 = sadd.s32 1, %s1379_s25  ;;  %s1874_s3 = sld [smem:[#allocation27_spill]] }
  0x1d   : > { %s1871_s10 = scalar_select %p1495_p12, 1, 0 }
  0x1e   : > { %p1008_p13 = pneg %p1495_p12  ;;  %p1513_p4 = scmp.ge.s32.totalorder %s39_s14, 2 }
  0x20   : > { %p1507_p2 = pnand %p1008_p13, %p1834_p3 }
  0x22   : > { %s1872_s13 = scalar_select %p1507_p2, 1, 0 }
  0x23   : > { %s1115_s19 = scalar_lea.hbm %s1874_s3, 768  ;;  %p1525_p10 = pneg %p1507_p2 }
  0x24   : > { %p1116_p6 = scmp.ne.s32.totalorder %s1874_s3, %s1115_s19  ;;  %p1122_p0 = scmp.lt.u32.totalorder %s1115_s19, %s1874_s3 }
  0x25   : > { %s1875_s11 = scalar_select %p1525_p10, 1, 0 }
  0x26   : > { %p1118_p11 = pnand %p1525_p10, %p1116_p6 }
  0x28   : > { %p1119_p13 = pneg %p1118_p11 }
  0x2a   : > { %p1124_p3 = pnand %p1122_p0, %p1119_p13 }
  0x2c   : > { %1127 = shalt.err (!%p1124_p3)
}
  0x2d   : > { %s1128_s17 = scalar_lea.vmem %s1499_s12, 768  ;;  %p1136_p7 = scmp.lt.s32.totalorder %s1499_s12, %s1499_s12 }
  0x2e   : > { %p1129_p1 = scmp.ne.s32.totalorder %s1499_s12, %s1128_s17  ;;  %p1137_p12 = scmp.lt.s32.totalorder %s1128_s17, %s1128_s17 }
  0x30   : > { %p1131_p9 = pnand %p1129_p1, %p1525_p10  ;;  %p1138_p6 = por %p1137_p12, %p1136_p7 }
  0x32   : > { %p1132_p8 = pneg %p1131_p9 }
  0x34   : > { %p1139_p11 = pnand %p1138_p6, %p1132_p8 }
  0x36   : > { %1142 = shalt.err (!%p1139_p11)
}
  0x37   : > { %s1840_s18 = smov 64   ;;  %s1842_s29 = smov 4  }
  0x38   : > { %1011 = dma.hbm_to_vmem [thread:$0]  (!%p1507_p2), %s1874_s3, 768, %s1499_s12, [#allocation9], %s1840_s18, %s1840_s18, %s1842_s29  }
  0x39   : > { %s1912_s14 = smov (%p1513_p4, %s39_s14), 0  ;;  %s1877_s20 = sand.u32 1, %s1371_s23  }
  0x3a   : > { %1876 = sst [smem:[#allocation24_spill]] %s1912_s14  ;;  %s1555_s28 = smul.u32 12, %s1877_s20 }
  0x3b   : > { %p1878_p3 = scmp.lt.s32.totalorder %s1383_s26, 2  ;;  %s43_s9 = ssub.s32 %s1379_s25, %s1912_s14 }
  0x3c   : > { %s1568_s21 = smul.u32 192, %s1379_s25  ;;  %p46_p8 = scmp.eq.s32.totalorder %s43_s9, 0 }
  0x3d   : > { %p1561_p7 = pnand %p1878_p3, %p1475_p5  ;;  %s300_s12 = sand.u32 1, %s1383_s26  }
  0x3e   : > { %s1880_s16 = sadd.s32 1, %s1371_s23  ;;  %s1882_s1 = sld [smem:[#allocation26_spill]] }
  0x3f   : > { %s1879_s17 = scalar_select %p1561_p7, 1, 0 }
  0x40   : > { %s1574_s15 = scalar_select %p46_p8, %s1371_s23, %s1880_s16  }
  0x41   : > { %s304_s18 = scalar_lea.vmem [#allocation5], %s1555_s28  ;;  %s1388_s3 = smov [#allocation10]  }
  0x42   : > { %1881 = sst [smem:[#allocation25_spill]] %s1574_s15  ;;  %s313_s29 = sshll.u32 %s304_s18, 4  ;;  %s1583_s29 = int_to_ptr.vmem [resolvable:$true] %s313_s29 }
  0x43   : > { %s1585_s14 = sshll.u32 %s1388_s3, 4  ;;  %s1587_s9 = scalar_lea.sflag [#allocation6], %s300_s12  ;;  %s251_s14 = int_to_ptr.vmem [resolvable:$true] %s1585_s14 }
  0x44   : > { %s1580_s30 = scalar_lea.hbm %s1882_s1, %s1568_s21  ;;  %p1593_p9 = pneg %p1561_p7 }
  0x45   : > { %s1143_s16 = scalar_lea.hbm %s1580_s30, 192  ;;  %s1148_s25 = scalar_lea.hbm %s1882_s1, 384 }
  0x46   : > { %p1144_p5 = scmp.ne.s32.totalorder %s1580_s30, %s1143_s16  ;;  %p1149_p1 = scmp.lt.u32.totalorder %s1580_s30, %s1882_s1 }
  0x47   : > { %s1883_s19 = scalar_select %p1593_p9, 1, 0 }
  0x48   : > { %p1146_p12 = pnand %p1593_p9, %p1144_p5  ;;  %p1150_p4 = scmp.lt.u32.totalorder %s1148_s25, %s1143_s16 }
  0x49   : > { %p1152_p6 = scmp.lt.u32.totalorder %s1143_s16, %s1580_s30 }
  0x4a   : > { %p1147_p0 = pneg %p1146_p12  ;;  %p1151_p13 = por %p1150_p4, %p1149_p1 }
  0x4c   : > { %p1153_p11 = por %p1152_p6, %p1151_p13 }
  0x4e   : > { %p1154_p3 = pnand %p1153_p11, %p1147_p0 }
  0x50   : > { %1157 = shalt.err (!%p1154_p3)
}
  0x51   : > { %s1158_s12 = scalar_lea.vmem %s1583_s29, 192  ;;  %s1389_s20 = smov [#allocation5]  }
  0x52   : > { %p1159_p8 = scmp.ne.s32.totalorder %s1583_s29, %s1158_s12  ;;  %s1163_s18 = sshll.u32 %s1389_s20, 4  ;;  %s1164_s18 = int_to_ptr.vmem [resolvable:$false] %s1163_s18 }
  0x53   : > { %s1165_s15 = scalar_lea.vmem %s1164_s18, 384  ;;  %p1166_p2 = scmp.lt.s32.totalorder %s1583_s29, %s1164_s18 }
  0x54   : > { %p1161_p5 = pnand %p1159_p8, %p1593_p9  ;;  %p1167_p10 = scmp.lt.s32.totalorder %s1165_s15, %s1158_s12 }
  0x56   : > { %p1162_p12 = pneg %p1161_p5  ;;  %p1168_p1 = por %p1167_p10, %p1166_p2 }
  0x58   : > { %p1169_p4 = pnand %p1168_p1, %p1162_p12 }
  0x5a   : > { %1172 = shalt.err (!%p1169_p4)
}
  0x5b   : > { %s1884_s25 = smov 4   ;;  %s1885_s16 = smov 64  }
  0x5c   : > { %1024 = dma.hbm_to_vmem [thread:$0]  (!%p1561_p7), %s1580_s30, 192, %s1583_s29, %s1587_s9, %s1885_s16, %s1885_s16, %s1884_s25  }
  0x5d   : > { %s1173_s18 = scalar_lea.hbm %s1831_s4, 16  ;;  %p1886_p10 = scmp.ne.s32.totalorder %s1875_s11, 0 }
  0x5e   : > { %p1174_p2 = scmp.ne.s32.totalorder %s1831_s4, %s1173_s18  ;;  %p1180_p6 = scmp.lt.u32.totalorder %s1173_s18, %s1831_s4 }
  0x60   : > { %p1176_p0 = pnand %p1174_p2, %p1886_p10 }
  0x62   : > { %p1177_p13 = pneg %p1176_p0 }
  0x64   : > { %p1182_p11 = pnand %p1180_p6, %p1177_p13 }
  0x66   : > { %1185 = shalt.err (!%p1182_p11)
}
  0x67   : > { %s1186_s6 = scalar_lea.vmem %s251_s14, 16  ;;  %s1193_s29 = scalar_lea.vmem %s251_s14, 32 }
  0x68   : > { %p1187_p3 = scmp.ne.s32.totalorder %s251_s14, %s1186_s6  ;;  %p1194_p12 = scmp.lt.s32.totalorder %s251_s14, %s251_s14 }
  0x69   : > { %p1195_p1 = scmp.lt.s32.totalorder %s1193_s29, %s1186_s6 }
  0x6a   : > { %p1189_p8 = pnand %p1187_p3, %p1886_p10 }
  0x6b   : > { %p1196_p4 = por %p1195_p1, %p1194_p12 }
  0x6c   : > { %p1190_p5 = pneg %p1189_p8 }
  0x6e   : > { %p1197_p7 = pnand %p1196_p4, %p1190_p5 }
  0x70   : > { %1200 = shalt.err (!%p1197_p7)
}
  0x71   : > { %p1887_p2 = scmp.ne.s32.totalorder %s1872_s13, 0  ;;  %s1390_s1 = smov [#allocation11]  }
  0x72   : > { %s263_s26 = sshll.u32 %s1390_s1, 4  ;;  %s1201_s12 = scalar_lea.hbm %s1832_s5, 384  ;;  %s264_s26 = int_to_ptr.vmem [resolvable:$true] %s263_s26 }
  0x73   : > { %1014 = dma.hbm_to_vmem [thread:$0]  (!%p1887_p2), %s1831_s4, 16, %s251_s14, [#allocation9]  }
  0x74   : > { %p1202_p0 = scmp.ne.s32.totalorder %s1832_s5, %s1201_s12  ;;  %p1208_p6 = scmp.lt.u32.totalorder %s1201_s12, %s1832_s5 }
  0x76   : > { %p1204_p7 = pnand %p1202_p0, %p1886_p10 }
  0x78   : > { %p1205_p13 = pneg %p1204_p7 }
  0x7a   : > { %p1210_p11 = pnand %p1208_p6, %p1205_p13 }
  0x7c   : > { %1213 = shalt.err (!%p1210_p11)
}
  0x7d   : > { %s1214_s14 = scalar_lea.vmem %s264_s26, 384  ;;  %p1222_p12 = scmp.lt.s32.totalorder %s264_s26, %s264_s26 }
  0x7e   : > { %p1215_p3 = scmp.ne.s32.totalorder %s264_s26, %s1214_s14  ;;  %p1223_p1 = scmp.lt.s32.totalorder %s1214_s14, %s1214_s14 }
  0x80   : > { %p1217_p8 = pnand %p1215_p3, %p1886_p10  ;;  %p1224_p4 = por %p1223_p1, %p1222_p12 }
  0x82   : > { %p1218_p5 = pneg %p1217_p8 }
  0x84   : > { %p1225_p9 = pnand %p1224_p4, %p1218_p5 }
  0x86   : > { %1228 = shalt.err (!%p1225_p9)
}
  0x87   : > { %s1391_s8 = smov 128   ;;  %s1392_s30 = smov 8  }
  0x88   : > { %1017 = dma.hbm_to_vmem [thread:$0]  (!%p1887_p2), %s1832_s5, 384, %s264_s26, [#allocation12], %s1391_s8, %s1391_s8, %s1392_s30  }
  0x89   : > { %s1661_s18 = scalar_lea.hbm %s1827_s0, %s1568_s21  ;;  %s281_s12 = scalar_lea.vmem [#allocation2], %s1555_s28 }
  0x8a   : > { %s290_s15 = sshll.u32 %s281_s12, 4  ;;  %s1888_s6 = sand.u32 1, %s1371_s23   ;;  %s1664_s15 = int_to_ptr.vmem [resolvable:$true] %s290_s15 }
  0x8b   : > { %s1668_s29 = scalar_lea.sflag [#allocation3], %s1888_s6  ;;  %s1229_s13 = scalar_lea.hbm %s1661_s18, 192 }
  0x8c   : > { %p1230_p9 = scmp.ne.s32.totalorder %s1661_s18, %s1229_s13  ;;  %p1889_p10 = scmp.ne.s32.totalorder %s1883_s19, 0 }
  0x8d   : > { %s1234_s8 = scalar_lea.hbm %s1827_s0, 384  ;;  %p1235_p7 = scmp.lt.u32.totalorder %s1661_s18, %s1827_s0 }
  0x8e   : > { %p1232_p2 = pnand %p1230_p9, %p1889_p10  ;;  %p1236_p13 = scmp.lt.u32.totalorder %s1234_s8, %s1229_s13 }
  0x8f   : > { %p1238_p11 = scmp.lt.u32.totalorder %s1229_s13, %s1661_s18 }
  0x90   : > { %p1233_p0 = pneg %p1232_p2  ;;  %p1237_p6 = por %p1236_p13, %p1235_p7 }
  0x92   : > { %p1239_p3 = por %p1238_p11, %p1237_p6 }
  0x94   : > { %p1240_p8 = pnand %p1239_p3, %p1233_p0 }
  0x96   : > { %1243 = shalt.err (!%p1240_p8)
}
  0x97   : > { %s1244_s1 = scalar_lea.vmem %s1664_s15, 192  ;;  %s1393_s11 = smov [#allocation2]  }
  0x98   : > { %p1245_p5 = scmp.ne.s32.totalorder %s1664_s15, %s1244_s1  ;;  %s1249_s20 = sshll.u32 %s1393_s11, 4  ;;  %s1250_s20 = int_to_ptr.vmem [resolvable:$false] %s1249_s20 }
  0x99   : > { %s1251_s12 = scalar_lea.vmem %s1250_s20, 384  ;;  %p1252_p4 = scmp.lt.s32.totalorder %s1664_s15, %s1250_s20 }
  0x9a   : > { %p1247_p12 = pnand %p1245_p5, %p1889_p10  ;;  %p1253_p9 = scmp.lt.s32.totalorder %s1251_s12, %s1244_s1 }
  0x9c   : > { %p1248_p1 = pneg %p1247_p12  ;;  %p1254_p2 = por %p1253_p9, %p1252_p4 }
  0x9e   : > { %p1255_p7 = pnand %p1254_p2, %p1248_p1 }
  0xa0   : > { %1258 = shalt.err (!%p1255_p7)
}
  0xa1   : > { %p1890_p0 = scmp.ne.s32.totalorder %s1879_s17, 0  ;;  %s1699_s26 = scalar_lea.hbm %s1829_s2, %s1568_s21 }
  0xa2   : > { %s327_s14 = scalar_lea.vmem [#allocation7], %s1555_s28  ;;  %s1259_s30 = scalar_lea.hbm %s1699_s26, 192 }
  0xa3   : > { %1021 = dma.hbm_to_vmem [thread:$0]  (!%p1890_p0), %s1661_s18, 192, %s1664_s15, %s1668_s29, %s1885_s16, %s1885_s16, %s1884_s25  }
  0xa4   : > { %s336_s8 = sshll.u32 %s327_s14, 4  ;;  %p1260_p13 = scmp.ne.s32.totalorder %s1699_s26, %s1259_s30  ;;  %s1702_s8 = int_to_ptr.vmem [resolvable:$true] %s336_s8 }
  0xa5   : > { %s1264_s15 = scalar_lea.hbm %s1829_s2, 384  ;;  %p1265_p3 = scmp.lt.u32.totalorder %s1699_s26, %s1829_s2 }
  0xa6   : > { %p1262_p6 = pnand %p1260_p13, %p1889_p10  ;;  %p1266_p8 = scmp.lt.u32.totalorder %s1264_s15, %s1259_s30 }
  0xa7   : > { %p1268_p12 = scmp.lt.u32.totalorder %s1259_s30, %s1699_s26 }
  0xa8   : > { %p1263_p11 = pneg %p1262_p6  ;;  %p1267_p5 = por %p1266_p8, %p1265_p3 }
  0xaa   : > { %p1269_p1 = por %p1268_p12, %p1267_p5 }
  0xac   : > { %p1270_p4 = pnand %p1269_p1, %p1263_p11 }
  0xae   : > { %1273 = shalt.err (!%p1270_p4)
}
  0xaf   : > { %s1274_s28 = scalar_lea.vmem %s1702_s8, 192  ;;  %s1394_s1 = smov [#allocation7]  }
  0xb0   : > { %p1275_p9 = scmp.ne.s32.totalorder %s1702_s8, %s1274_s28  ;;  %s1279_s11 = sshll.u32 %s1394_s1, 4  ;;  %s1280_s11 = int_to_ptr.vmem [resolvable:$false] %s1279_s11 }
  0xb1   : > { %s1281_s20 = scalar_lea.vmem %s1280_s11, 384  ;;  %p1282_p13 = scmp.lt.s32.totalorder %s1702_s8, %s1280_s11 }
  0xb2   : > { %p1277_p2 = pnand %p1275_p9, %p1889_p10  ;;  %p1283_p6 = scmp.lt.s32.totalorder %s1281_s20, %s1274_s28 }
  0xb4   : > { %p1278_p7 = pneg %p1277_p2  ;;  %p1284_p3 = por %p1283_p6, %p1282_p13 }
  0xb6   : > { %p1285_p8 = pnand %p1284_p3, %p1278_p7 }
  0xb8   : > { %1288 = shalt.err (!%p1285_p8)
}
  0xb9   : > { %1027 = dma.hbm_to_vmem [thread:$0]  (!%p1890_p0), %s1699_s26, 192, %s1702_s8, %s1587_s9, %s1885_s16, %s1885_s16, %s1884_s25  }
  0xba   : > { %p1891_p10 = scmp.ne.s32.totalorder %s1871_s10, 0 }
  0xbb   : > { %s1732_s19 = sand.u32 (!%p1891_p10), 1, %s1367_s22   ;;  %p1892_p11 = scmp.ne.s32.totalorder (!%p1891_p10), %s1866_s7, 0 }
  0xbc   : > { %348 = sbr.rel (%p1891_p10) target bundleno = 485 (0x1e5), region = 44  ;;  %s351_s17 = scalar_lea.sflag (!%p1891_p10), [#allocation3], %s1732_s19 }
  0xbd   : > { %s1735_s12 = smul.u32 (!%p1891_p10), 12, %s1732_s19 }
  0xbf   : > { %s354_s6 = scalar_lea.vmem (!%p1891_p10), [#allocation2], %s1735_s12 }
  0xc3   : > { %1342 = dma.done.wait (%p1892_p11), %s351_s17, 192  }
  0xc4   : > { %1344 = vsyncadd (%p1892_p11), %s351_s17, 4294967104  ;;  %s359_s10 = sand.u32 1, %s1464_s27   ;;  %s363_s25 = scalar_lea.vmem [#allocation5], %s1735_s12 }
  0xc5   : > { %s360_s9 = scalar_lea.sflag [#allocation6], %s359_s10 }
  0xc6   : > { %1346 = dma.done.wait (%p1892_p11), %s360_s9, 384  }
  0xc7   : > { %1348 = vsyncadd (%p1892_p11), %s360_s9, 4294966912  ;;  %s372_s16 = scalar_lea.vmem [#allocation7], %s1735_s12  ;;  %p1893_p0 = scmp.eq.s32.totalorder %s1464_s27, 0 }
  0xc9   : > { %1350 = dma.done.wait (%p1893_p0), [#allocation9], 784   ;;  %p1894_p5 = pmov %p1893_p0 }
  0xca   : > { %p1895_p12 = pmov %p1893_p0 }
  0xcb   : > { %1352 = vsyncadd (%p1894_p5), [#allocation9], 4294966512 }
  0xcc   : > { %1354 = dma.done.wait (%p1895_p12), [#allocation12], 384   ;;  %p1896_p1 = pmov %p1893_p0 }
  0xcd   : > { %v1097_v0 = vld [vmem:[#allocation8 + $0x10] sm:$0xff]   ;;  %v1098_v1 = vld [vmem:[#allocation8] sm:$0xff]   ;;  %v1099_v2 = vld [vmem:[#allocation8 + $0x18] sm:$0xff]   ;;  %vm464_vm0 = vcmask 261120   ;;  %s986_s27 = smul.u32 24, %s1732_s19  ;;  %s1897_s13 = sld [smem:[#allocation22_spill]] }
  0xce   : > { %1356 = vsyncadd (%p1896_p1), [#allocation12], 4294966912  ;;  %955 = vmatprep.subr.bf16.mxu0 %v1097_v0  ;;  %963 = vmatprep.subr.bf16.mxu1 %v1098_v1  ;;  %v1100_v3 = vld [vmem:[#allocation8 + $0x8] sm:$0xff]   ;;  %v1101_v4 = vld [vmem:[%s363_s25] sm:$0xff]   ;;  %s987_s7 = smul.u32 384, %s1375_s24  ;;  %s1898_s3 = sld [smem:[#allocation28_spill]] }
  0xcf   : > { %956 = vmatpush3.bf16.msra.mxu0 %v1097_v0  ;;  %964 = vmatpush3.bf16.msra.mxu1 %v1098_v1  ;;  %v1102_v5 = vld [vmem:[%s354_s6] sm:$0xff]   ;;  %v1104_v7 = vld [vmem:[%s354_s6 + $0x8] ss:$0 sps:$4 sm:$0xff]   ;;  %v1107_v10 = vld [vmem:[%s372_s16] sm:$0xff]   ;;  %s422_s26 = scalar_lea.vmem [#allocation13], %s986_s27  ;;  %s725_s24 = scalar_lea.sflag [#allocation4], %s1732_s19 }
  0xd0   : > { %957 = vmatprep.subr.bf16.mxu0 %v1099_v2  ;;  %965 = vmatprep.subr.bf16.mxu1 %v1100_v3  ;;  %v1103_v6 = vld [vmem:[%s363_s25 + $0x8] ss:$0 sps:$4 sm:$0xff]   ;;  %v1106_v9 = vld [vmem:[#allocation8 + $0x28] sm:$0xff]   ;;  %v1108_v11 = vld [vmem:[%s372_s16 + $0x8] ss:$0 sps:$4 sm:$0xff]   ;;  %s740_s14 = sshll.u32 %s422_s26, 4  ;;  %s1776_s14 = int_to_ptr.vmem [resolvable:$true] %s740_s14 }
  0xd1   : > { %959 = vmatprep.mubr.msk.bf16.mxu0 %vm464_vm0, %v1101_v4  ;;  %967 = vmatprep.mubr.msk.bf16.mxu1 %vm464_vm0, %v1102_v5  ;;  %v1105_v8 = vld [vmem:[#allocation8 + $0x20] sm:$0xff]   ;;  %v939_v24 = vld [vmem:[#allocation10] ss:$0 sm:$0xff]  ;;  %v715_v59 = vld [vmem:[#allocation11] sm:$0xff]  ;;  %s1289_s15 = scalar_lea.vmem %s1776_s14, 384  ;;  %s1395_s29 = smov [#allocation13]  }
  0xd2   : > { %v717_v55 = vld [vmem:[#allocation11 + $0x10] sm:$0xff]  ;;  %v716_v63 = vld [vmem:[#allocation11 + $0x8] sm:$0xff]  ;;  %p1290_p4 = scmp.ne.s32.totalorder %s1776_s14, %s1289_s15  ;;  %s1293_s21 = sshll.u32 %s1395_s29, 4  ;;  %s1294_s21 = int_to_ptr.vmem [resolvable:$false] %s1293_s21 }
  0xd3   : > { %958 = vmatpush3.bf16.msra.mxu0 %v1099_v2  ;;  %966 = vmatpush3.bf16.msra.mxu1 %v1100_v3  ;;  %p1899_p9 = scmp.ne.s32.totalorder %s1897_s13, 0  ;;  %s1295_s28 = scalar_lea.vmem %s1294_s21, 768 }
  0xd4   : > { %971 = vmatprep.subr.bf16.mxu0 %v1105_v8  ;;  %s1774_s18 = scalar_lea.hbm %s1898_s3, %s987_s7  ;;  %p1296_p13 = scmp.lt.s32.totalorder %s1776_s14, %s1294_s21 }
  0xd5   : > { %p1291_p2 = pnand %p1290_p4, %p1899_p9  ;;  %p1297_p6 = scmp.lt.s32.totalorder %s1295_s28, %s1289_s15 }
  0xd6   : > { %960 = vmatmul.mubr.msk.bf16.vlgmr.msra.gmra.mrb[0].mxu0 %vm464_vm0, %v1103_v6  ;;  %968 = vmatmul.mubr.msk.bf16.vlgmr.msra.gmra.mrb[0].mxu1 %vm464_vm0, %v1104_v7 }
  0xd7   : > { %972 = vmatpush3.bf16.msra.mxu0 %v1105_v8  ;;  %975 = vmatprep.mubr.msk.bf16.mxu0 %vm464_vm0, %v1107_v10  ;;  %p1292_p7 = pneg %p1291_p2  ;;  %p1298_p3 = por %p1297_p6, %p1296_p13 }
  0xd8   : > { %973 = vmatprep.subr.bf16.mxu0 %v1106_v9 }
  0xd9   : > { %p1299_p8 = pnand %p1298_p3, %p1292_p7 }
  0xdb   : > { %974 = vmatpush3.bf16.msra.mxu0 %v1106_v9 }
  0xde   : > { %976 = vmatmul.mubr.msk.bf16.vlgmr.msra.gmra.mrb[4].mxu0 %vm464_vm0, %v1108_v11 }
 0x1a9   : > { %v961_v12 = vpop.f32.mrb[0].mxu0  ;;  %v969_v13 = vpop.f32.mrb[0].mxu1 }
 0x1aa   : > { %v505_v14 = vpop.f32.mrb[1].mxu0  ;;  %v588_v15 = vadd.f32 %v969_v13, %v961_v12  ;;  %v579_v16 = vpop.f32.mrb[1].mxu1 }
 0x1ab   : > { %v962_v17 = vpop.f32.mrb[2].mxu0  ;;  %v580_v18 = vadd.f32 %v579_v16, %v505_v14  ;;  %v970_v19 = vpop.f32.mrb[2].mxu1 }
 0x1ac   : > { %v508_v20 = vpop.f32.mrb[3].mxu0  ;;  %v582_v21 = vpop.f32.mrb[3].mxu1 }
 0x1ad   : > { %v583_v22 = vadd.f32 %v582_v21, %v508_v20 }
 0x1b1   : > { %v977_v23 = vpop.f32.mrb[4].mxu0 }
 0x1b2   : > { %v677_v25 = vadd.f32 %v977_v23, %v588_v15  ;;  %v661_v26 = vpop.f32.mrb[5].mxu0 }
 0x1b3   : > { %v675_v27 = vadd.f32 %v661_v26, %v580_v18  ;;  %v978_v28 = vpop.f32.mrb[6].mxu0 }
 0x1b4   : > { %v687_v29 = vadd.f32 %v939_v24, %v677_v25  ;;  %v664_v30 = vpop.f32.mrb[7].mxu0 }
 0x1b5   : > { %v685_v31 = vadd.f32 %v939_v24, %v675_v27  ;;  %v676_v32 = vadd.f32 %v664_v30, %v583_v22 }
 0x1b6   : > { %v690_v33 = vmul.f32 %v687_v29, %v687_v29 }
 0x1b7   : > { %v688_v34 = vmul.f32 %v685_v31, %v685_v31  ;;  %v686_v35 = vadd.f32 %v939_v24, %v676_v32 }
 0x1b8   : > { %v693_v36 = vmul.f32 %v690_v33, %v687_v29 }
 0x1b9   : > { %v691_v37 = vmul.f32 %v688_v34, %v685_v31  ;;  %v689_v38 = vmul.f32 %v686_v35, %v686_v35 }
 0x1ba   : > { %v696_v39 = vmul.f32 0.044715, %v693_v36 }
 0x1bb   : > { %v694_v40 = vmul.f32 0.044715, %v691_v37  ;;  %v692_v41 = vmul.f32 %v689_v38, %v686_v35 }
 0x1bc   : > { %v699_v42 = vadd.f32 %v696_v39, %v687_v29 }
 0x1bd   : > { %v697_v43 = vadd.f32 %v694_v40, %v685_v31  ;;  %v695_v44 = vmul.f32 0.044715, %v692_v41 }
 0x1be   : > { %v702_v45 = vmul.f32 0.7978846, %v699_v42 }
 0x1bf   : > { %v700_v46 = vmul.f32 0.7978846, %v697_v43  ;;  %v698_v47 = vadd.f32 %v695_v44, %v686_v35 }
 0x1c0   : > { %1109 = vtanh.f32 %v702_v45 }
 0x1c1   : > { %1111 = vtanh.f32 %v700_v46  ;;  %v701_v48 = vmul.f32 0.7978846, %v698_v47 }
 0x1c3   : > { %1113 = vtanh.f32 %v701_v48 }
 0x1ca   : > { %v1110_v49 = vpop.eup %1109 }
 0x1cb   : > { %v1112_v50 = vpop.eup %1111  ;;  %v708_v51 = vadd.f32 1.0, %v1110_v49 }
 0x1cc   : > { %v706_v52 = vadd.f32 1.0, %v1112_v50 }
 0x1cd   : > { %v1114_v53 = vpop.eup %1113  ;;  %v711_v54 = vmul.f32 0.5, %v708_v51 }
 0x1ce   : > { %v709_v56 = vmul.f32 0.5, %v706_v52  ;;  %v707_v57 = vadd.f32 1.0, %v1114_v53 }
 0x1cf   : > { %v714_v58 = vmul.f32 %v711_v54, %v687_v29 }
 0x1d0   : > { %v712_v60 = vmul.f32 %v709_v56, %v685_v31  ;;  %v710_v61 = vmul.f32 0.5, %v707_v57 }
 0x1d1   : > { %v720_v62 = vadd.f32 %v717_v55, %v714_v58 }
 0x1d2   : > { %v718_v0 = vadd.f32 %v715_v59, %v712_v60  ;;  %v713_v1 = vmul.f32 %v710_v61, %v686_v35 }
 0x1d3   : > { %723 = vst.msk [vmem:[%s422_s26 + $0x10] sm:$0xff] %vm464_vm0, %v720_v62 }
 0x1d4   : > { %v719_v2 = vadd.f32 %v716_v63, %v713_v1  ;;  %721 = vst.msk [vmem:[%s422_s26] sm:$0xff] %vm464_vm0, %v718_v0 }
 0x1d6   : > { %722 = vst.msk [vmem:[%s422_s26 + $0x8] sm:$0xff] %vm464_vm0, %v719_v2 }
 0x1d7   : > { %1302 = shalt.err (!%p1299_p8)
}
 0x1d8   : > { %s1303_s1 = scalar_lea.hbm %s1774_s18, 384  ;;  %s1307_s12 = scalar_lea.hbm %s1898_s3, 768 }
 0x1d9   : > { %p1304_p10 = scmp.ne.s32.totalorder %s1774_s18, %s1303_s1  ;;  %p1308_p5 = scmp.lt.u32.totalorder %s1774_s18, %s1898_s3 }
 0x1da   : > { %p1309_p12 = scmp.lt.u32.totalorder %s1307_s12, %s1303_s1  ;;  %p1311_p4 = scmp.lt.u32.totalorder %s1303_s1, %s1774_s18 }
 0x1db   : > { %p1305_p11 = pnand %p1304_p10, %p1899_p9 }
 0x1dc   : > { %p1310_p1 = por %p1309_p12, %p1308_p5 }
 0x1dd   : > { %p1306_p0 = pneg %p1305_p11 }
 0x1de   : > { %p1312_p2 = por %p1311_p4, %p1310_p1 }
 0x1e0   : > { %p1313_p7 = pnand %p1312_p2, %p1306_p0 }
 0x1e2   : > { %1316 = shalt.err (!%p1313_p7)
}
 0x1e3   : > { %s1396_s10 = smov 128   ;;  %s1397_s9 = smov 8  }
 0x1e4   : > { %1006 = dma.vmem_to_hbm [thread:$0]  (%p1899_p9), %s1776_s14, 384, %s1774_s18, %s725_s24, %s1396_s10, %s1396_s10, %s1397_s9  }
 0x1e5 PF: > { %s1900_s25 = sld [smem:[#allocation19_spill]]  ;;  %s1901_s16 = sld [smem:[#allocation23_spill]] }
 0x1e6   : > { %s1902_s27 = sld [smem:[#allocation21_spill]] }
 0x1eb   : > { %s755_s7 = sand.u32 1, %s1900_s25   ;;  %p1903_p13 = scmp.ne.s32.totalorder %s1901_s16, 0 }
 0x1ec   : > { %p1904_p6 = scmp.ge.s32.totalorder %s1902_s27, 2  ;;  %s756_s26 = scalar_lea.sflag [#allocation4], %s755_s7 }
 0x1ee   : > { %p1029_p3 = pnand %p1904_p6, %p1903_p13 }
 0x1f0   : > { %1358 = dma.done.wait (!%p1029_p3), %s756_s26, 384  }
 0x1f1   : > { %1360 = vsyncadd (!%p1029_p3), %s756_s26, 4294966912  ;;  %s27_s26 = sadd.s32 1, %s1902_s27   ;;  %s1905_s8 = sld [smem:[#allocation25_spill]] }
 0x1f2   : > { %p24_p8 = scmp.ge.s32.totalorder %s27_s26, 4   ;;  %s1906_s24 = sld [smem:[#allocation20_spill]] }
 0x1f3   : > { %s1907_s25 = sld [smem:[#allocation24_spill]]  ;;  %s1908_s21 = smov %s1367_s22 }
 0x1f4   : > { %s1909_s22 = smov %s1371_s23  ;;  %26 = sbr.rel (!%p24_p8) target bundleno = 14 (0xe), region = 128 }
 0x1f7   : > { %s1910_s23 = smov %s1905_s8 }
 0x1fb   :  { %761 = vsyncpa [#allocation3], 1 }
 0x1fc   :  { %763 = vsyncpa [#allocation3 + $0x1], 1 }
 0x1fd   :  { %764 = vsyncpa [#allocation6], 1 }
 0x1fe   :  { %766 = vsyncpa [#allocation6 + $0x1], 1 }
 0x1ff   :  { %767 = vsyncpa [#allocation9], 1 }
 0x200   :  { %768 = vsyncpa [#allocation12], 1 }
 0x201   :  { %769 = vsyncpa [#allocation4], 1 }
 0x202   :  { %771 = vsyncpa [#allocation4 + $0x1], 1 }

// kernel: audio_encoder_forward.17
= control target key start
LH: loop header
LB: loop body
LE: loop exit
PB: predicated region body
PF: predicated region fallthrough
CT: control target
= control target key end

     0   :  { %8 = vsyncpa [#allocation3], 0  ;;  %s999_s0 = inlined_call_operand.hbm [shape: f32[2,24,32], index: 0, kind: input, shape index: {}]   ;;  %s1000_s1 = inlined_call_operand.hbm [shape: f32[1,32], index: 1, kind: input, shape index: {}]   ;;  %s1001_s2 = inlined_call_operand.hbm [shape: f32[1,32], index: 2, kind: input, shape index: {}]   ;;  %s1002_s3 = inlined_call_operand.hbm [shape: f32[2,24,32], index: 3, kind: output, shape index: {}]  }
   0x1   :  { %10 = vsyncpa [#allocation3 + $0x1], 0 }
   0x2   :  { %11 = vsyncpa [#allocation6], 0 }
   0x3   :  { %12 = vsyncpa [#allocation4], 0 }
   0x4   :  { %14 = vsyncpa [#allocation4 + $0x1], 0  ;;  %s737_s12 = smov 0   ;;  %s739_s13 = smov 0  }
   0x5   :  { %s741_s14 = smov 0   ;;  %s743_s15 = smov 0  }
   0x6   :  { %s745_s16 = smov 0   ;;  %s747_s17 = smov 0  }
   0x7 LB: > { %s423_s18 = sadd.s32 4294967295, %s707_s17   ;;  %s424_s19 = sadd.s32 4294967294, %s707_s17   ;;  %s707_s17 = sphi %s747_s17, %s20_s17   ;;  %s703_s16 = sphi %s745_s16, %s1028_s16   ;;  %s699_s15 = sphi %s743_s15, %s1027_s15   ;;  %s695_s14 = sphi %s741_s14, %s1026_s14   ;;  %s691_s13 = sphi %s739_s13, %s1025_s13   ;;  %s687_s12 = sphi %s737_s12, %s1024_s12  }
   0x8   : > { %s41_s20 = sadd.s32 1, %s695_s14  ;;  %p48_p0 = scmp.ne.s32.totalorder %s695_s14, %s691_s13 }
   0x9   : > { %p49_p1 = scmp.eq.s32.totalorder %s707_s17, 0  ;;  %p54_p2 = scmp.ne.s32.totalorder %s691_s13, %s687_s12 }
   0xa   : > { %p775_p3 = scmp.eq.s32.totalorder %s423_s18, 0  ;;  %p122_p4 = scmp.eq.s32.totalorder %s423_s18, 1 }
   0xb   : > { %p779_p5 = por %p49_p1, %p48_p0  ;;  %p128_p6 = scmp.eq.s32.totalorder %s424_s19, 1 }
   0xc   : > { %s1009_s21 = scalar_select %p775_p3, 1, 0 }
   0xd   : > { %p785_p7 = por %p775_p3, %p54_p2  ;;  %p789_p8 = por %p122_p4, %p48_p0 }
   0xe   : > { %p793_p9 = por %p128_p6, %p54_p2  ;;  %p425_p10 = scmp.ge.s32.totalorder %s707_s17, 1 }
   0xf   : > { %s1011_s23 = scalar_select %p785_p7, 1, 0 }
  0x10   : > { %s1012_s24 = scalar_select %p789_p8, 1, 0 }
  0x11   : > { %s1013_s25 = scalar_select %p793_p9, 1, 0 }
  0x12   : > { %p135_p11 = scmp.lt.s32.totalorder %s707_s17, 3  ;;  %s709_s27 = smov [#allocation5]  }
  0x13   : > { %s148_s28 = sshll.u32 %s709_s27, 4  ;;  %p471_p1 = scmp.lt.s32.totalorder %s707_s17, 2  ;;  %s149_s28 = int_to_ptr.vmem [resolvable:$true] %s148_s28 }
  0x14   : > { %p800_p13 = pnand %p425_p10, %p135_p11  ;;  %s710_s30 = smov [#allocation7]  }
  0x15   : > { %p809_p4 = pnand %p471_p1, %p779_p5  ;;  %s159_s4 = sshll.u32 %s710_s30, 4  ;;  %s819_s4 = int_to_ptr.vmem [resolvable:$true] %s159_s4 }
  0x16   : > { %s1014_s26 = scalar_select %p800_p13, 1, 0 }
  0x17   : > { %p454_p0 = pneg %p800_p13  ;;  %s535_s8 = scalar_lea.hbm %s1000_s1, 16 }
  0x18   : > { %s1015_s29 = scalar_select %p809_p4, 1, 0 }
  0x19   : > { %p815_p2 = pnand %p454_p0, %p775_p3  ;;  %p536_p5 = scmp.ne.s32.totalorder %s1000_s1, %s535_s8 }
  0x1a   : > { %p542_p1 = scmp.lt.u32.totalorder %s535_s8, %s1000_s1 }
  0x1b   : > { %p537_p6 = pneg %p815_p2 }
  0x1d   : > { %p538_p10 = pnand %p537_p6, %p536_p5 }
  0x1f   : > { %p539_p11 = pneg %p538_p10 }
  0x21   : > { %p544_p0 = pnand %p542_p1, %p539_p11 }
  0x23   : > { %547 = shalt.err (!%p544_p0)
}
  0x24   : > { %s548_s19 = scalar_lea.vmem %s149_s28, 16  ;;  %s555_s22 = scalar_lea.vmem %s149_s28, 32 }
  0x25   : > { %p549_p12 = scmp.ne.s32.totalorder %s149_s28, %s548_s19  ;;  %p556_p3 = scmp.lt.s32.totalorder %s149_s28, %s149_s28 }
  0x26   : > { %p557_p7 = scmp.lt.s32.totalorder %s555_s22, %s548_s19 }
  0x27   : > { %p551_p9 = pnand %p549_p12, %p537_p6 }
  0x28   : > { %p558_p13 = por %p557_p7, %p556_p3 }
  0x29   : > { %p552_p8 = pneg %p551_p9 }
  0x2b   : > { %p559_p4 = pnand %p558_p13, %p552_p8 }
  0x2d   : > { %562 = shalt.err (!%p559_p4)
}
  0x2e   : > { %457 = dma.hbm_to_vmem [thread:$0]  (!%p815_p2), %s1000_s1, 16, %s149_s28, [#allocation6]  }
  0x2f   : > { %s563_s8 = scalar_lea.hbm %s1001_s2, 16 }
  0x30   : > { %p564_p9 = scmp.ne.s32.totalorder %s1001_s2, %s563_s8  ;;  %p570_p8 = scmp.lt.u32.totalorder %s563_s8, %s1001_s2 }
  0x32   : > { %p566_p3 = pnand %p564_p9, %p537_p6 }
  0x34   : > { %p567_p7 = pneg %p566_p3 }
  0x36   : > { %p572_p12 = pnand %p570_p8, %p567_p7 }
  0x38   : > { %575 = shalt.err (!%p572_p12)
}
  0x39   : > { %s576_s28 = scalar_lea.vmem %s819_s4, 16  ;;  %s583_s19 = scalar_lea.vmem %s819_s4, 32 }
  0x3a   : > { %p577_p13 = scmp.ne.s32.totalorder %s819_s4, %s576_s28  ;;  %p584_p10 = scmp.lt.s32.totalorder %s819_s4, %s819_s4 }
  0x3b   : > { %p585_p11 = scmp.lt.s32.totalorder %s583_s19, %s576_s28 }
  0x3c   : > { %p579_p4 = pnand %p577_p13, %p537_p6 }
  0x3d   : > { %p586_p1 = por %p585_p11, %p584_p10 }
  0x3e   : > { %p580_p5 = pneg %p579_p4 }
  0x40   : > { %p587_p0 = pnand %p586_p1, %p580_p5 }
  0x42   : > { %590 = shalt.err (!%p587_p0)
}
  0x43   : > { %460 = dma.hbm_to_vmem [thread:$0]  (!%p815_p2), %s1001_s2, 16, %s819_s4, [#allocation6]  }
  0x44   : > { %s32_s30 = sadd.s32 1, %s703_s16  ;;  %s170_s6 = sand.u32 1, %s695_s14  }
  0x45   : > { %p34_p6 = scmp.ge.s32.totalorder %s32_s30, 2  ;;  %s438_s7 = smul.u32 24, %s170_s6 }
  0x46   : > { %s439_s5 = smul.u32 384, %s703_s16  ;;  %s888_s19 = scalar_lea.sflag [#allocation3], %s170_s6 }
  0x47   : > { %s1030_s30 = smov (%p34_p6, %s32_s30), 0  ;;  %s174_s9 = scalar_lea.vmem [#allocation2], %s438_s7 }
  0x48   : > { %s36_s8 = ssub.s32 %s703_s16, %s1030_s30  ;;  %s183_s10 = sshll.u32 %s174_s9, 4  ;;  %s881_s10 = int_to_ptr.vmem [resolvable:$true] %s183_s10 }
  0x49   : > { %p39_p9 = scmp.eq.s32.totalorder %s36_s8, 0  ;;  %s879_s28 = scalar_lea.hbm %s999_s0, %s439_s5 }
  0x4a   : > { %s591_s22 = scalar_lea.hbm %s879_s28, 384  ;;  %p1017_p3 = scmp.ne.s32.totalorder %s1015_s29, 0 }
  0x4b   : > { %s886_s4 = scalar_select %p39_p9, %s695_s14, %s41_s20  }
  0x4c   : > { %p592_p2 = scmp.ne.s32.totalorder %s879_s28, %s591_s22  ;;  %p593_p7 = pneg %p1017_p3 }
  0x4d   : > { %s596_s5 = scalar_lea.hbm %s999_s0, 768  ;;  %p597_p13 = scmp.lt.u32.totalorder %s879_s28, %s999_s0 }
  0x4e   : > { %p594_p8 = pnand %p593_p7, %p592_p2  ;;  %p598_p4 = scmp.lt.u32.totalorder %s596_s5, %s591_s22 }
  0x4f   : > { %p600_p10 = scmp.lt.u32.totalorder %s591_s22, %s879_s28 }
  0x50   : > { %p595_p12 = pneg %p594_p8  ;;  %p599_p5 = por %p598_p4, %p597_p13 }
  0x52   : > { %p601_p11 = por %p600_p10, %p599_p5 }
  0x54   : > { %p602_p1 = pnand %p601_p11, %p595_p12 }
  0x56   : > { %605 = shalt.err (!%p602_p1)
}
  0x57   : > { %s606_s20 = scalar_lea.vmem %s881_s10, 384  ;;  %s711_s6 = smov [#allocation2]  }
  0x58   : > { %p607_p0 = scmp.ne.s32.totalorder %s881_s10, %s606_s20  ;;  %s611_s11 = sshll.u32 %s711_s6, 4  ;;  %s612_s11 = int_to_ptr.vmem [resolvable:$false] %s611_s11 }
  0x59   : > { %s613_s18 = scalar_lea.vmem %s612_s11, 768  ;;  %p614_p2 = scmp.lt.s32.totalorder %s881_s10, %s612_s11 }
  0x5a   : > { %p609_p6 = pnand %p607_p0, %p593_p7  ;;  %p615_p8 = scmp.lt.s32.totalorder %s613_s18, %s606_s20 }
  0x5c   : > { %p610_p9 = pneg %p609_p6  ;;  %p616_p13 = por %p615_p8, %p614_p2 }
  0x5e   : > { %p617_p4 = pnand %p616_p13, %p610_p9 }
  0x60   : > { %620 = shalt.err (!%p617_p4)
}
  0x61   : > { %s712_s22 = smov 128   ;;  %s713_s27 = smov 8  }
  0x62   : > { %464 = dma.hbm_to_vmem [thread:$0]  (!%p1017_p3), %s879_s28, 384, %s881_s10, %s888_s19, %s712_s22, %s712_s22, %s713_s27  }
  0x63   : > { %p1018_p7 = scmp.ne.s32.totalorder %s1014_s26, 0 }
  0x64   : > { %s919_s7 = sand.u32 (!%p1018_p7), 1, %s691_s13   ;;  %p1019_p12 = scmp.ne.s32.totalorder (!%p1018_p7), %s1011_s23, 0 }
  0x65   : > { %195 = sbr.rel (%p1018_p7) target bundleno = 446 (0x1be), region = 32  ;;  %s198_s8 = scalar_lea.sflag (!%p1018_p7), [#allocation3], %s919_s7 }
  0x66   : > { %s440_s5 = smul.u32 (!%p1018_p7), 24, %s919_s7 }
  0x68   : > { %s201_s9 = scalar_lea.vmem (!%p1018_p7), [#allocation2], %s440_s5 }
  0x6c   : > { %674 = dma.done.wait (%p1019_p12), %s198_s8, 384  }
  0x6d   : > { %676 = vsyncadd (%p1019_p12), %s198_s8, 4294966912  ;;  %p1020_p3 = scmp.ne.s32.totalorder %s1009_s21, 0 }
  0x6f   : > { %678 = dma.done.wait (%p1020_p3), [#allocation6], 32  }
  0x70   : > { %680 = vsyncadd (%p1020_p3), [#allocation6], 4294967264  ;;  %vm237_vm0 = vcmask 261120   ;;  %v234_v0 = vld [vmem:[%s201_s9] sm:$0xff]  ;;  %v236_v1 = vld [vmem:[%s201_s9 + $0x10] sm:$0xff]  ;;  %s441_s21 = smul.u32 384, %s699_s15 }
  0x71   : > { %v235_v2 = vld [vmem:[%s201_s9 + $0x8] sm:$0xff]  ;;  %v238_v3 = vsel %vm237_vm0, %v234_v0, 0.0  ;;  %v244_v4 = vsel %vm237_vm0, %v236_v1, 0.0  ;;  %v433_v31 = vld [vmem:[#allocation5] ss:$0 sm:$0xff]  ;;  %s231_s23 = scalar_lea.vmem [#allocation8], %s440_s5 }
  0x72   : > { %239 = vadd.xlane.f32.xlu0 %v238_v3  ;;  %245 = vadd.xlane.f32.xlu1 %v244_v4  ;;  %v241_v5 = vsel %vm237_vm0, %v235_v2, 0.0  ;;  %v434_v33 = vld [vmem:[#allocation7] ss:$0 sm:$0xff]  ;;  %s317_s26 = sshll.u32 %s231_s23, 4  ;;  %s946_s28 = scalar_lea.hbm %s1002_s3, %s441_s21  ;;  %s948_s26 = int_to_ptr.vmem [resolvable:$true] %s317_s26 }
  0x73   : > { %s302_s15 = scalar_lea.sflag [#allocation4], %s919_s7  ;;  %s621_s19 = scalar_lea.vmem %s948_s26, 384 }
  0x74   : > { %p622_p5 = scmp.ne.s32.totalorder %s948_s26, %s621_s19  ;;  %p1021_p10 = scmp.ne.s32.totalorder %s1012_s24, 0 }
  0x75   : > { %s714_s20 = smov [#allocation8]  }
  0x76   : > { %242 = vadd.xlane.f32.xlu0 %v241_v5  ;;  %p623_p11 = pnand %p622_p5, %p1021_p10  ;;  %s625_s6 = sshll.u32 %s714_s20, 4  ;;  %s626_s6 = int_to_ptr.vmem [resolvable:$false] %s625_s6 }
  0x77   : > { %s627_s11 = scalar_lea.vmem %s626_s6, 768  ;;  %p628_p0 = scmp.lt.s32.totalorder %s948_s26, %s626_s6 }
  0x78   : > { %p624_p1 = pneg %p623_p11  ;;  %p629_p6 = scmp.lt.s32.totalorder %s627_s11, %s621_s19 }
  0x7a   : > { %p630_p9 = por %p629_p6, %p628_p0 }
  0x7c   : > { %p631_p2 = pnand %p630_p9, %p624_p1 }
  0xff   : > { %v240_v6 = vpop.xlane.xlu0 %239  ;;  %v246_v7 = vpop.xlane.xlu1 %245 }
 0x100   : > { %v248_v8 = vmul.f32 0.03125, %v240_v6  ;;  %v250_v9 = vmul.f32 0.03125, %v246_v7 }
 0x102   : > { %v251_v10 = vsub.f32 %v234_v0, %v248_v8  ;;  %v253_v11 = vsub.f32 %v236_v1, %v250_v9 }
 0x103   : > { %v243_v12 = vpop.xlane.xlu0 %242 }
 0x104   : > { %v249_v13 = vmul.f32 0.03125, %v243_v12  ;;  %v254_v14 = vmul.f32 %v251_v10, %v251_v10  ;;  %v256_v15 = vmul.f32 %v253_v11, %v253_v11 }
 0x106   : > { %v252_v16 = vsub.f32 %v235_v2, %v249_v13  ;;  %v257_v17 = vsel %vm237_vm0, %v254_v14, 0.0  ;;  %v263_v18 = vsel %vm237_vm0, %v256_v15, 0.0 }
 0x107   : > { %258 = vadd.xlane.f32.xlu1 %v257_v17 }
 0x108   : > { %v255_v19 = vmul.f32 %v252_v16, %v252_v16 }
 0x10a   : > { %v260_v20 = vsel %vm237_vm0, %v255_v19, 0.0 }
 0x10b   : > { %264 = vadd.xlane.f32.xlu1 %v263_v18  ;;  %261 = vadd.xlane.f32.xlu0 %v260_v20 }
 0x194   : > { %v259_v21 = vpop.xlane.xlu1 %258 }
 0x195   : > { %v266_v22 = vmul.f32 0.03125, %v259_v21 }
 0x197   : > { %v269_v23 = vadd.f32 1e-05, %v266_v22 }
 0x198   : > { %v265_v24 = vpop.xlane.xlu1 %264  ;;  %v262_v25 = vpop.xlane.xlu0 %261 }
 0x199   : > { %529 = vrsqrt.f32 %v269_v23  ;;  %v268_v26 = vmul.f32 0.03125, %v265_v24  ;;  %v267_v27 = vmul.f32 0.03125, %v262_v25 }
 0x19b   : > { %v271_v28 = vadd.f32 1e-05, %v268_v26  ;;  %v270_v29 = vadd.f32 1e-05, %v267_v27 }
 0x19d   : > { %531 = vrsqrt.f32 %v271_v28 }
 0x19e   : > { %533 = vrsqrt.f32 %v270_v29 }
 0x1a3   : > { %v530_v30 = vpop.eup %529 }
 0x1a4   : > { %v275_v32 = vmul.f32 %v530_v30, %v251_v10 }
 0x1a6   : > { %v285_v34 = vmul.f32 %v433_v31, %v275_v32 }
 0x1a7   : > { %v532_v35 = vpop.eup %531 }
 0x1a8   : > { %v534_v36 = vpop.eup %533  ;;  %v295_v37 = vadd.f32 %v434_v33, %v285_v34  ;;  %v277_v38 = vmul.f32 %v532_v35, %v253_v11 }
 0x1a9   : > { %v276_v39 = vmul.f32 %v534_v36, %v252_v16 }
 0x1aa   : > { %v287_v40 = vmul.f32 %v433_v31, %v277_v38  ;;  %298 = vst.msk [vmem:[%s231_s23] sm:$0xff] %vm237_vm0, %v295_v37 }
 0x1ab   : > { %v286_v41 = vmul.f32 %v433_v31, %v276_v39 }
 0x1ac   : > { %v297_v42 = vadd.f32 %v434_v33, %v287_v40 }
 0x1ad   : > { %v296_v43 = vadd.f32 %v434_v33, %v286_v41 }
 0x1ae   : > { %300 = vst.msk [vmem:[%s231_s23 + $0x10] sm:$0xff] %vm237_vm0, %v297_v42 }
 0x1af   : > { %299 = vst.msk [vmem:[%s231_s23 + $0x8] sm:$0xff] %vm237_vm0, %v296_v43 }
 0x1b0   : > { %634 = shalt.err (!%p631_p2)
}
 0x1b1   : > { %s635_s18 = scalar_lea.hbm %s946_s28, 384  ;;  %s639_s5 = scalar_lea.hbm %s1002_s3, 768 }
 0x1b2   : > { %p636_p8 = scmp.ne.s32.totalorder %s946_s28, %s635_s18  ;;  %p640_p7 = scmp.lt.u32.totalorder %s946_s28, %s1002_s3 }
 0x1b3   : > { %p641_p12 = scmp.lt.u32.totalorder %s639_s5, %s635_s18  ;;  %p643_p5 = scmp.lt.u32.totalorder %s635_s18, %s946_s28 }
 0x1b4   : > { %p637_p13 = pnand %p636_p8, %p1021_p10 }
 0x1b5   : > { %p642_p3 = por %p641_p12, %p640_p7 }
 0x1b6   : > { %p638_p4 = pneg %p637_p13 }
 0x1b7   : > { %p644_p11 = por %p643_p5, %p642_p3 }
 0x1b9   : > { %p645_p1 = pnand %p644_p11, %p638_p4 }
 0x1bb   : > { %648 = shalt.err (!%p645_p1)
}
 0x1bc   : > { %s715_s21 = smov 128   ;;  %s716_s23 = smov 8  }
 0x1bd   : > { %452 = dma.vmem_to_hbm [thread:$0]  (%p1021_p10), %s948_s26, 384, %s946_s28, %s302_s15, %s715_s21, %s715_s21, %s716_s23  }
 0x1be PF: > { %s332_s29 = sand.u32 1, %s687_s12   ;;  %p1022_p0 = scmp.ne.s32.totalorder %s1013_s25, 0 }
 0x1bf   : > { %p1023_p6 = scmp.ge.s32.totalorder %s707_s17, 2  ;;  %s333_s10 = scalar_lea.sflag [#allocation4], %s332_s29 }
 0x1c1   : > { %p466_p9 = pnand %p1023_p6, %p1022_p0 }
 0x1c3   : > { %682 = dma.done.wait (!%p466_p9), %s333_s10, 384  }
 0x1c4   : > { %684 = vsyncadd (!%p466_p9), %s333_s10, 4294966912  ;;  %s20_s17 = sadd.s32 1, %s707_s17   ;;  %s1024_s12 = smov %s691_s13 }
 0x1c5   : > { %p17_p2 = scmp.ge.s32.totalorder %s20_s17, 4   ;;  %s1025_s13 = smov %s695_s14 }
 0x1c6   : > { %s1026_s14 = smov %s886_s4  ;;  %s1027_s15 = smov %s703_s16 }
 0x1c7   : > { %s1028_s16 = smov %s1030_s30  ;;  %19 = sbr.rel (!%p17_p2) target bundleno = 7 (0x7), region = 85 }
 0x1ce   :  { %338 = vsyncpa [#allocation3], 1 }
 0x1cf   :  { %340 = vsyncpa [#allocation3 + $0x1], 1 }
 0x1d0   :  { %341 = vsyncpa [#allocation6], 1 }
 0x1d1   :  { %342 = vsyncpa [#allocation4], 1 }
 0x1d2   :  { %344 = vsyncpa [#allocation4 + $0x1], 1 }

// kernel: audio_encoder_forward.13
= control target key start
LH: loop header
LB: loop body
LE: loop exit
PB: predicated region body
PF: predicated region fallthrough
CT: control target
= control target key end

     0   :  { %s2464_s0 = inlined_call_operand.hbm [shape: f32[2,24,32], index: 0, kind: input, shape index: {}]   ;;  %s2465_s1 = inlined_call_operand.hbm [shape: bf16[2,24,32], index: 1, kind: input, shape index: {}]   ;;  %s2466_s2 = inlined_call_operand.hbm [shape: bf16[32,32], index: 2, kind: input, shape index: {}]   ;;  %s2467_s3 = inlined_call_operand.hbm [shape: f32[1,32], index: 3, kind: input, shape index: {}]   ;;  %s2468_s4 = inlined_call_operand.hbm [shape: f32[1,32], index: 4, kind: input, shape index: {}]   ;;  %s2469_s5 = inlined_call_operand.hbm [shape: f32[1,32], index: 5, kind: input, shape index: {}]   ;;  %s2470_s6 = inlined_call_operand.hbm [shape: bf16[32,128], index: 6, kind: input, shape index: {}]   ;;  %s2471_s7 = inlined_call_operand.hbm [shape: f32[1,128], index: 7, kind: input, shape index: {}]   ;;  %s2472_s8 = inlined_call_operand.hbm [shape: bf16[128,32], index: 8, kind: input, shape index: {}]   ;;  %s2473_s9 = inlined_call_operand.hbm [shape: f32[1,32], index: 9, kind: input, shape index: {}]   ;;  %s2474_s10 = inlined_call_operand.hbm [shape: f32[2,24,32], index: 10, kind: output, shape index: {}]  }
   0x1   :  { %2484 = sst [smem:[#allocation32_spill]] %s2464_s0 }
   0x2   :  { %2485 = sst [smem:[#allocation33_spill]] %s2465_s1 }
   0x3   :  { %2486 = sst [smem:[#allocation34_spill]] %s2466_s2 }
   0x4   :  { %2487 = sst [smem:[#allocation35_spill]] %s2467_s3 }
   0x5   :  { %2488 = sst [smem:[#allocation36_spill]] %s2468_s4 }
   0x6   :  { %2489 = sst [smem:[#allocation37_spill]] %s2469_s5 }
   0x7   :  { %2490 = sst [smem:[#allocation38_spill]] %s2470_s6 }
   0x8   :  { %2491 = sst [smem:[#allocation39_spill]] %s2471_s7 }
   0x9   :  { %2492 = sst [smem:[#allocation40_spill]] %s2472_s8 }
   0xa   :  { %2493 = sst [smem:[#allocation41_spill]] %s2474_s10 }
   0xb   :  { %15 = vsyncpa [#allocation5], 0 }
   0xc   :  { %17 = vsyncpa [#allocation5 + $0x1], 0 }
   0xd   :  { %18 = vsyncpa [#allocation8], 0 }
   0xe   :  { %20 = vsyncpa [#allocation8 + $0x1], 0 }
   0xf   :  { %21 = vsyncpa [#allocation11], 0 }
  0x10   :  { %22 = vsyncpa [#allocation14], 0 }
  0x11   :  { %23 = vsyncpa [#allocation17], 0 }
  0x12   :  { %24 = vsyncpa [#allocation20], 0 }
  0x13   :  { %25 = vsyncpa [#allocation6], 0 }
  0x14   :  { %27 = vsyncpa [#allocation6 + $0x1], 0  ;;  %s1998_s13 = smov 0   ;;  %s2000_s14 = smov 0  }
  0x15   :  { %s2002_s15 = smov 0   ;;  %s2004_s16 = smov 0  }
  0x16   :  { %s2006_s17 = smov 0   ;;  %s2008_s18 = smov 0  }
  0x17 LB: > { %2494 = sst [smem:[#allocation30_spill]] %s1916_s16  ;;  %s2029_s19 = sadd.s32 4294967295, %s1924_s18   ;;  %s1924_s18 = sphi %s2008_s18, %s33_s18   ;;  %s1920_s17 = sphi %s2006_s17, %s2537_s17   ;;  %s1916_s16 = sphi %s2004_s16, %s2536_s16   ;;  %s1912_s15 = sphi %s2002_s15, %s2535_s15   ;;  %s1908_s14 = sphi %s2000_s14, %s2534_s14   ;;  %s1904_s13 = sphi %s1998_s13, %s2533_s13  }
  0x18   : > { %p1236_p0 = scmp.ge.s32.totalorder %s1924_s18, 1  ;;  %p2478_p1 = scmp.eq.s32.totalorder %s2029_s19, 0 }
  0x19   : > { %p324_p2 = scmp.lt.s32.totalorder %s1924_s18, 3  ;;  %s1926_s21 = smov [#allocation9]  }
  0x1a   : > { %s336_s22 = sshll.u32 %s1926_s21, 4  ;;  %s1927_s24 = smov [#allocation10]   ;;  %s2038_s22 = int_to_ptr.vmem [resolvable:$true] %s336_s22 }
  0x1b   : > { %p2034_p3 = pnand %p1236_p0, %p324_p2  ;;  %s350_s25 = sshll.u32 %s1927_s24, 4  ;;  %s2049_s25 = int_to_ptr.vmem [resolvable:$true] %s350_s25 }
  0x1c   : > { %s1928_s26 = smov [#allocation13]   ;;  %s2498_s2 = sld [smem:[#allocation34_spill]] }
  0x1d   : > { %s2495_s20 = scalar_select %p2034_p3, 1, 0 }
  0x1e   : > { %p1390_p4 = pneg %p2034_p3  ;;  %s2051_s27 = sshll.u32 %s1928_s26, 4  ;;  %s373_s27 = int_to_ptr.vmem [resolvable:$true] %s2051_s27 }
  0x1f   : > { %2496 = sst [smem:[#allocation31_spill]] %s2495_s20 }
  0x20   : > { %p2045_p6 = pnand %p1390_p4, %p2478_p1 }
  0x22   : > { %s1534_s30 = scalar_lea.hbm %s2498_s2, 256  ;;  %p2061_p8 = pneg %p2045_p6 }
  0x23   : > { %p1535_p7 = scmp.ne.s32.totalorder %s2498_s2, %s1534_s30  ;;  %p1541_p11 = scmp.lt.u32.totalorder %s1534_s30, %s2498_s2 }
  0x25   : > { %p1537_p9 = pnand %p2061_p8, %p1535_p7 }
  0x27   : > { %p1538_p10 = pneg %p1537_p9 }
  0x29   : > { %p1543_p12 = pnand %p1541_p11, %p1538_p10 }
  0x2b   : > { %1546 = shalt.err (!%p1543_p12)
}
  0x2c   : > { %s1547_s28 = scalar_lea.vmem %s2038_s22, 256  ;;  %p1555_p4 = scmp.lt.s32.totalorder %s2038_s22, %s2038_s22 }
  0x2d   : > { %p1548_p13 = scmp.ne.s32.totalorder %s2038_s22, %s1547_s28  ;;  %p1556_p5 = scmp.lt.s32.totalorder %s1547_s28, %s1547_s28 }
  0x2f   : > { %p1550_p0 = pnand %p1548_p13, %p2061_p8  ;;  %p1557_p7 = por %p1556_p5, %p1555_p4 }
  0x31   : > { %p1551_p2 = pneg %p1550_p0 }
  0x33   : > { %p1558_p9 = pnand %p1557_p7, %p1551_p2 }
  0x35   : > { %1561 = shalt.err (!%p1558_p9)
}
  0x36   : > { %s2480_s29 = smov 64   ;;  %s2482_s30 = smov 4  }
  0x37   : > { %1393 = dma.hbm_to_vmem [thread:$0]  (!%p2045_p6), %s2498_s2, 256, %s2038_s22, [#allocation8], %s2480_s29, %s2480_s29, %s2482_s30  }
  0x38   : > { %s2500_s3 = sld [smem:[#allocation35_spill]] }
  0x3e   : > { %s1562_s28 = scalar_lea.hbm %s2500_s3, 16 }
  0x3f   : > { %p1563_p5 = scmp.ne.s32.totalorder %s2500_s3, %s1562_s28  ;;  %p1569_p12 = scmp.lt.u32.totalorder %s1562_s28, %s2500_s3 }
  0x41   : > { %p1565_p10 = pnand %p1563_p5, %p2061_p8 }
  0x43   : > { %p1566_p11 = pneg %p1565_p10 }
  0x45   : > { %p1571_p13 = pnand %p1569_p12, %p1566_p11 }
  0x47   : > { %1574 = shalt.err (!%p1571_p13)
}
  0x48   : > { %s1575_s22 = scalar_lea.vmem %s2049_s25, 16  ;;  %s1582_s10 = scalar_lea.vmem %s2049_s25, 32 }
  0x49   : > { %p1576_p0 = scmp.ne.s32.totalorder %s2049_s25, %s1575_s22  ;;  %p1583_p7 = scmp.lt.s32.totalorder %s2049_s25, %s2049_s25 }
  0x4a   : > { %p1584_p9 = scmp.lt.s32.totalorder %s1582_s10, %s1575_s22 }
  0x4b   : > { %p1578_p2 = pnand %p1576_p0, %p2061_p8 }
  0x4c   : > { %p1585_p5 = por %p1584_p9, %p1583_p7 }
  0x4d   : > { %p1579_p4 = pneg %p1578_p2 }
  0x4f   : > { %p1586_p10 = pnand %p1585_p5, %p1579_p4 }
  0x51   : > { %1589 = shalt.err (!%p1586_p10)
}
  0x52   : > { %1396 = dma.hbm_to_vmem [thread:$0]  (!%p2045_p6), %s2500_s3, 16, %s2049_s25, [#allocation11]  }
  0x53   : > { %s2501_s5 = sld [smem:[#allocation37_spill]] }
  0x59   : > { %s1590_s12 = scalar_lea.hbm %s2501_s5, 16 }
  0x5a   : > { %p1591_p11 = scmp.ne.s32.totalorder %s2501_s5, %s1590_s12  ;;  %p1597_p0 = scmp.lt.u32.totalorder %s1590_s12, %s2501_s5 }
  0x5c   : > { %p1593_p12 = pnand %p1591_p11, %p2061_p8 }
  0x5e   : > { %p1594_p13 = pneg %p1593_p12 }
  0x60   : > { %p1599_p2 = pnand %p1597_p0, %p1594_p13 }
  0x62   : > { %1602 = shalt.err (!%p1599_p2)
}
  0x63   : > { %s1603_s10 = scalar_lea.vmem %s373_s27, 16  ;;  %s1610_s25 = scalar_lea.vmem %s373_s27, 32 }
  0x64   : > { %p1604_p4 = scmp.ne.s32.totalorder %s373_s27, %s1603_s10  ;;  %p1611_p5 = scmp.lt.s32.totalorder %s373_s27, %s373_s27 }
  0x65   : > { %p1612_p10 = scmp.lt.s32.totalorder %s1610_s25, %s1603_s10 }
  0x66   : > { %p1606_p7 = pnand %p1604_p4, %p2061_p8 }
  0x67   : > { %p1613_p1 = por %p1612_p10, %p1611_p5 }
  0x68   : > { %p1607_p9 = pneg %p1606_p7 }
  0x6a   : > { %p1614_p3 = pnand %p1613_p1, %p1607_p9 }
  0x6c   : > { %1617 = shalt.err (!%p1614_p3)
}
  0x6d   : > { %1402 = dma.hbm_to_vmem [thread:$0]  (!%p2045_p6), %s2501_s5, 16, %s373_s27, [#allocation14]  }
  0x6e   : > { %s1931_s20 = smov [#allocation16]   ;;  %s1932_s12 = smov [#allocation12]  }
  0x6f   : > { %s400_s11 = sshll.u32 %s1931_s20, 4  ;;  %s361_s24 = sshll.u32 %s1932_s12, 4  ;;  %s401_s11 = int_to_ptr.vmem [resolvable:$true] %s400_s11  ;;  %s362_s24 = int_to_ptr.vmem [resolvable:$true] %s361_s24 }
  0x70   : > { %s2502_s7 = sld [smem:[#allocation39_spill]] }
  0x76   : > { %s1618_s22 = scalar_lea.hbm %s2502_s7, 16 }
  0x77   : > { %p1619_p1 = scmp.ne.s32.totalorder %s2502_s7, %s1618_s22  ;;  %p1625_p12 = scmp.lt.u32.totalorder %s1618_s22, %s2502_s7 }
  0x79   : > { %p1621_p3 = pnand %p1619_p1, %p2061_p8 }
  0x7b   : > { %p1622_p11 = pneg %p1621_p3 }
  0x7d   : > { %p1627_p13 = pnand %p1625_p12, %p1622_p11 }
  0x7f   : > { %1630 = shalt.err (!%p1627_p13)
}
  0x80   : > { %s1631_s27 = scalar_lea.vmem %s401_s11, 16  ;;  %s1638_s16 = scalar_lea.vmem %s401_s11, 32 }
  0x81   : > { %p1632_p0 = scmp.ne.s32.totalorder %s401_s11, %s1631_s27  ;;  %p1639_p7 = scmp.lt.s32.totalorder %s401_s11, %s401_s11 }
  0x82   : > { %p1640_p9 = scmp.lt.s32.totalorder %s1638_s16, %s1631_s27 }
  0x83   : > { %p1634_p2 = pnand %p1632_p0, %p2061_p8 }
  0x84   : > { %p1641_p5 = por %p1640_p9, %p1639_p7 }
  0x85   : > { %p1635_p4 = pneg %p1634_p2 }
  0x87   : > { %p1642_p10 = pnand %p1641_p5, %p1635_p4 }
  0x89   : > { %1645 = shalt.err (!%p1642_p10)
}
  0x8a   : > { %1408 = dma.hbm_to_vmem [thread:$0]  (!%p2045_p6), %s2502_s7, 16, %s401_s11, [#allocation17]  }
  0x8b   : > { %s2503_s4 = sld [smem:[#allocation36_spill]] }
  0x91   : > { %s1646_s28 = scalar_lea.hbm %s2503_s4, 16 }
  0x92   : > { %p1647_p1 = scmp.ne.s32.totalorder %s2503_s4, %s1646_s28  ;;  %p1653_p12 = scmp.lt.u32.totalorder %s1646_s28, %s2503_s4 }
  0x94   : > { %p1649_p3 = pnand %p1647_p1, %p2061_p8 }
  0x96   : > { %p1650_p11 = pneg %p1649_p3 }
  0x98   : > { %p1655_p13 = pnand %p1653_p12, %p1650_p11 }
  0x9a   : > { %1658 = shalt.err (!%p1655_p13)
}
  0x9b   : > { %s1659_s27 = scalar_lea.vmem %s362_s24, 16  ;;  %s1666_s11 = scalar_lea.vmem %s362_s24, 32 }
  0x9c   : > { %p1660_p0 = scmp.ne.s32.totalorder %s362_s24, %s1659_s27  ;;  %p1667_p7 = scmp.lt.s32.totalorder %s362_s24, %s362_s24 }
  0x9d   : > { %p1668_p9 = scmp.lt.s32.totalorder %s1666_s11, %s1659_s27 }
  0x9e   : > { %p1662_p2 = pnand %p1660_p0, %p2061_p8 }
  0x9f   : > { %p1669_p5 = por %p1668_p9, %p1667_p7 }
  0xa0   : > { %p1663_p4 = pneg %p1662_p2 }
  0xa2   : > { %p1670_p10 = pnand %p1669_p5, %p1663_p4 }
  0xa4   : > { %1673 = shalt.err (!%p1670_p10)
}
  0xa5   : > { %1399 = dma.hbm_to_vmem [thread:$0]  (!%p2045_p6), %s2503_s4, 16, %s362_s24, [#allocation11]  }
  0xa6   : > { %s1933_s12 = smov [#allocation15]   ;;  %s1934_s26 = smov [#allocation18]  }
  0xa7   : > { %s384_s29 = sshll.u32 %s1933_s12, 4  ;;  %s413_s28 = sshll.u32 %s1934_s26, 4  ;;  %s385_s29 = int_to_ptr.vmem [resolvable:$true] %s384_s29  ;;  %s414_s28 = int_to_ptr.vmem [resolvable:$true] %s413_s28 }
  0xa8   : > { %s2504_s6 = sld [smem:[#allocation38_spill]] }
  0xae   : > { %s1674_s25 = scalar_lea.hbm %s2504_s6, 256 }
  0xaf   : > { %p1675_p1 = scmp.ne.s32.totalorder %s2504_s6, %s1674_s25  ;;  %p1681_p12 = scmp.lt.u32.totalorder %s1674_s25, %s2504_s6 }
  0xb1   : > { %p1677_p3 = pnand %p1675_p1, %p2061_p8 }
  0xb3   : > { %p1678_p11 = pneg %p1677_p3 }
  0xb5   : > { %p1683_p13 = pnand %p1681_p12, %p1678_p11 }
  0xb7   : > { %1686 = shalt.err (!%p1683_p13)
}
  0xb8   : > { %s1687_s24 = scalar_lea.vmem %s385_s29, 256  ;;  %p1695_p7 = scmp.lt.s32.totalorder %s385_s29, %s385_s29 }
  0xb9   : > { %p1688_p0 = scmp.ne.s32.totalorder %s385_s29, %s1687_s24  ;;  %p1696_p9 = scmp.lt.s32.totalorder %s1687_s24, %s1687_s24 }
  0xbb   : > { %p1690_p2 = pnand %p1688_p0, %p2061_p8  ;;  %p1697_p5 = por %p1696_p9, %p1695_p7 }
  0xbd   : > { %p1691_p4 = pneg %p1690_p2 }
  0xbf   : > { %p1698_p10 = pnand %p1697_p5, %p1691_p4 }
  0xc1   : > { %1701 = shalt.err (!%p1698_p10)
}
  0xc2   : > { %s2505_s20 = smov 64   ;;  %s2506_s8 = sld [smem:[#allocation40_spill]] }
  0xc3   : > { %1405 = dma.hbm_to_vmem [thread:$0]  (!%p2045_p6), %s2504_s6, 256, %s385_s29, [#allocation14], %s2505_s20, %s2505_s20, %s2482_s30  }
  0xc8   : > { %s1702_s25 = scalar_lea.hbm %s2506_s8, 1024 }
  0xc9   : > { %p1703_p1 = scmp.ne.s32.totalorder %s2506_s8, %s1702_s25  ;;  %p1709_p12 = scmp.lt.u32.totalorder %s1702_s25, %s2506_s8 }
  0xcb   : > { %p1705_p3 = pnand %p1703_p1, %p2061_p8 }
  0xcd   : > { %p1706_p11 = pneg %p1705_p3 }
  0xcf   : > { %p1711_p13 = pnand %p1709_p12, %p1706_p11 }
  0xd1   : > { %1714 = shalt.err (!%p1711_p13)
}
  0xd2   : > { %s1715_s24 = scalar_lea.vmem %s414_s28, 1024  ;;  %p1723_p7 = scmp.lt.s32.totalorder %s414_s28, %s414_s28 }
  0xd3   : > { %p1716_p0 = scmp.ne.s32.totalorder %s414_s28, %s1715_s24  ;;  %p1724_p9 = scmp.lt.s32.totalorder %s1715_s24, %s1715_s24 }
  0xd5   : > { %p1718_p2 = pnand %p1716_p0, %p2061_p8  ;;  %p1725_p5 = por %p1724_p9, %p1723_p7 }
  0xd7   : > { %p1719_p4 = pneg %p1718_p2 }
  0xd9   : > { %p1726_p10 = pnand %p1725_p5, %p1719_p4 }
  0xdb   : > { %1729 = shalt.err (!%p1726_p10)
}
  0xdc   : > { %1411 = dma.hbm_to_vmem [thread:$0]  (!%p2045_p6), %s2506_s8, 1024, %s414_s28, [#allocation17], %s2505_s20, %s2505_s20, %s2482_s30  }
  0xdd   : > { %s1935_s26 = smov [#allocation19]   ;;  %s1730_s1 = scalar_lea.hbm %s2473_s9, 16 }
  0xde   : > { %s427_s22 = sshll.u32 %s1935_s26, 4  ;;  %p1731_p1 = scmp.ne.s32.totalorder %s2473_s9, %s1730_s1  ;;  %s428_s22 = int_to_ptr.vmem [resolvable:$true] %s427_s22 }
  0xdf   : > { %p1737_p12 = scmp.lt.u32.totalorder %s1730_s1, %s2473_s9 }
  0xe0   : > { %p1733_p3 = pnand %p1731_p1, %p2061_p8 }
  0xe2   : > { %p1734_p11 = pneg %p1733_p3 }
  0xe4   : > { %p1739_p13 = pnand %p1737_p12, %p1734_p11 }
  0xe6   : > { %1742 = shalt.err (!%p1739_p13)
}
  0xe7   : > { %s1743_s28 = scalar_lea.vmem %s428_s22, 16  ;;  %s1750_s29 = scalar_lea.vmem %s428_s22, 32 }
  0xe8   : > { %p1744_p0 = scmp.ne.s32.totalorder %s428_s22, %s1743_s28  ;;  %p1751_p7 = scmp.lt.s32.totalorder %s428_s22, %s428_s22 }
  0xe9   : > { %p1752_p9 = scmp.lt.s32.totalorder %s1750_s29, %s1743_s28 }
  0xea   : > { %p1746_p2 = pnand %p1744_p0, %p2061_p8 }
  0xeb   : > { %p1753_p5 = por %p1752_p9, %p1751_p7 }
  0xec   : > { %p1747_p4 = pneg %p1746_p2 }
  0xee   : > { %p1754_p10 = pnand %p1753_p5, %p1747_p4 }
  0xf0   : > { %1757 = shalt.err (!%p1754_p10)
}
  0xf1   : > { %1414 = dma.hbm_to_vmem [thread:$0]  (!%p2045_p6), %s2473_s9, 16, %s428_s22, [#allocation20]  }
  0xf2   : > { %s1235_s21 = sadd.s32 4294967294, %s1924_s18   ;;  %s52_s10 = sadd.s32 1, %s1920_s17 }
  0xf3   : > { %p54_p8 = scmp.ge.s32.totalorder %s52_s10, 2  ;;  %s61_s23 = sadd.s32 1, %s1912_s15 }
  0xf4   : > { %p68_p1 = scmp.ne.s32.totalorder %s1912_s15, %s1908_s14  ;;  %p69_p3 = scmp.eq.s32.totalorder %s1924_s18, 0 }
  0xf5   : > { %s2539_s10 = smov (%p54_p8, %s52_s10), 0  ;;  %p74_p12 = scmp.ne.s32.totalorder %s1908_s14, %s1904_s13 }
  0xf6   : > { %p2232_p11 = por %p69_p3, %p68_p1  ;;  %s56_s22 = ssub.s32 %s1920_s17, %s2539_s10 }
  0xf7   : > { %p311_p6 = scmp.eq.s32.totalorder %s2029_s19, 1  ;;  %p59_p13 = scmp.eq.s32.totalorder %s56_s22, 0 }
  0xf8   : > { %p2508_p0 = scmp.eq.s32.totalorder %s2029_s19, 0  ;;  %p317_p7 = scmp.eq.s32.totalorder %s1235_s21, 1 }
  0xf9   : > { %p2247_p4 = por %p311_p6, %p68_p1  ;;  %p1434_p5 = scmp.lt.s32.totalorder %s1924_s18, 2 }
  0xfa   : > { %p2243_p2 = por %p2508_p0, %p74_p12  ;;  %p2254_p9 = por %p317_p7, %p74_p12 }
  0xfb   : > { %s2510_s27 = scalar_select %p2247_p4, 1, 0 }
  0xfc   : > { %s2252_s11 = scalar_select %p59_p13, %s1912_s15, %s61_s23  }
  0xfd   : > { %s2511_s16 = scalar_select %p2254_p9, 1, 0 }
  0xfe   : > { %s2260_s24 = sand.u32 1, %s1912_s15   ;;  %s1346_s28 = smul.u32 384, %s1920_s17 }
  0xff   : > { %s1345_s29 = smul.u32 24, %s2260_s24  ;;  %s2512_s0 = sld [smem:[#allocation32_spill]] }
 0x100   : > { %p2271_p10 = pnand %p1434_p5, %p2232_p11  ;;  %s439_s2 = scalar_lea.sflag [#allocation5], %s2260_s24 }
 0x101   : > { %s442_s23 = scalar_lea.vmem [#allocation4], %s1345_s29 }
 0x102   : > { %s451_s30 = sshll.u32 %s442_s23, 4  ;;  %p1760_p1 = pneg %p2271_p10  ;;  %s2275_s30 = int_to_ptr.vmem [resolvable:$true] %s451_s30 }
 0x105   : > { %s2267_s22 = scalar_lea.hbm %s2512_s0, %s1346_s28  ;;  %s1763_s12 = scalar_lea.hbm %s2512_s0, 768 }
 0x106   : > { %s1758_s3 = scalar_lea.hbm %s2267_s22, 384  ;;  %p1764_p11 = scmp.lt.u32.totalorder %s2267_s22, %s2512_s0 }
 0x107   : > { %p1759_p8 = scmp.ne.s32.totalorder %s2267_s22, %s1758_s3  ;;  %p1765_p6 = scmp.lt.u32.totalorder %s1763_s12, %s1758_s3 }
 0x108   : > { %p1767_p0 = scmp.lt.u32.totalorder %s1758_s3, %s2267_s22 }
 0x109   : > { %p1761_p3 = pnand %p1760_p1, %p1759_p8  ;;  %p1766_p13 = por %p1765_p6, %p1764_p11 }
 0x10b   : > { %p1762_p12 = pneg %p1761_p3  ;;  %p1768_p7 = por %p1767_p0, %p1766_p13 }
 0x10d   : > { %p1769_p5 = pnand %p1768_p7, %p1762_p12 }
 0x10f   : > { %1772 = shalt.err (!%p1769_p5)
}
 0x110   : > { %s1773_s29 = scalar_lea.vmem %s2275_s30, 384  ;;  %s1936_s23 = smov [#allocation4]  }
 0x111   : > { %p1774_p8 = scmp.ne.s32.totalorder %s2275_s30, %s1773_s29  ;;  %s1778_s25 = sshll.u32 %s1936_s23, 4  ;;  %s1779_s25 = int_to_ptr.vmem [resolvable:$false] %s1778_s25 }
 0x112   : > { %s1780_s4 = scalar_lea.vmem %s1779_s25, 768  ;;  %p1781_p4 = scmp.lt.s32.totalorder %s2275_s30, %s1779_s25 }
 0x113   : > { %p1776_p3 = pnand %p1774_p8, %p1760_p1  ;;  %p1782_p11 = scmp.lt.s32.totalorder %s1780_s4, %s1773_s29 }
 0x115   : > { %p1777_p9 = pneg %p1776_p3  ;;  %p1783_p6 = por %p1782_p11, %p1781_p4 }
 0x117   : > { %p1784_p13 = pnand %p1783_p6, %p1777_p9 }
 0x119   : > { %1787 = shalt.err (!%p1784_p13)
}
 0x11a   : > { %s1937_s3 = smov 128   ;;  %s1938_s28 = smov 8  }
 0x11b   : > { %1418 = dma.hbm_to_vmem [thread:$0]  (!%p2271_p10), %s2267_s22, 384, %s2275_s30, %s439_s2, %s1937_s3, %s1937_s3, %s1938_s28  }
 0x11c   : > { %s461_s12 = sand.u32 1, %s1924_s18   ;;  %s1347_s26 = smul.u32 12, %s2260_s24 }
 0x11d   : > { %s1348_s23 = smul.u32 192, %s1920_s17  ;;  %s2514_s4 = sld [smem:[#allocation33_spill]] }
 0x11e   : > { %s465_s5 = scalar_lea.vmem [#allocation7], %s1347_s26  ;;  %s2315_s7 = scalar_lea.sflag [#allocation8], %s461_s12 }
 0x11f   : > { %s474_s6 = sshll.u32 %s465_s5, 4  ;;  %s2313_s6 = int_to_ptr.vmem [resolvable:$true] %s474_s6 }
 0x123   : > { %s2311_s0 = scalar_lea.hbm %s2514_s4, %s1348_s23  ;;  %s1793_s24 = scalar_lea.hbm %s2514_s4, 384 }
 0x124   : > { %s1788_s8 = scalar_lea.hbm %s2311_s0, 192  ;;  %p1794_p0 = scmp.lt.u32.totalorder %s2311_s0, %s2514_s4 }
 0x125   : > { %p1789_p4 = scmp.ne.s32.totalorder %s2311_s0, %s1788_s8  ;;  %p1795_p7 = scmp.lt.u32.totalorder %s1793_s24, %s1788_s8 }
 0x126   : > { %p1797_p8 = scmp.lt.u32.totalorder %s1788_s8, %s2311_s0 }
 0x127   : > { %p1791_p9 = pnand %p1789_p4, %p1760_p1  ;;  %p1796_p5 = por %p1795_p7, %p1794_p0 }
 0x129   : > { %p1792_p12 = pneg %p1791_p9  ;;  %p1798_p3 = por %p1797_p8, %p1796_p5 }
 0x12b   : > { %p1799_p11 = pnand %p1798_p3, %p1792_p12 }
 0x12d   : > { %1802 = shalt.err (!%p1799_p11)
}
 0x12e   : > { %s1803_s5 = scalar_lea.vmem %s2313_s6, 192  ;;  %s1939_s28 = smov [#allocation7]  }
 0x12f   : > { %p1804_p6 = scmp.ne.s32.totalorder %s2313_s6, %s1803_s5  ;;  %s1808_s12 = sshll.u32 %s1939_s28, 4  ;;  %s1809_s12 = int_to_ptr.vmem [resolvable:$false] %s1808_s12 }
 0x130   : > { %s1810_s26 = scalar_lea.vmem %s1809_s12, 384  ;;  %p1811_p9 = scmp.lt.s32.totalorder %s2313_s6, %s1809_s12 }
 0x131   : > { %p1806_p13 = pnand %p1804_p6, %p1760_p1  ;;  %p1812_p0 = scmp.lt.s32.totalorder %s1810_s26, %s1803_s5 }
 0x133   : > { %p1807_p4 = pneg %p1806_p13  ;;  %p1813_p7 = por %p1812_p0, %p1811_p9 }
 0x135   : > { %p1814_p5 = pnand %p1813_p7, %p1807_p4 }
 0x137   : > { %1817 = shalt.err (!%p1814_p5)
}
 0x138   : > { %s2515_s8 = smov 4   ;;  %s2516_s23 = sld [smem:[#allocation31_spill]] }
 0x139   : > { %1421 = dma.hbm_to_vmem [thread:$0]  (!%p2271_p10), %s2311_s0, 192, %s2313_s6, %s2315_s7, %s2505_s20, %s2505_s20, %s2515_s8  }
 0x13e   : > { %p2517_p1 = scmp.ne.s32.totalorder %s2516_s23, 0 }
 0x13f   : > { %s2347_s29 = sand.u32 (!%p2517_p1), 1, %s1908_s14  }
 0x140   : > { %486 = sbr.rel (%p2517_p1) target bundleno = 1390 (0x56e), region = 60  ;;  %s489_s2 = scalar_lea.sflag (!%p2517_p1), [#allocation5], %s2347_s29 }
 0x141   : > { %s1349_s25 = smul.u32 (!%p2517_p1), 24, %s2347_s29 }
 0x143   : > { %s2353_s21 = scalar_lea.vmem (!%p2517_p1), [#allocation4], %s1349_s25 }
 0x147   : > { %1871 = dma.done.wait (%p2243_p2), %s489_s2, 384  }
 0x148   : > { %1873 = vsyncadd (%p2243_p2), %s489_s2, 4294966912  ;;  %s497_s0 = sand.u32 1, %s2029_s19   ;;  %s1350_s6 = smul.u32 12, %s2347_s29 }
 0x149   : > { %s498_s7 = scalar_lea.sflag [#allocation8], %s497_s0 }
 0x14a   : > { %s501_s20 = scalar_lea.vmem [#allocation7], %s1350_s6 }
 0x14b   : > { %1875 = dma.done.wait (%p2243_p2), %s498_s7, 192  }
 0x14c   : > { %1877 = vsyncadd (%p2243_p2), %s498_s7, 4294967104  ;;  %p2518_p10 = scmp.eq.s32.totalorder %s2029_s19, 0 }
 0x14e   : > { %1879 = dma.done.wait (%p2518_p10), [#allocation8], 256   ;;  %p2519_p12 = pmov %p2518_p10 }
 0x14f   : > { %p2520_p8 = pmov %p2518_p10 }
 0x150   : > { %1881 = vsyncadd (%p2519_p12), [#allocation8], 4294967040 }
 0x151   : > { %1883 = dma.done.wait (%p2520_p8), [#allocation11], 32   ;;  %p2521_p3 = pmov %p2520_p8 }
 0x153   : > { %1885 = vsyncadd (%p2521_p3), [#allocation11], 4294967264  ;;  %p2522_p11 = pmov %p2521_p3 }
 0x154   : > { %p2523_p6 = pmov %p2521_p3 }
 0x155   : > { %1887 = dma.done.wait (%p2522_p11), [#allocation14], 272  }
 0x156   : > { %1889 = vsyncadd (%p2523_p6), [#allocation14], 4294967024  ;;  %p2524_p2 = pmov %p2521_p3 }
 0x158   : > { %1891 = dma.done.wait (%p2524_p2), [#allocation17], 1040   ;;  %p2525_p13 = pmov %p2524_p2 }
 0x159   : > { %p2526_p4 = pmov %p2524_p2 }
 0x15a   : > { %1893 = vsyncadd (%p2525_p13), [#allocation17], 4294966256 }
 0x15b   : > { %1895 = dma.done.wait (%p2526_p4), [#allocation20], 16   ;;  %p2527_p9 = pmov %p2524_p2 }
 0x15c   : > { %v1506_v0 = vld [vmem:[#allocation9] sm:$0xff]   ;;  %v1507_v1 = vld [vmem:[#allocation9 + $0x8] sm:$0xff]   ;;  %vm614_vm0 = vcmask 261120   ;;  %v1509_v3 = vld [vmem:[%s501_s20 + $0x8] ss:$0 sps:$4 sm:$0xff]   ;;  %vm755_vm1 = vcmask 257024  }
 0x15d   : > { %1897 = vsyncadd (%p2527_p9), [#allocation20], 4294967280  ;;  %1309 = vmatprep.subr.bf16.mxu1 %v1506_v0  ;;  %v1508_v2 = vld [vmem:[%s501_s20] sm:$0xff]   ;;  %v1263_v7 = vld [vmem:[#allocation10] ss:$0 sm:$0xff]  ;;  %s2528_s19 = sld [smem:[#allocation30_spill]] }
 0x15e   : > { %1310 = vmatpush3.bf16.msra.mxu1 %v1506_v0  ;;  %1313 = vmatprep.mubr.msk.bf16.mxu1 %vm614_vm0, %v1508_v2  ;;  %v586_v4 = vld [vmem:[%s2353_s21 + $0x10] sm:$0xff]  ;;  %v584_v5 = vld [vmem:[%s2353_s21] sm:$0xff]  ;;  %v585_v10 = vld [vmem:[%s2353_s21 + $0x8] sm:$0xff]  ;;  %s574_s30 = scalar_lea.vmem [#allocation21], %s1349_s25  ;;  %s2529_s5 = sld [smem:[#allocation41_spill]] }
 0x15f   : > { %1311 = vmatprep.subr.bf16.mxu1 %v1507_v1  ;;  %v1269_v11 = vld [vmem:[#allocation19] ss:$0 sm:$0xff]  ;;  %v1510_v40 = vld [vmem:[#allocation15] sm:$0xff]   ;;  %v1511_v41 = vld [vmem:[#allocation15 + $0x8] sm:$0xff]   ;;  %s1036_s24 = sshll.u32 %s574_s30, 4  ;;  %s1021_s12 = scalar_lea.sflag [#allocation6], %s2347_s29  ;;  %s2413_s24 = int_to_ptr.vmem [resolvable:$true] %s1036_s24 }
 0x160   : > { %v1264_v52 = vld [vmem:[#allocation12] ss:$0 sm:$0xff]  ;;  %v1265_v54 = vld [vmem:[#allocation13] ss:$0 sm:$0xff]  ;;  %s1818_s26 = scalar_lea.vmem %s2413_s24, 384  ;;  %p2530_p7 = scmp.ne.s32.totalorder %s2510_s27, 0 }
 0x161   : > { %p1819_p0 = scmp.ne.s32.totalorder %s2413_s24, %s1818_s26  ;;  %s1940_s8 = smov [#allocation21]  }
 0x162   : > { %1312 = vmatpush3.bf16.msra.mxu1 %v1507_v1  ;;  %s1822_s23 = sshll.u32 %s1940_s8, 4  ;;  %s1823_s23 = int_to_ptr.vmem [resolvable:$false] %s1822_s23 }
 0x163   : > { %1317 = vmatprep.subr.bf16.mxu1 %v1510_v40  ;;  %s1351_s1 = smul.u32 384, %s2528_s19  ;;  %p1820_p5 = pnand %p1819_p0, %p2530_p7 }
 0x164   : > { %s1824_s25 = scalar_lea.vmem %s1823_s23, 768  ;;  %p1825_p10 = scmp.lt.s32.totalorder %s2413_s24, %s1823_s23 }
 0x165   : > { %1314 = vmatmul.mubr.msk.bf16.vlgmr.msra.gmra.mrb[0].mxu1 %vm614_vm0, %v1509_v3  ;;  %s2411_s28 = scalar_lea.hbm %s2529_s5, %s1351_s1  ;;  %p1821_p1 = pneg %p1820_p5 }
 0x166   : > { %1318 = vmatpush3.bf16.msra.mxu1 %v1510_v40  ;;  %p1826_p12 = scmp.lt.s32.totalorder %s1824_s25, %s1818_s26 }
 0x167   : > { %1319 = vmatprep.subr.bf16.mxu1 %v1511_v41 }
 0x168   : > { %p1827_p8 = por %p1826_p12, %p1825_p10 }
 0x16a   : > { %1320 = vmatpush3.bf16.msra.mxu1 %v1511_v41  ;;  %p1828_p3 = pnand %p1827_p8, %p1821_p1 }
 0x238   : > { %v1315_v6 = vpop.f32.mrb[0].mxu1 }
 0x239   : > { %v671_v8 = vadd.f32 %v1315_v6, %v586_v4  ;;  %v655_v9 = vpop.f32.mrb[1].mxu1  ;;  %v1514_v6 = vld [vmem:[#allocation18] sm:$0xff]  }
 0x23a   : > { %v669_v12 = vadd.f32 %v655_v9, %v584_v5  ;;  %v1316_v13 = vpop.f32.mrb[2].mxu1  ;;  %1325 = vmatprep.subr.bf16.mxu0 %v1514_v6  ;;  %v1517_v9 = vld [vmem:[#allocation18 + $0x18] sm:$0xff]  }
 0x23b   : > { %v681_v14 = vadd.f32 %v1263_v7, %v671_v8  ;;  %v658_v15 = vpop.f32.mrb[3].mxu1  ;;  %1326 = vmatpush3.bf16.msra.mxu0 %v1514_v6  ;;  %v1516_v8 = vld [vmem:[#allocation18 + $0x10] sm:$0xff]   ;;  %v1521_v13 = vld [vmem:[#allocation18 + $0x38] sm:$0xff]  }
 0x23c   : > { %v679_v16 = vadd.f32 %v1263_v7, %v669_v12  ;;  %v670_v17 = vadd.f32 %v658_v15, %v585_v10  ;;  %v1518_v10 = vld [vmem:[#allocation18 + $0x20] sm:$0xff]   ;;  %v1520_v12 = vld [vmem:[#allocation18 + $0x30] sm:$0xff]  }
 0x23d   : > { %v768_v18 = vadd.f32 %v1269_v11, %v681_v14  ;;  %v688_v19 = vsel %vm614_vm0, %v681_v14, 0.0 }
 0x23e   : > { %v766_v20 = vadd.f32 %v1269_v11, %v679_v16  ;;  %v680_v21 = vadd.f32 %v1263_v7, %v670_v17  ;;  %689 = vadd.xlane.f32.xlu1 %v688_v19  ;;  %v682_v22 = vsel %vm614_vm0, %v679_v16, 0.0  ;;  %v1515_v7 = vld [vmem:[#allocation18 + $0x8] sm:$0xff]  }
 0x23f   : > { %771 = vst.msk [vmem:[#allocation2 + $0x10] sm:$0xff] %vm614_vm0, %v768_v18  ;;  %683 = vadd.xlane.f32.xlu0 %v682_v22  ;;  %1327 = vmatprep.subr.bf16.mxu0 %v1515_v7 }
 0x240   : > { %769 = vst.msk [vmem:[#allocation2] sm:$0xff] %vm614_vm0, %v766_v20  ;;  %v767_v23 = vadd.f32 %v1269_v11, %v680_v21  ;;  %v685_v24 = vsel %vm614_vm0, %v680_v21, 0.0  ;;  %1328 = vmatpush3.bf16.msra.mxu0 %v1515_v7  ;;  %v1519_v11 = vld [vmem:[#allocation18 + $0x28] sm:$0xff]  }
 0x241   : > { %1329 = vmatprep.subr.bf16.mxu0 %v1516_v8 }
 0x242   : > { %770 = vst.msk [vmem:[#allocation2 + $0x8] sm:$0xff] %vm614_vm0, %v767_v23 }
 0x243   : > { %686 = vadd.xlane.f32.xlu0 %v685_v24 }
 0x244   : > { %1330 = vmatpush3.bf16.msra.mxu0 %v1516_v8 }
 0x245   : > { %1331 = vmatprep.subr.bf16.mxu0 %v1517_v9 }
 0x248   : > { %1332 = vmatpush3.bf16.msra.mxu0 %v1517_v9 }
 0x249   : > { %1333 = vmatprep.subr.bf16.mxu0 %v1518_v10 }
 0x24c   : > { %1334 = vmatpush3.bf16.msra.mxu0 %v1518_v10 }
 0x24d   : > { %1335 = vmatprep.subr.bf16.mxu0 %v1519_v11 }
 0x250   : > { %1336 = vmatpush3.bf16.msra.mxu0 %v1519_v11 }
 0x251   : > { %1337 = vmatprep.subr.bf16.mxu0 %v1520_v12 }
 0x254   : > { %1338 = vmatpush3.bf16.msra.mxu0 %v1520_v12 }
 0x255   : > { %1339 = vmatprep.subr.bf16.mxu0 %v1521_v13 }
 0x258   : > { %1340 = vmatpush3.bf16.msra.mxu0 %v1521_v13 }
 0x2cb   : > { %v690_v25 = vpop.xlane.xlu1 %689 }
 0x2cc   : > { %v694_v26 = vmul.f32 0.03125, %v690_v25  ;;  %v684_v27 = vpop.xlane.xlu0 %683 }
 0x2cd   : > { %v692_v28 = vmul.f32 0.03125, %v684_v27 }
 0x2ce   : > { %v697_v29 = vsub.f32 %v681_v14, %v694_v26  ;;  %v1270_v14 = vld [vmem:[#allocation16] ss:$0 sm:$0xff] }
 0x2cf   : > { %v695_v30 = vsub.f32 %v679_v16, %v692_v28 }
 0x2d0   : > { %v687_v31 = vpop.xlane.xlu0 %686  ;;  %v700_v36 = vmul.f32 %v697_v29, %v697_v29 }
 0x2d1   : > { %v693_v32 = vmul.f32 0.03125, %v687_v31  ;;  %v698_v33 = vmul.f32 %v695_v30, %v695_v30 }
 0x2d2   : > { %v707_v38 = vsel %vm614_vm0, %v700_v36, 0.0 }
 0x2d3   : > { %v696_v34 = vsub.f32 %v680_v21, %v693_v32  ;;  %v701_v35 = vsel %vm614_vm0, %v698_v33, 0.0 }
 0x2d4   : > { %702 = vadd.xlane.f32.xlu1 %v701_v35 }
 0x2d5   : > { %v699_v37 = vmul.f32 %v696_v34, %v696_v34 }
 0x2d7   : > { %v704_v39 = vsel %vm614_vm0, %v699_v37, 0.0 }
 0x2d8   : > { %708 = vadd.xlane.f32.xlu1 %v707_v38  ;;  %705 = vadd.xlane.f32.xlu0 %v704_v39 }
 0x361   : > { %v703_v42 = vpop.xlane.xlu1 %702 }
 0x362   : > { %v710_v43 = vmul.f32 0.03125, %v703_v42 }
 0x364   : > { %v713_v44 = vadd.f32 1e-05, %v710_v43 }
 0x365   : > { %v709_v45 = vpop.xlane.xlu1 %708  ;;  %v706_v46 = vpop.xlane.xlu0 %705 }
 0x366   : > { %1522 = vrsqrt.f32 %v713_v44  ;;  %v712_v47 = vmul.f32 0.03125, %v709_v45  ;;  %v711_v48 = vmul.f32 0.03125, %v706_v46 }
 0x368   : > { %v715_v49 = vadd.f32 1e-05, %v712_v47  ;;  %v714_v50 = vadd.f32 1e-05, %v711_v48 }
 0x36a   : > { %1524 = vrsqrt.f32 %v715_v49 }
 0x36b   : > { %1526 = vrsqrt.f32 %v714_v50 }
 0x370   : > { %v1523_v51 = vpop.eup %1522 }
 0x371   : > { %v719_v53 = vmul.f32 %v1523_v51, %v695_v30  ;;  %v890_v51 = vld [vmem:[#allocation2 + $0x10] sm:$0xff] }
 0x373   : > { %v729_v55 = vmul.f32 %v1264_v52, %v719_v53 }
 0x374   : > { %v1525_v56 = vpop.eup %1524 }
 0x375   : > { %v1527_v57 = vpop.eup %1526  ;;  %v739_v58 = vadd.f32 %v1265_v54, %v729_v55  ;;  %v721_v59 = vmul.f32 %v1525_v56, %v697_v29 }
 0x376   : > { %v720_v60 = vmul.f32 %v1527_v57, %v696_v34 }
 0x377   : > { %v1288_v61 = vpack.c.bf16 %v739_v58, %v739_v58  ;;  %v731_v62 = vmul.f32 %v1264_v52, %v721_v59  ;;  %v889_v58 = vld [vmem:[#allocation2 + $0x8] sm:$0xff] }
 0x378   : > { %v730_v63 = vmul.f32 %v1264_v52, %v720_v60 }
 0x379   : > { %756 = vst.msk [vmem:[#allocation3] sm:$0xf] %vm755_vm1, %v1288_v61  ;;  %v741_v0 = vadd.f32 %v1265_v54, %v731_v62 }
 0x37a   : > { %v740_v1 = vadd.f32 %v1265_v54, %v730_v63  ;;  %v888_v54 = vld [vmem:[#allocation2] sm:$0xff] }
 0x37b   : > { %v1290_v2 = vpack.c.bf16 %v741_v0, %v741_v0 }
 0x37c   : > { %v1289_v3 = vpack.c.bf16 %v740_v1, %v740_v1 }
 0x37d   : > { %758 = vst.msk [vmem:[#allocation3 + $0x8] sm:$0xf] %vm755_vm1, %v1290_v2 }
 0x37e   : > { %757 = vst.msk [vmem:[#allocation3 + $0x4] sm:$0xf] %vm755_vm1, %v1289_v3 }
 0x384   : > { %v1513_v4 = vld [vmem:[#allocation3 + $0x8] ss:$0 sps:$4 sm:$0xff]  }
 0x385   : > { %v1512_v5 = vld [vmem:[#allocation3] sm:$0xff]  }
 0x386   : > { %1321 = vmatprep.mubr.msk.bf16.mxu1 %vm614_vm0, %v1512_v5 }
 0x387   : > { %1322 = vmatmul.mubr.msk.bf16.vlgmr.msra.gmra.mrb[4].mxu1 %vm614_vm0, %v1513_v4 }
 0x45a   : > { %v1323_v15 = vpop.f32.mrb[4].mxu1 }
 0x45b   : > { %v856_v16 = vadd.f32 %v1323_v15, %v1270_v14  ;;  %v847_v17 = vpop.f32.mrb[5].mxu1 }
 0x45c   : > { %v848_v18 = vadd.f32 %v1270_v14, %v847_v17  ;;  %v1324_v19 = vpop.f32.mrb[6].mxu1 }
 0x45d   : > { %v863_v20 = vmul.f32 %v856_v16, %v856_v16  ;;  %v850_v21 = vpop.f32.mrb[7].mxu1 }
 0x45e   : > { %v861_v22 = vmul.f32 %v848_v18, %v848_v18  ;;  %v851_v23 = vadd.f32 %v1270_v14, %v850_v21 }
 0x45f   : > { %v866_v24 = vmul.f32 %v863_v20, %v856_v16 }
 0x460   : > { %v864_v25 = vmul.f32 %v861_v22, %v848_v18  ;;  %v862_v26 = vmul.f32 %v851_v23, %v851_v23 }
 0x461   : > { %v869_v27 = vmul.f32 0.044715, %v866_v24 }
 0x462   : > { %v867_v28 = vmul.f32 0.044715, %v864_v25  ;;  %v865_v29 = vmul.f32 %v862_v26, %v851_v23 }
 0x463   : > { %v872_v30 = vadd.f32 %v869_v27, %v856_v16 }
 0x464   : > { %v868_v31 = vmul.f32 0.044715, %v865_v29  ;;  %v870_v32 = vadd.f32 %v867_v28, %v848_v18 }
 0x465   : > { %v875_v33 = vmul.f32 0.7978846, %v872_v30 }
 0x466   : > { %v871_v34 = vadd.f32 %v868_v31, %v851_v23  ;;  %v873_v35 = vmul.f32 0.7978846, %v870_v32 }
 0x467   : > { %1528 = vtanh.f32 %v875_v33 }
 0x468   : > { %v874_v36 = vmul.f32 0.7978846, %v871_v34  ;;  %1530 = vtanh.f32 %v873_v35 }
 0x46a   : > { %1532 = vtanh.f32 %v874_v36 }
 0x471   : > { %v1529_v37 = vpop.eup %1528 }
 0x472   : > { %v1531_v38 = vpop.eup %1530  ;;  %v881_v39 = vadd.f32 1.0, %v1529_v37 }
 0x473   : > { %v879_v40 = vadd.f32 1.0, %v1531_v38 }
 0x474   : > { %v1533_v41 = vpop.eup %1532  ;;  %v884_v42 = vmul.f32 0.5, %v881_v39 }
 0x475   : > { %v880_v43 = vadd.f32 1.0, %v1533_v41  ;;  %v882_v44 = vmul.f32 0.5, %v879_v40 }
 0x476   : > { %v887_v46 = vmul.f32 %v884_v42, %v856_v16 }
 0x477   : > { %v883_v45 = vmul.f32 0.5, %v880_v43  ;;  %v885_v47 = vmul.f32 %v882_v44, %v848_v18 }
 0x478   : > { %v892_v50 = vpack.c.bf16 %v887_v46, %v887_v46 }
 0x479   : > { %v886_v48 = vmul.f32 %v883_v45, %v851_v23 }
 0x47b   : > { %v891_v49 = vpack.c.bf16 %v886_v48, %v885_v47 }
 0x47d   : > { %1341 = vmatprep.mubr.bf16.mxu0 %v891_v49 }
 0x47e   : > { %1342 = vmatmul.mubr.bf16.vlgmr.msra.gmra.mrb[0].mxu0 %v892_v50 }
 0x551   : > { %v1343_v52 = vpop.f32.mrb[0].mxu0 }
 0x552   : > { %v1007_v53 = vadd.f32 %v1343_v52, %v890_v51  ;;  %v991_v55 = vpop.f32.mrb[1].mxu0 }
 0x553   : > { %v1005_v56 = vadd.f32 %v991_v55, %v888_v54  ;;  %v1344_v57 = vpop.f32.mrb[2].mxu0 }
 0x554   : > { %1010 = vst.msk [vmem:[#allocation2 + $0x10] sm:$0xff] %vm614_vm0, %v1007_v53  ;;  %v994_v59 = vpop.f32.mrb[3].mxu0 }
 0x555   : > { %1008 = vst.msk [vmem:[#allocation2] sm:$0xff] %vm614_vm0, %v1005_v56  ;;  %v1006_v60 = vadd.f32 %v994_v59, %v889_v58 }
 0x557   : > { %1009 = vst.msk [vmem:[#allocation2 + $0x8] sm:$0xff] %vm614_vm0, %v1006_v60 }
 0x55b   : > { %v1016_v61 = vld [vmem:[#allocation2 + $0x10] sm:$0xff] }
 0x55c   : > { %v1014_v62 = vld [vmem:[#allocation2] sm:$0xff]  ;;  %1019 = vst.msk [vmem:[%s574_s30 + $0x10] sm:$0xff] %vm614_vm0, %v1016_v61 }
 0x55d   : > { %1017 = vst.msk [vmem:[%s574_s30] sm:$0xff] %vm614_vm0, %v1014_v62 }
 0x55e   : > { %v1015_v63 = vld [vmem:[#allocation2 + $0x8] sm:$0xff] }
 0x55f   : > { %1018 = vst.msk [vmem:[%s574_s30 + $0x8] sm:$0xff] %vm614_vm0, %v1015_v63 }
 0x560   : > { %1831 = shalt.err (!%p1828_p3)
}
 0x561   : > { %s1832_s2 = scalar_lea.hbm %s2411_s28, 384  ;;  %s1836_s6 = scalar_lea.hbm %s2529_s5, 768 }
 0x562   : > { %p1833_p11 = scmp.ne.s32.totalorder %s2411_s28, %s1832_s2  ;;  %p1837_p13 = scmp.lt.u32.totalorder %s2411_s28, %s2529_s5 }
 0x563   : > { %p1838_p4 = scmp.lt.u32.totalorder %s1836_s6, %s1832_s2  ;;  %p1840_p0 = scmp.lt.u32.totalorder %s1832_s2, %s2411_s28 }
 0x564   : > { %p1834_p6 = pnand %p1833_p11, %p2530_p7 }
 0x565   : > { %p1839_p9 = por %p1838_p4, %p1837_p13 }
 0x566   : > { %p1835_p2 = pneg %p1834_p6 }
 0x567   : > { %p1841_p5 = por %p1840_p0, %p1839_p9 }
 0x569   : > { %p1842_p1 = pnand %p1841_p5, %p1835_p2 }
 0x56b   : > { %1845 = shalt.err (!%p1842_p1)
}
 0x56c   : > { %s1941_s19 = smov 128   ;;  %s1942_s1 = smov 8  }
 0x56d   : > { %1388 = dma.vmem_to_hbm [thread:$0]  (%p2530_p7), %s2413_s24, 384, %s2411_s28, %s1021_s12, %s1941_s19, %s1941_s19, %s1942_s1  }
 0x56e PF: > { %s1051_s30 = sand.u32 1, %s1904_s13   ;;  %p2531_p10 = scmp.ne.s32.totalorder %s2511_s16, 0 }
 0x56f   : > { %p2532_p12 = scmp.ge.s32.totalorder %s1924_s18, 2  ;;  %s1052_s22 = scalar_lea.sflag [#allocation6], %s1051_s30 }
 0x571   : > { %p1423_p8 = pnand %p2532_p12, %p2531_p10 }
 0x573   : > { %1899 = dma.done.wait (!%p1423_p8), %s1052_s22, 384  }
 0x574   : > { %1901 = vsyncadd (!%p1423_p8), %s1052_s22, 4294966912  ;;  %s33_s18 = sadd.s32 1, %s1924_s18   ;;  %s2533_s13 = smov %s1908_s14 }
 0x575   : > { %p30_p3 = scmp.ge.s32.totalorder %s33_s18, 4   ;;  %s2534_s14 = smov %s1912_s15 }
 0x576   : > { %s2535_s15 = smov %s2252_s11  ;;  %s2536_s16 = smov %s1920_s17 }
 0x577   : > { %s2537_s17 = smov %s2539_s10  ;;  %32 = sbr.rel (!%p30_p3) target bundleno = 23 (0x17), region = 161 }
 0x57e   :  { %1057 = vsyncpa [#allocation5], 1 }
 0x57f   :  { %1059 = vsyncpa [#allocation5 + $0x1], 1 }
 0x580   :  { %1060 = vsyncpa [#allocation8], 1 }
 0x581   :  { %1062 = vsyncpa [#allocation8 + $0x1], 1 }
 0x582   :  { %1063 = vsyncpa [#allocation11], 1 }
 0x583   :  { %1064 = vsyncpa [#allocation14], 1 }
 0x584   :  { %1065 = vsyncpa [#allocation17], 1 }
 0x585   :  { %1066 = vsyncpa [#allocation20], 1 }
 0x586   :  { %1067 = vsyncpa [#allocation6], 1 }
 0x587   :  { %1069 = vsyncpa [#allocation6 + $0x1], 1 }

</bundles_post_ra>
